<compile_context>
chip_gen: v7x
topology: tpu7x:2x2x1
jax: 0.10.0
libtpu: 0.0.40
codegen_flags: <defaults>
</compile_context>

<pallas_src>
import functools

import jax
import jax.numpy as jnp
from jax.experimental import pallas as pl
from jax.experimental.pallas import tpu as pltpu

D_IN = 768
H1 = 512
H2 = 512
VOCAB = 2000           # synthetic stand-in for len(tokenizer) (~119547 in the original)
TILE_V_DEFAULT = 8192  # vocab tile; v6e can go 16384, keep <= 8192 on v7x (64 MiB VMEM/TC)
PRED_LANES = 128       # lane-dense slabs for the per-tile argmax partials
LN_EPS = 1e-5
NEG_BIG = -1e30        # bias for padded vocab columns so they never win the argmax


def _round_up(x, m):
    return ((x + m - 1) // m) * m


def _gelu_exact(x):
    # nn.GELU() default in PyTorch is the exact erf-based GELU.
    return 0.5 * x * (1.0 + jax.lax.erf(x * (2.0 ** -0.5)))


def mlm_head_kernel(x_ref, g_ref, be_ref,
                    w1_ref, b1_ref, w2_ref, b2_ref,
                    w3_ref, b3_ref,
                    out_ref, max_ref, idx_ref):
    j = pl.program_id(0)
    tile_v = out_ref.shape[-1]

    # ---- Stage 1: LN -> FC1 -> GELU -> FC2 -> GELU, recomputed per tile ----
    # (tiny vs. the W3 tile DMA; keeps the vocab axis free of cross-tile state
    #  so it can be "parallel" across TensorCores)
    x = x_ref[...]                                       # (N, 768) f32
    mean = jnp.mean(x, axis=-1, keepdims=True)
    xc = x - mean
    var = jnp.mean(xc * xc, axis=-1, keepdims=True)
    xn = (xc * jax.lax.rsqrt(var + LN_EPS)) * g_ref[...] + be_ref[...]

    h = jnp.dot(xn.astype(jnp.bfloat16), w1_ref[...],
                preferred_element_type=jnp.float32) + b1_ref[...]
    h = _gelu_exact(h)
    h = jnp.dot(h.astype(jnp.bfloat16), w2_ref[...],
                preferred_element_type=jnp.float32) + b2_ref[...]
    h = _gelu_exact(h).astype(jnp.bfloat16)              # (N, 512) bf16

    # ---- Stage 2: logits tile = h @ W3_tile + b3_tile (bf16 x bf16 -> f32) ----
    logits = jnp.dot(h, w3_ref[...],
                     preferred_element_type=jnp.float32) + b3_ref[...]

    # Per-tile argmax partials on pre-tanh logits (tanh is monotone; first
    # occurrence on in-tile ties).  Stored as lane-dense 128-wide slabs.
    tile_max = jnp.max(logits, axis=-1, keepdims=True)                    # (N, 1)
    iota = jax.lax.broadcasted_iota(jnp.int32, (1, tile_v), 1)            # (1, tile_v)
    tile_idx = jnp.min(jnp.where(logits == tile_max, iota, tile_v),
                       axis=-1, keepdims=True) + j * tile_v               # (N, 1)

    out_ref[...] = jnp.tanh(logits).astype(out_ref.dtype)
    max_ref[...] = jnp.broadcast_to(tile_max, max_ref.shape)
    idx_ref[...] = jnp.broadcast_to(tile_idx, idx_ref.shape)


def _vmem_limit_bytes(n_rows, tile_v):
    # double-buffered streamed blocks + resident stage-1 operands + headroom
    w3_dbl = 2 * H2 * tile_v * 2          # bf16 W3 tile, 2 buffers
    b3_dbl = 2 * tile_v * 4
    logits_dbl = 2 * n_rows * tile_v * 4
    slabs = 2 * 2 * n_rows * PRED_LANES * 4
    resident = 2 * (n_rows * D_IN * 4 + 2 * D_IN * 4
                    + D_IN * H1 * 2 + H1 * 4 + H1 * H2 * 2 + H2 * 4)
    return min(int(w3_dbl + b3_dbl + logits_dbl + slabs + resident) + (6 << 20),
               96 << 20)


def prepare_mlm_head_params(params, *, tile_v=TILE_V_DEFAULT):
    """One-time weight preparation (run at init/checkpoint-load time, NOT per
    forward call): pad the vocab axis, cast W1/W2/W3 to bf16, and pre-tile W3
    to (n_tiles, H2, tile_v) so each vocab tile is one contiguous DMA."""
    gamma, beta, w1, b1, w2, b2, w3, b3 = params
    V = w3.shape[1]

    tile_v = int(min(tile_v, _round_up(V, 128)))
    tile_v = max(128, _round_up(tile_v, 128))
    n_tiles = pl.cdiv(V, tile_v)
    v_pad = n_tiles * tile_v
    if v_pad != V:
        # Padded vocab columns get a huge negative bias so they never win the
        # argmax; the padded logits columns are sliced off in the wrapper.
        w3 = jnp.pad(w3, ((0, 0), (0, v_pad - V)))
        b3 = jnp.pad(b3, ((0, 0), (0, v_pad - V)), constant_values=NEG_BIG)

    w3_tiled = (w3.astype(jnp.bfloat16)
                  .reshape(H2, n_tiles, tile_v)
                  .transpose(1, 0, 2))                 # (n_tiles, H2, tile_v)

    return (gamma.astype(jnp.float32), beta.astype(jnp.float32),
            w1.astype(jnp.bfloat16), b1.astype(jnp.float32),
            w2.astype(jnp.bfloat16), b2.astype(jnp.float32),
            w3_tiled, b3.astype(jnp.float32))


@functools.partial(jax.jit, static_argnames=("vocab",))
def mlm_head_forward(x, prepped, *, vocab):
    gamma, beta, w1, b1, w2, b2, w3_tiled, b3 = prepped
    N = x.shape[0]
    n_tiles, _, tile_v = w3_tiled.shape
    v_pad = n_tiles * tile_v

    fixed = lambda shape: pl.BlockSpec(shape, lambda j: (0, 0))

    logits_pad, max_slab, idx_slab = pl.pallas_call(
        mlm_head_kernel,
        out_shape=(
            jax.ShapeDtypeStruct((N, v_pad), jnp.float32),
            jax.ShapeDtypeStruct((N, n_tiles * PRED_LANES), jnp.float32),
            jax.ShapeDtypeStruct((N, n_tiles * PRED_LANES), jnp.int32),
        ),
        grid=(n_tiles,),
        in_specs=[
            fixed((N, D_IN)),                                     # x (resident)
            fixed((1, D_IN)),                                     # LN gamma
            fixed((1, D_IN)),                                     # LN beta
            fixed((D_IN, H1)),                                    # W1 (bf16, resident)
            fixed((1, H1)),                                       # b1
            fixed((H1, H2)),                                      # W2 (bf16, resident)
            fixed((1, H2)),                                       # b2
            pl.BlockSpec((None, H2, tile_v), lambda j: (j, 0, 0)),  # W3 tile (contiguous stream)
            pl.BlockSpec((1, tile_v), lambda j: (0, j)),          # b3 tile
        ],
        out_specs=(
            pl.BlockSpec((N, tile_v), lambda j: (0, j)),          # tanh(logits) tile
            pl.BlockSpec((N, PRED_LANES), lambda j: (0, j)),      # per-tile max slab
            pl.BlockSpec((N, PRED_LANES), lambda j: (0, j)),      # per-tile argmax slab
        ),
        compiler_params=pltpu.CompilerParams(
            # No cross-tile state -> vocab axis is parallel (2 TCs on v7x).
            dimension_semantics=("parallel",),
            vmem_limit_bytes=_vmem_limit_bytes(N, tile_v),
        ),
    )(x, gamma, beta, w1, b1, w2, b2, w3_tiled, b3)

    # Reduce the per-tile argmax partials (tiny: N x n_tiles).
    max_all = max_slab[:, ::PRED_LANES]                  # (N, n_tiles)
    idx_all = idx_slab[:, ::PRED_LANES]                  # (N, n_tiles)
    best_tile = jnp.argmax(max_all, axis=1)[:, None]     # first tile on ties
    pred = jnp.take_along_axis(idx_all, best_tile, axis=1)[:, 0]

    return logits_pad[:, :vocab], pred                   # pred shape (N,), like torch.argmax(dim=1)


def mlm_head_reference(x, params):
    """Plain-JAX reference with the same mixed precision as the kernel."""
    gamma, beta, w1, b1, w2, b2, w3, b3 = params
    mean = jnp.mean(x, axis=-1, keepdims=True)
    xc = x - mean
    var = jnp.mean(xc * xc, axis=-1, keepdims=True)
    xn = xc * jax.lax.rsqrt(var + LN_EPS) * gamma + beta
    h = _gelu_exact(jnp.dot(xn.astype(jnp.bfloat16), w1.astype(jnp.bfloat16),
                            preferred_element_type=jnp.float32) + b1)
    h = _gelu_exact(jnp.dot(h.astype(jnp.bfloat16), w2.astype(jnp.bfloat16),
                            preferred_element_type=jnp.float32) + b2)
    logits = jnp.dot(h.astype(jnp.bfloat16), w3.astype(jnp.bfloat16),
                     preferred_element_type=jnp.float32) + b3
    return jnp.tanh(logits)


def init_params(key):
    ks = jax.random.split(key, 6)
    gamma = jnp.ones((1, D_IN), jnp.float32)
    beta = jnp.zeros((1, D_IN), jnp.float32)
    # deterministic small-scale init (synthetic weights; no checkpoint load)
    w1 = jax.random.normal(ks[0], (D_IN, H1), jnp.float32) * 0.02
    b1 = jax.random.normal(ks[1], (1, H1), jnp.float32) * 0.02
    w2 = jax.random.normal(ks[2], (H1, H2), jnp.float32) * 0.02
    b2 = jax.random.normal(ks[3], (1, H2), jnp.float32) * 0.02
    w3 = jax.random.normal(ks[4], (H2, VOCAB), jnp.float32) * 0.02
    b3 = jax.random.normal(ks[5], (1, VOCAB), jnp.float32) * 0.02
    return (gamma, beta, w1, b1, w2, b2, w3, b3)


if __name__ == "__main__":
    key = jax.random.PRNGKey(0)
    kx, kp = jax.random.split(key)
    N = 16  # small batch of token embeddings
    x = jax.random.normal(kx, (N, D_IN), jnp.float32)
    params = init_params(kp)

    # One-time weight prep (pad / bf16 / pre-tile W3) -- outside the hot path.
    prepped = prepare_mlm_head_params(params, tile_v=TILE_V_DEFAULT)

    logits, pred = mlm_head_forward(x, prepped, vocab=VOCAB)
    jax.block_until_ready((logits, pred))

    assert logits.shape == (N, VOCAB) and logits.dtype == jnp.float32
    assert pred.shape == (N,) and pred.dtype == jnp.int32

    # Numerical check against a plain-JAX reference with matching precision.
    ref = mlm_head_reference(x, params)
    assert bool(jnp.allclose(logits, ref, atol=2e-2, rtol=0.0))

    # pred must land in-vocab and select a (near-)row-maximal logit
    # (robust to tie ordering / tanh saturation rounding).
    assert bool(jnp.all((pred >= 0) & (pred < VOCAB)))
    picked = jnp.take_along_axis(logits, pred[:, None], axis=1)[:, 0]
    assert bool(jnp.all(picked >= jnp.max(logits, axis=1) - 1e-5))

    print("KERNEL_OK")
</pallas_src>

<mosaic_0001>
module attributes {stable_mosaic.version = 11 : i64} {
  func.func @mlm_head_kernel(%arg0: i32, %arg1: memref<16x768xf32, #tpu.memory_space<vmem>>, %arg2: memref<1x768xf32, #tpu.memory_space<vmem>>, %arg3: memref<1x768xf32, #tpu.memory_space<vmem>>, %arg4: memref<768x512xbf16, #tpu.memory_space<vmem>>, %arg5: memref<1x512xf32, #tpu.memory_space<vmem>>, %arg6: memref<512x512xbf16, #tpu.memory_space<vmem>>, %arg7: memref<1x512xf32, #tpu.memory_space<vmem>>, %arg8: memref<1x512x2048xbf16, #tpu.memory_space<vmem>>, %arg9: memref<1x2048xf32, #tpu.memory_space<vmem>>, %arg10: memref<16x2048xf32, #tpu.memory_space<vmem>>, %arg11: memref<16x128xf32, #tpu.memory_space<vmem>>, %arg12: memref<16x128xi32, #tpu.memory_space<vmem>>) attributes {dimension_semantics = [#tpu.dimension_semantics<parallel>], iteration_bounds = array<i64: 1>, scalar_prefetch = 0 : i64, scratch_operands = 0 : i64, tpu.core_type = #tpu.core_type<tc>, window_params = [{pipeline_mode = #tpu.pipeline_mode<synchronous>, transform_indices = @transform_0, window_bounds = array<i64: 16, 768>}, {pipeline_mode = #tpu.pipeline_mode<synchronous>, transform_indices = @transform_1, window_bounds = array<i64: 1, 768>}, {pipeline_mode = #tpu.pipeline_mode<synchronous>, transform_indices = @transform_2, window_bounds = array<i64: 1, 768>}, {pipeline_mode = #tpu.pipeline_mode<synchronous>, transform_indices = @transform_3, window_bounds = array<i64: 768, 512>}, {pipeline_mode = #tpu.pipeline_mode<synchronous>, transform_indices = @transform_4, window_bounds = array<i64: 1, 512>}, {pipeline_mode = #tpu.pipeline_mode<synchronous>, transform_indices = @transform_5, window_bounds = array<i64: 512, 512>}, {pipeline_mode = #tpu.pipeline_mode<synchronous>, transform_indices = @transform_6, window_bounds = array<i64: 1, 512>}, {transform_indices = @transform_7, window_bounds = array<i64: 1, 512, 2048>}, {transform_indices = @transform_8, window_bounds = array<i64: 1, 2048>}, {transform_indices = @transform_9, window_bounds = array<i64: 16, 2048>}, {transform_indices = @transform_10, window_bounds = array<i64: 16, 128>}, {transform_indices = @transform_11, window_bounds = array<i64: 16, 128>}]} {
    %c0 = arith.constant 0 : index
    %c0_0 = arith.constant 0 : index
    %0 = vector.load %arg1[%c0, %c0_0] : memref<16x768xf32, #tpu.memory_space<vmem>>, vector<16x768xf32>
    %cst = arith.constant dense<0.000000e+00> : vector<16xf32>
    %1 = vector.multi_reduction <add>, %0, %cst [1] : vector<16x768xf32> to vector<16xf32>
    %2 = vector.shape_cast %1 : vector<16xf32> to vector<16x1xf32>
    %cst_1 = arith.constant 7.680000e+02 : f32
    %3 = vector.broadcast %cst_1 : f32 to vector<16x1xf32>
    %4 = arith.divf %2, %3 : vector<16x1xf32>
    %5 = vector.broadcast %4 : vector<16x1xf32> to vector<16x768xf32>
    %6 = arith.subf %0, %5 : vector<16x768xf32>
    %7 = arith.mulf %6, %6 : vector<16x768xf32>
    %cst_2 = arith.constant dense<0.000000e+00> : vector<16xf32>
    %8 = vector.multi_reduction <add>, %7, %cst_2 [1] : vector<16x768xf32> to vector<16xf32>
    %9 = vector.shape_cast %8 : vector<16xf32> to vector<16x1xf32>
    %cst_3 = arith.constant 7.680000e+02 : f32
    %10 = vector.broadcast %cst_3 : f32 to vector<16x1xf32>
    %11 = arith.divf %9, %10 : vector<16x1xf32>
    %cst_4 = arith.constant 9.99999974E-6 : f32
    %12 = vector.broadcast %cst_4 : f32 to vector<16x1xf32>
    %13 = arith.addf %11, %12 : vector<16x1xf32>
    %14 = math.rsqrt %13 : vector<16x1xf32>
    %15 = vector.broadcast %14 : vector<16x1xf32> to vector<16x768xf32>
    %16 = arith.mulf %6, %15 : vector<16x768xf32>
    %c0_5 = arith.constant 0 : index
    %c0_6 = arith.constant 0 : index
    %17 = vector.load %arg2[%c0_5, %c0_6] : memref<1x768xf32, #tpu.memory_space<vmem>>, vector<1x768xf32>
    %18 = vector.broadcast %17 : vector<1x768xf32> to vector<16x768xf32>
    %19 = arith.mulf %16, %18 : vector<16x768xf32>
    %c0_7 = arith.constant 0 : index
    %c0_8 = arith.constant 0 : index
    %20 = vector.load %arg3[%c0_7, %c0_8] : memref<1x768xf32, #tpu.memory_space<vmem>>, vector<1x768xf32>
    %21 = vector.broadcast %20 : vector<1x768xf32> to vector<16x768xf32>
    %22 = arith.addf %19, %21 : vector<16x768xf32>
    %23 = arith.truncf %22 : vector<16x768xf32> to vector<16x768xbf16>
    %c0_9 = arith.constant 0 : index
    %c0_10 = arith.constant 0 : index
    %24 = vector.load %arg4[%c0_9, %c0_10] : memref<768x512xbf16, #tpu.memory_space<vmem>>, vector<768x512xbf16>
    %cst_11 = arith.constant dense<0.000000e+00> : vector<16x512xf32>
    %25 = tpu.matmul %23, %24, %cst_11 {dimension_numbers = #tpu.dot_dimension_numbers<[1], [0], [0], [1], [0, 0, 1, 1], [], []>} : vector<16x768xbf16>, vector<768x512xbf16>, vector<16x512xf32> -> vector<16x512xf32>
    %c0_12 = arith.constant 0 : index
    %c0_13 = arith.constant 0 : index
    %26 = vector.load %arg5[%c0_12, %c0_13] : memref<1x512xf32, #tpu.memory_space<vmem>>, vector<1x512xf32>
    %27 = vector.broadcast %26 : vector<1x512xf32> to vector<16x512xf32>
    %28 = arith.addf %25, %27 : vector<16x512xf32>
    %cst_14 = arith.constant 5.000000e-01 : f32
    %29 = vector.broadcast %cst_14 : f32 to vector<16x512xf32>
    %30 = arith.mulf %29, %28 : vector<16x512xf32>
    %cst_15 = arith.constant 0.707106769 : f32
    %31 = vector.broadcast %cst_15 : f32 to vector<16x512xf32>
    %32 = arith.mulf %28, %31 : vector<16x512xf32>
    %33 = math.erf %32 : vector<16x512xf32>
    %cst_16 = arith.constant 1.000000e+00 : f32
    %34 = vector.broadcast %cst_16 : f32 to vector<16x512xf32>
    %35 = arith.addf %34, %33 : vector<16x512xf32>
    %36 = arith.mulf %30, %35 : vector<16x512xf32>
    %37 = arith.truncf %36 : vector<16x512xf32> to vector<16x512xbf16>
    %c0_17 = arith.constant 0 : index
    %c0_18 = arith.constant 0 : index
    %38 = vector.load %arg6[%c0_17, %c0_18] : memref<512x512xbf16, #tpu.memory_space<vmem>>, vector<512x512xbf16>
    %cst_19 = arith.constant dense<0.000000e+00> : vector<16x512xf32>
    %39 = tpu.matmul %37, %38, %cst_19 {dimension_numbers = #tpu.dot_dimension_numbers<[1], [0], [0], [1], [0, 0, 1, 1], [], []>} : vector<16x512xbf16>, vector<512x512xbf16>, vector<16x512xf32> -> vector<16x512xf32>
    %c0_20 = arith.constant 0 : index
    %c0_21 = arith.constant 0 : index
    %40 = vector.load %arg7[%c0_20, %c0_21] : memref<1x512xf32, #tpu.memory_space<vmem>>, vector<1x512xf32>
    %41 = vector.broadcast %40 : vector<1x512xf32> to vector<16x512xf32>
    %42 = arith.addf %39, %41 : vector<16x512xf32>
    %cst_22 = arith.constant 5.000000e-01 : f32
    %43 = vector.broadcast %cst_22 : f32 to vector<16x512xf32>
    %44 = arith.mulf %43, %42 : vector<16x512xf32>
    %cst_23 = arith.constant 0.707106769 : f32
    %45 = vector.broadcast %cst_23 : f32 to vector<16x512xf32>
    %46 = arith.mulf %42, %45 : vector<16x512xf32>
    %47 = math.erf %46 : vector<16x512xf32>
    %cst_24 = arith.constant 1.000000e+00 : f32
    %48 = vector.broadcast %cst_24 : f32 to vector<16x512xf32>
    %49 = arith.addf %48, %47 : vector<16x512xf32>
    %50 = arith.mulf %44, %49 : vector<16x512xf32>
    %51 = arith.truncf %50 : vector<16x512xf32> to vector<16x512xbf16>
    %c0_25 = arith.constant 0 : index
    %c0_26 = arith.constant 0 : index
    %c0_27 = arith.constant 0 : index
    %52 = vector.load %arg8[%c0_25, %c0_26, %c0_27] : memref<1x512x2048xbf16, #tpu.memory_space<vmem>>, vector<1x512x2048xbf16>
    %53 = vector.shape_cast %52 : vector<1x512x2048xbf16> to vector<512x2048xbf16>
    %cst_28 = arith.constant dense<0.000000e+00> : vector<16x2048xf32>
    %54 = tpu.matmul %51, %53, %cst_28 {dimension_numbers = #tpu.dot_dimension_numbers<[1], [0], [0], [1], [0, 0, 1, 1], [], []>} : vector<16x512xbf16>, vector<512x2048xbf16>, vector<16x2048xf32> -> vector<16x2048xf32>
    %c0_29 = arith.constant 0 : index
    %c0_30 = arith.constant 0 : index
    %55 = vector.load %arg9[%c0_29, %c0_30] : memref<1x2048xf32, #tpu.memory_space<vmem>>, vector<1x2048xf32>
    %56 = vector.broadcast %55 : vector<1x2048xf32> to vector<16x2048xf32>
    %57 = arith.addf %54, %56 : vector<16x2048xf32>
    %cst_31 = arith.constant dense<0xFF800000> : vector<16xf32>
    %58 = vector.multi_reduction <maximumf>, %57, %cst_31 [1] : vector<16x2048xf32> to vector<16xf32>
    %59 = vector.shape_cast %58 : vector<16xf32> to vector<16x1xf32>
    %60 = tpu.iota {dimensions = array<i32: 1>} : vector<1x2048xi32>
    %61 = vector.broadcast %59 : vector<16x1xf32> to vector<16x2048xf32>
    %62 = arith.cmpf oeq, %57, %61 : vector<16x2048xf32>
    %c2048_i32 = arith.constant 2048 : i32
    %63 = vector.shape_cast %60 : vector<1x2048xi32> to vector<1x2048xi32>
    %64 = vector.broadcast %63 : vector<1x2048xi32> to vector<16x2048xi32>
    %65 = vector.broadcast %c2048_i32 : i32 to vector<16x2048xi32>
    %66 = arith.select %62, %64, %65 : vector<16x2048xi1>, vector<16x2048xi32>
    %cst_32 = arith.constant dense<2147483647> : vector<16xi32>
    %67 = vector.multi_reduction <minsi>, %66, %cst_32 [1] : vector<16x2048xi32> to vector<16xi32>
    %68 = vector.shape_cast %67 : vector<16xi32> to vector<16x1xi32>
    %c2048_i32_33 = arith.constant 2048 : i32
    %69 = arith.muli %arg0, %c2048_i32_33 : i32
    %70 = vector.broadcast %69 : i32 to vector<16x1xi32>
    %71 = arith.addi %68, %70 : vector<16x1xi32>
    %72 = math.tanh %57 : vector<16x2048xf32>
    %c0_34 = arith.constant 0 : index
    %c0_35 = arith.constant 0 : index
    %73 = vector.load %arg10[%c0_34, %c0_35] : memref<16x2048xf32, #tpu.memory_space<vmem>>, vector<16x2048xf32>
    tpu.vector_store %arg10[%c0_34, %c0_35], %72 {strides = array<i32>} : memref<16x2048xf32, #tpu.memory_space<vmem>>, vector<16x2048xf32>,
    %74 = vector.shape_cast %59 : vector<16x1xf32> to vector<16x1xf32>
    %75 = vector.broadcast %74 : vector<16x1xf32> to vector<16x128xf32>
    %c0_36 = arith.constant 0 : index
    %c0_37 = arith.constant 0 : index
    %76 = vector.load %arg11[%c0_36, %c0_37] : memref<16x128xf32, #tpu.memory_space<vmem>>, vector<16x128xf32>
    tpu.vector_store %arg11[%c0_36, %c0_37], %75 {strides = array<i32>} : memref<16x128xf32, #tpu.memory_space<vmem>>, vector<16x128xf32>,
    %77 = vector.shape_cast %71 : vector<16x1xi32> to vector<16x1xi32>
    %78 = vector.broadcast %77 : vector<16x1xi32> to vector<16x128xi32>
    %c0_38 = arith.constant 0 : index
    %c0_39 = arith.constant 0 : index
    %79 = vector.load %arg12[%c0_38, %c0_39] : memref<16x128xi32, #tpu.memory_space<vmem>>, vector<16x128xi32>
    tpu.vector_store %arg12[%c0_38, %c0_39], %78 {strides = array<i32>} : memref<16x128xi32, #tpu.memory_space<vmem>>, vector<16x128xi32>,
    return
  }
  func.func @transform_0(%arg0: i32) -> (i32, i32) {
    %c0_i32 = arith.constant 0 : i32
    %c0_i32_0 = arith.constant 0 : i32
    %c0_i32_1 = arith.constant 0 : i32
    return %c0_i32, %c0_i32_0 : i32, i32
  }
  func.func @transform_1(%arg0: i32) -> (i32, i32) {
    %c0_i32 = arith.constant 0 : i32
    %c0_i32_0 = arith.constant 0 : i32
    %c0_i32_1 = arith.constant 0 : i32
    return %c0_i32, %c0_i32_0 : i32, i32
  }
  func.func @transform_2(%arg0: i32) -> (i32, i32) {
    %c0_i32 = arith.constant 0 : i32
    %c0_i32_0 = arith.constant 0 : i32
    %c0_i32_1 = arith.constant 0 : i32
    return %c0_i32, %c0_i32_0 : i32, i32
  }
  func.func @transform_3(%arg0: i32) -> (i32, i32) {
    %c0_i32 = arith.constant 0 : i32
    %c0_i32_0 = arith.constant 0 : i32
    %c0_i32_1 = arith.constant 0 : i32
    return %c0_i32, %c0_i32_0 : i32, i32
  }
  func.func @transform_4(%arg0: i32) -> (i32, i32) {
    %c0_i32 = arith.constant 0 : i32
    %c0_i32_0 = arith.constant 0 : i32
    %c0_i32_1 = arith.constant 0 : i32
    return %c0_i32, %c0_i32_0 : i32, i32
  }
  func.func @transform_5(%arg0: i32) -> (i32, i32) {
    %c0_i32 = arith.constant 0 : i32
    %c0_i32_0 = arith.constant 0 : i32
    %c0_i32_1 = arith.constant 0 : i32
    return %c0_i32, %c0_i32_0 : i32, i32
  }
  func.func @transform_6(%arg0: i32) -> (i32, i32) {
    %c0_i32 = arith.constant 0 : i32
    %c0_i32_0 = arith.constant 0 : i32
    %c0_i32_1 = arith.constant 0 : i32
    return %c0_i32, %c0_i32_0 : i32, i32
  }
  func.func @transform_7(%arg0: i32) -> (i32, i32, i32) {
    %c0_i32 = arith.constant 0 : i32
    %c0_i32_0 = arith.constant 0 : i32
    %c0_i32_1 = arith.constant 0 : i32
    return %arg0, %c0_i32, %c0_i32_0 : i32, i32, i32
  }
  func.func @transform_8(%arg0: i32) -> (i32, i32) {
    %c0_i32 = arith.constant 0 : i32
    %c0_i32_0 = arith.constant 0 : i32
    return %c0_i32, %arg0 : i32, i32
  }
  func.func @transform_9(%arg0: i32) -> (i32, i32) {
    %c0_i32 = arith.constant 0 : i32
    %c0_i32_0 = arith.constant 0 : i32
    return %c0_i32, %arg0 : i32, i32
  }
  func.func @transform_10(%arg0: i32) -> (i32, i32) {
    %c0_i32 = arith.constant 0 : i32
    %c0_i32_0 = arith.constant 0 : i32
    return %c0_i32, %arg0 : i32, i32
  }
  func.func @transform_11(%arg0: i32) -> (i32, i32) {
    %c0_i32 = arith.constant 0 : i32
    %c0_i32_0 = arith.constant 0 : i32
    return %c0_i32, %arg0 : i32, i32
  }
}

</mosaic_0001>

<bundles_post_ra>
// kernel: mlm_head_forward.1
= control target key start
LH: loop header
LB: loop body
LE: loop exit
PB: predicated region body
PF: predicated region fallthrough
CT: control target
= control target key end

     0   :  { %17 = vsyncpa [#allocation3], 0  ;;  %s9584_s0 = inlined_call_operand.hbm [shape: f32[16,768], index: 0, kind: input, shape index: {}]   ;;  %s9585_s1 = inlined_call_operand.hbm [shape: f32[1,768], index: 1, kind: input, shape index: {}]   ;;  %s9586_s2 = inlined_call_operand.hbm [shape: f32[1,768], index: 2, kind: input, shape index: {}]   ;;  %s9587_s3 = inlined_call_operand.hbm [shape: bf16[768,512], index: 3, kind: input, shape index: {}]   ;;  %s9588_s4 = inlined_call_operand.hbm [shape: f32[1,512], index: 4, kind: input, shape index: {}]   ;;  %s9589_s5 = inlined_call_operand.hbm [shape: bf16[512,512], index: 5, kind: input, shape index: {}]   ;;  %s9590_s6 = inlined_call_operand.hbm [shape: f32[1,512], index: 6, kind: input, shape index: {}]   ;;  %s9591_s7 = inlined_call_operand.hbm [shape: bf16[1,512,2048], index: 7, kind: input, shape index: {}]   ;;  %s9592_s8 = inlined_call_operand.hbm [shape: f32[1,2048], index: 8, kind: input, shape index: {}]   ;;  %s9593_s9 = inlined_call_operand.hbm [shape: f32[16,2048], index: 9, kind: output, shape index: {0}]   ;;  %s9594_s10 = inlined_call_operand.hbm [shape: f32[16,128], index: 10, kind: output, shape index: {1}]   ;;  %s9595_s11 = inlined_call_operand.vmem [shape: s32[16,128], index: 11, kind: output, shape index: {2}]  }
   0x1   :  { %18 = vsyncpa [#allocation6], 0 }
   0x2   :  { %19 = vsyncpa [#allocation9], 0 }
   0x3   :  { %20 = vsyncpa [#allocation12], 0 }
   0x4   :  { %21 = vsyncpa [#allocation15], 0 }
   0x5   :  { %22 = vsyncpa [#allocation4], 0 }
   0x6   :  { %23 = vsyncpa [#allocation19], 0  ;;  %s8762_s17 = smov [#allocation5]   ;;  %s8763_s19 = smov [#allocation8]  }
   0x7   :  { %s42_s18 = sshll.u32 %s8762_s17, 4  ;;  %s61_s20 = sshll.u32 %s8763_s19, 4  ;;  %s43_s18 = int_to_ptr.vmem [resolvable:$true] %s42_s18  ;;  %s8842_s20 = int_to_ptr.vmem [resolvable:$true] %s61_s20 }
   0x8   :  { %s8506_s23 = scalar_lea.hbm %s9585_s1, 96 }
   0x9   :  { %p8507_p0 = scmp.ne.s32.totalorder %s9585_s1, %s8506_s23  ;;  %p8510_p1 = scmp.lt.u32.totalorder %s8506_s23, %s9585_s1 }
   0xb   :  { %p8512_p2 = pnand %p8510_p1, %p8507_p0 }
   0xd   :  { %8515 = shalt.err (!%p8512_p2)
}
   0xe   :  { %s8516_s28 = scalar_lea.vmem %s43_s18, 96  ;;  %p8521_p4 = scmp.lt.s32.totalorder %s43_s18, %s43_s18 }
   0xf   :  { %p8517_p3 = scmp.ne.s32.totalorder %s43_s18, %s8516_s28  ;;  %p8522_p5 = scmp.lt.s32.totalorder %s8516_s28, %s8516_s28 }
  0x11   :  { %p8523_p6 = por %p8522_p5, %p8521_p4 }
  0x13   :  { %p8524_p7 = pnand %p8523_p6, %p8517_p3 }
  0x15   :  { %8527 = shalt.err (!%p8524_p7)
}
  0x16   :  { %45 = dma.hbm_to_vmem [thread:$0]  %s9585_s1, 96, %s43_s18, [#allocation6]  }
  0x17   :  { %s8528_s14 = scalar_lea.hbm %s9587_s3, 24576 }
  0x18   :  { %p8529_p8 = scmp.ne.s32.totalorder %s9587_s3, %s8528_s14  ;;  %p8532_p9 = scmp.lt.u32.totalorder %s8528_s14, %s9587_s3 }
  0x1a   :  { %p8534_p10 = pnand %p8532_p9, %p8529_p8 }
  0x1c   :  { %8537 = shalt.err (!%p8534_p10)
}
  0x1d   :  { %s8538_s21 = scalar_lea.vmem %s8842_s20, 24576  ;;  %p8543_p12 = scmp.lt.s32.totalorder %s8842_s20, %s8842_s20 }
  0x1e   :  { %p8539_p11 = scmp.ne.s32.totalorder %s8842_s20, %s8538_s21  ;;  %p8544_p13 = scmp.lt.s32.totalorder %s8538_s21, %s8538_s21 }
  0x20   :  { %p8545_p0 = por %p8544_p13, %p8543_p12 }
  0x22   :  { %p8546_p1 = pnand %p8545_p0, %p8539_p11 }
  0x24   :  { %8549 = shalt.err (!%p8546_p1)
}
  0x25   :  { %s8764_s1 = smov 256   ;;  %s8765_s18 = smov 16  }
  0x26   :  { %67 = dma.hbm_to_vmem [thread:$0]  %s9587_s3, 24576, %s8842_s20, [#allocation9], %s8764_s1, %s8764_s1, %s8765_s18  }
  0x27   :  { %s8766_s24 = smov [#allocation11]   ;;  %s8767_s26 = smov [#allocation14]  }
  0x28   :  { %s83_s25 = sshll.u32 %s8766_s24, 4  ;;  %s105_s27 = sshll.u32 %s8767_s26, 4  ;;  %s84_s25 = int_to_ptr.vmem [resolvable:$true] %s83_s25  ;;  %s8873_s27 = int_to_ptr.vmem [resolvable:$true] %s105_s27 }
  0x29   :  { %s8550_s30 = scalar_lea.hbm %s9589_s5, 16384 }
  0x2a   :  { %p8551_p2 = scmp.ne.s32.totalorder %s9589_s5, %s8550_s30  ;;  %p8554_p3 = scmp.lt.u32.totalorder %s8550_s30, %s9589_s5 }
  0x2c   :  { %p8556_p4 = pnand %p8554_p3, %p8551_p2 }
  0x2e   :  { %8559 = shalt.err (!%p8556_p4)
}
  0x2f   :  { %s8560_s3 = scalar_lea.vmem %s84_s25, 16384  ;;  %p8565_p6 = scmp.lt.s32.totalorder %s84_s25, %s84_s25 }
  0x30   :  { %p8561_p5 = scmp.ne.s32.totalorder %s84_s25, %s8560_s3  ;;  %p8566_p7 = scmp.lt.s32.totalorder %s8560_s3, %s8560_s3 }
  0x32   :  { %p8567_p8 = por %p8566_p7, %p8565_p6 }
  0x34   :  { %p8568_p9 = pnand %p8567_p8, %p8561_p5 }
  0x36   :  { %8571 = shalt.err (!%p8568_p9)
}
  0x37   :  { %89 = dma.hbm_to_vmem [thread:$0]  %s9589_s5, 16384, %s84_s25, [#allocation12], %s8764_s1, %s8764_s1, %s8765_s18  }
  0x38   :  { %s8572_s21 = scalar_lea.hbm %s9591_s7, 65536 }
  0x39   :  { %p8573_p10 = scmp.ne.s32.totalorder %s9591_s7, %s8572_s21  ;;  %p8576_p11 = scmp.lt.u32.totalorder %s8572_s21, %s9591_s7 }
  0x3b   :  { %p8578_p12 = pnand %p8576_p11, %p8573_p10 }
  0x3d   :  { %8581 = shalt.err (!%p8578_p12)
}
  0x3e   :  { %s8582_s28 = scalar_lea.vmem %s8873_s27, 65536  ;;  %p8587_p0 = scmp.lt.s32.totalorder %s8873_s27, %s8873_s27 }
  0x3f   :  { %p8583_p13 = scmp.ne.s32.totalorder %s8873_s27, %s8582_s28  ;;  %p8588_p1 = scmp.lt.s32.totalorder %s8582_s28, %s8582_s28 }
  0x41   :  { %p8589_p2 = por %p8588_p1, %p8587_p0 }
  0x43   :  { %p8590_p3 = pnand %p8589_p2, %p8583_p13 }
  0x45   :  { %8593 = shalt.err (!%p8590_p3)
}
  0x46   :  { %s8768_s5 = smov 1024   ;;  %s8769_s1 = smov 64  }
  0x47   :  { %111 = dma.hbm_to_vmem [thread:$0]  %s9591_s7, 65536, %s8873_s27, [#allocation15], %s8768_s5, %s8768_s5, %s8769_s1  }
  0x48   :  { %s8770_s29 = smov [#allocation2]   ;;  %s8594_s14 = scalar_lea.hbm %s9584_s0, 1536 }
  0x49   :  { %s29_s30 = sshll.u32 %s8770_s29, 4  ;;  %p8595_p4 = scmp.ne.s32.totalorder %s9584_s0, %s8594_s14  ;;  %s30_s30 = int_to_ptr.vmem [resolvable:$true] %s29_s30 }
  0x4a   :  { %p8598_p5 = scmp.lt.u32.totalorder %s8594_s14, %s9584_s0 }
  0x4c   :  { %p8600_p6 = pnand %p8598_p5, %p8595_p4 }
  0x4e   :  { %8603 = shalt.err (!%p8600_p6)
}
  0x4f   :  { %s8604_s17 = scalar_lea.vmem %s30_s30, 1536  ;;  %p8609_p8 = scmp.lt.s32.totalorder %s30_s30, %s30_s30 }
  0x50   :  { %p8605_p7 = scmp.ne.s32.totalorder %s30_s30, %s8604_s17  ;;  %p8610_p9 = scmp.lt.s32.totalorder %s8604_s17, %s8604_s17 }
  0x52   :  { %p8611_p10 = por %p8610_p9, %p8609_p8 }
  0x54   :  { %p8612_p11 = pnand %p8611_p10, %p8605_p7 }
  0x56   :  { %8615 = shalt.err (!%p8612_p11)
}
  0x57   :  { %s8771_s7 = smov 768   ;;  %s8772_s27 = smov 48  }
  0x58   :  { %35 = dma.hbm_to_vmem [thread:$0]  %s9584_s0, 1536, %s30_s30, [#allocation3], %s8771_s7, %s8771_s7, %s8772_s27  }
  0x59   :  { %s8773_s22 = smov [#allocation7]   ;;  %s8774_s24 = smov [#allocation10]  }
  0x5a   :  { %s52_s23 = sshll.u32 %s8773_s22, 4  ;;  %s74_s26 = sshll.u32 %s8774_s24, 4  ;;  %s53_s23 = int_to_ptr.vmem [resolvable:$true] %s52_s23  ;;  %s75_s26 = int_to_ptr.vmem [resolvable:$true] %s74_s26 }
  0x5b   :  { %s8616_s1 = scalar_lea.hbm %s9586_s2, 96 }
  0x5c   :  { %p8617_p12 = scmp.ne.s32.totalorder %s9586_s2, %s8616_s1  ;;  %p8620_p13 = scmp.lt.u32.totalorder %s8616_s1, %s9586_s2 }
  0x5e   :  { %p8622_p0 = pnand %p8620_p13, %p8617_p12 }
  0x60   :  { %8625 = shalt.err (!%p8622_p0)
}
  0x61   :  { %s8626_s0 = scalar_lea.vmem %s53_s23, 96  ;;  %p8631_p2 = scmp.lt.s32.totalorder %s53_s23, %s53_s23 }
  0x62   :  { %p8627_p1 = scmp.ne.s32.totalorder %s53_s23, %s8626_s0  ;;  %p8632_p3 = scmp.lt.s32.totalorder %s8626_s0, %s8626_s0 }
  0x64   :  { %p8633_p4 = por %p8632_p3, %p8631_p2 }
  0x66   :  { %p8634_p5 = pnand %p8633_p4, %p8627_p1 }
  0x68   :  { %8637 = shalt.err (!%p8634_p5)
}
  0x69   :  { %55 = dma.hbm_to_vmem [thread:$0]  %s9586_s2, 96, %s53_s23, [#allocation6]  }
  0x6a   :  { %s8638_s3 = scalar_lea.hbm %s9588_s4, 64 }
  0x6b   :  { %p8639_p6 = scmp.ne.s32.totalorder %s9588_s4, %s8638_s3  ;;  %p8642_p7 = scmp.lt.u32.totalorder %s8638_s3, %s9588_s4 }
  0x6d   :  { %p8644_p8 = pnand %p8642_p7, %p8639_p6 }
  0x6f   :  { %8647 = shalt.err (!%p8644_p8)
}
  0x70   :  { %s8648_s27 = scalar_lea.vmem %s75_s26, 64  ;;  %p8653_p10 = scmp.lt.s32.totalorder %s75_s26, %s75_s26 }
  0x71   :  { %p8649_p9 = scmp.ne.s32.totalorder %s75_s26, %s8648_s27  ;;  %p8654_p11 = scmp.lt.s32.totalorder %s8648_s27, %s8648_s27 }
  0x73   :  { %p8655_p12 = por %p8654_p11, %p8653_p10 }
  0x75   :  { %p8656_p13 = pnand %p8655_p12, %p8649_p9 }
  0x77   :  { %8659 = shalt.err (!%p8656_p13)
}
  0x78   :  { %77 = dma.hbm_to_vmem [thread:$0]  %s9588_s4, 64, %s75_s26, [#allocation9]  }
  0x79   :  { %s8775_s21 = smov [#allocation13]   ;;  %s8776_s23 = smov [#allocation16]  }
  0x7a   :  { %s96_s22 = sshll.u32 %s8775_s21, 4  ;;  %s118_s24 = sshll.u32 %s8776_s23, 4  ;;  %s97_s22 = int_to_ptr.vmem [resolvable:$true] %s96_s22  ;;  %s119_s24 = int_to_ptr.vmem [resolvable:$true] %s118_s24 }
  0x7b   :  { %s8660_s1 = scalar_lea.hbm %s9590_s6, 64 }
  0x7c   :  { %p8661_p0 = scmp.ne.s32.totalorder %s9590_s6, %s8660_s1  ;;  %p8664_p1 = scmp.lt.u32.totalorder %s8660_s1, %s9590_s6 }
  0x7e   :  { %p8666_p2 = pnand %p8664_p1, %p8661_p0 }
  0x80   :  { %8669 = shalt.err (!%p8666_p2)
}
  0x81   :  { %s8670_s4 = scalar_lea.vmem %s97_s22, 64  ;;  %p8675_p4 = scmp.lt.s32.totalorder %s97_s22, %s97_s22 }
  0x82   :  { %p8671_p3 = scmp.ne.s32.totalorder %s97_s22, %s8670_s4  ;;  %p8676_p5 = scmp.lt.s32.totalorder %s8670_s4, %s8670_s4 }
  0x84   :  { %p8677_p6 = por %p8676_p5, %p8675_p4 }
  0x86   :  { %p8678_p7 = pnand %p8677_p6, %p8671_p3 }
  0x88   :  { %8681 = shalt.err (!%p8678_p7)
}
  0x89   :  { %99 = dma.hbm_to_vmem [thread:$0]  %s9590_s6, 64, %s97_s22, [#allocation12]  }
  0x8a   :  { %s8682_s14 = scalar_lea.hbm %s9592_s8, 256 }
  0x8b   :  { %p8683_p8 = scmp.ne.s32.totalorder %s9592_s8, %s8682_s14  ;;  %p8686_p9 = scmp.lt.u32.totalorder %s8682_s14, %s9592_s8 }
  0x8d   :  { %p8688_p10 = pnand %p8686_p9, %p8683_p8 }
  0x8f   :  { %8691 = shalt.err (!%p8688_p10)
}
  0x90   :  { %s8692_s17 = scalar_lea.vmem %s119_s24, 256  ;;  %p8697_p12 = scmp.lt.s32.totalorder %s119_s24, %s119_s24 }
  0x91   :  { %p8693_p11 = scmp.ne.s32.totalorder %s119_s24, %s8692_s17  ;;  %p8698_p13 = scmp.lt.s32.totalorder %s8692_s17, %s8692_s17 }
  0x93   :  { %p8699_p0 = por %p8698_p13, %p8697_p12 }
  0x95   :  { %p8700_p1 = pnand %p8699_p0, %p8693_p11 }
  0x97   :  { %8703 = shalt.err (!%p8700_p1)
}
  0x98   :  { %121 = dma.hbm_to_vmem [thread:$0]  %s9592_s8, 256, %s119_s24, [#allocation15]  }
  0x99   :  { %8748 = dma.done.wait [#allocation3], 1536  }
  0x9a   :  { %8749 = vsyncadd [#allocation3], 4294965760 }
  0x9b   :  { %8750 = dma.done.wait [#allocation6], 192  }
  0x9c   :  { %8751 = vsyncadd [#allocation6], 4294967104 }
  0x9d   :  { %8752 = dma.done.wait [#allocation9], 24640  }
  0x9e   :  { %8753 = vsyncadd [#allocation9], 4294942656 }
  0x9f   :  { %8754 = dma.done.wait [#allocation12], 16448  }
  0xa0   :  { %8755 = vsyncadd [#allocation12], 4294950848 }
  0xa1   :  { %8756 = dma.done.wait [#allocation15], 65792  }
  0xa2   :  { %8757 = vsyncadd [#allocation15], 4294901504  ;;  %v8964_v0 = vld [vmem:[#allocation2] sm:$0xff]  ;;  %v8966_v1 = vld [vmem:[#allocation2 + $0x8] sm:$0xff]  ;;  %s8777_s8 = smov [#allocation17]   ;;  %s8778_s2 = smov [#allocation18]  }
  0xa3   :  { %v8968_v2 = vld [vmem:[#allocation2 + $0x10] sm:$0xff]  ;;  %v8970_v3 = vld [vmem:[#allocation2 + $0x18] sm:$0xff]  ;;  %v161_v4 = vadd.f32 %v8966_v1, %v8964_v0  ;;  %v8978_v7 = vld [vmem:[#allocation2 + $0x40] sm:$0xff]  ;;  %s6934_s27 = sshll.u32 %s8777_s8, 4  ;;  %s6946_s19 = sshll.u32 %s8778_s2, 4  ;;  %s6935_s27 = int_to_ptr.vmem [resolvable:$true] %s6934_s27  ;;  %s9547_s19 = int_to_ptr.vmem [resolvable:$true] %s6946_s19 }
  0xa4   :  { %v8974_v5 = vld [vmem:[#allocation2 + $0x30] sm:$0xff]  ;;  %v8976_v6 = vld [vmem:[#allocation2 + $0x38] sm:$0xff]  ;;  %v8980_v8 = vld [vmem:[#allocation2 + $0x20] sm:$0xff]  ;;  %s8704_s21 = scalar_lea.vmem %s6935_s27, 4096  ;;  %p8709_p3 = scmp.lt.s32.totalorder %s6935_s27, %s6935_s27 }
  0xa5   :  { %v162_v9 = vadd.f32 %v161_v4, %v8968_v2  ;;  %v8983_v10 = vld [vmem:[#allocation2 + $0x48] sm:$0xff]  ;;  %v168_v11 = vadd.f32 %v8976_v6, %v8974_v5  ;;  %v8989_v13 = vld [vmem:[#allocation2 + $0x50] sm:$0xff]  ;;  %v8993_v16 = vld [vmem:[#allocation2 + $0x58] sm:$0xff]  ;;  %p8705_p2 = scmp.ne.s32.totalorder %s6935_s27, %s8704_s21  ;;  %p8710_p4 = scmp.lt.s32.totalorder %s8704_s21, %s8704_s21 }
  0xa6   :  { %v8987_v12 = vld [vmem:[#allocation2 + $0x28] sm:$0xff]  ;;  %v7926_v22 = vld [vmem:[#allocation8 + $0x4] ss:$16 sps:$4 sm:$0xff]   ;;  %v7931_v25 = vld [vmem:[#allocation8 + $0x8] ss:$16 sps:$4 sm:$0xff]  }
  0xa7   :  { %v163_v14 = vadd.f32 %v162_v9, %v8970_v3  ;;  %v169_v15 = vadd.f32 %v168_v11, %v8978_v7  ;;  %v7928_v23 = vld [vmem:[#allocation8 + $0xc] ss:$16 sps:$4 sm:$0xff]   ;;  %v7930_v24 = vld [vmem:[#allocation8] ss:$16 sps:$4 sm:$0xff]   ;;  %v7932_v26 = vld [vmem:[#allocation8 + $0x24] ss:$16 sps:$4 sm:$0xff]   ;;  %1502 = vmatprep.subr.bf16.mxu0 %v7926_v22  ;;  %p8711_p5 = por %p8710_p4, %p8709_p3 }
  0xa8   :  { %v7934_v27 = vld [vmem:[#allocation8 + $0x2c] ss:$16 sps:$4 sm:$0xff]   ;;  %1631 = vmatprep.subr.bf16.mxu1 %v7928_v23  ;;  %1503 = vmatpush1.bf16.msra.mxu0 %v7930_v24  ;;  %v7936_v28 = vld [vmem:[#allocation8 + $0x20] ss:$16 sps:$4 sm:$0xff]   ;;  %v7937_v29 = vld [vmem:[#allocation8 + $0x28] ss:$16 sps:$4 sm:$0xff]  }
  0xa9   :  { %v164_v17 = vadd.f32 %v163_v14, %v8980_v8  ;;  %v170_v18 = vadd.f32 %v169_v15, %v8983_v10  ;;  %1632 = vmatpush1.bf16.msra.mxu1 %v7931_v25  ;;  %1504 = vmatprep.subr.bf16.mxu0 %v7932_v26  ;;  %v7938_v30 = vld [vmem:[#allocation8 + $0x44] ss:$16 sps:$4 sm:$0xff]   ;;  %v7940_v31 = vld [vmem:[#allocation8 + $0x4c] ss:$16 sps:$4 sm:$0xff]   ;;  %v7942_v32 = vld [vmem:[#allocation8 + $0x40] ss:$16 sps:$4 sm:$0xff]   ;;  %p8712_p6 = pnand %p8711_p5, %p8705_p2 }
  0xaa   :  { %1633 = vmatprep.subr.bf16.mxu1 %v7934_v27  ;;  %v7943_v33 = vld [vmem:[#allocation8 + $0x48] ss:$16 sps:$4 sm:$0xff]   ;;  %v7944_v34 = vld [vmem:[#allocation8 + $0x64] ss:$16 sps:$4 sm:$0xff]   ;;  %v7946_v35 = vld [vmem:[#allocation8 + $0x6c] ss:$16 sps:$4 sm:$0xff]  }
  0xab   :  { %v165_v19 = vadd.f32 %v164_v17, %v8987_v12  ;;  %v171_v20 = vadd.f32 %v170_v18, %v8989_v13  ;;  %v7948_v36 = vld [vmem:[#allocation8 + $0x60] ss:$16 sps:$4 sm:$0xff]   ;;  %v7949_v37 = vld [vmem:[#allocation8 + $0x68] ss:$16 sps:$4 sm:$0xff]   ;;  %v7950_v38 = vld [vmem:[#allocation8 + $0x84] ss:$16 sps:$4 sm:$0xff]  }
  0xac   :  { %1505 = vmatpush1.bf16.msra.mxu0 %v7936_v28  ;;  %v7952_v39 = vld [vmem:[#allocation8 + $0x8c] ss:$16 sps:$4 sm:$0xff]   ;;  %v7954_v40 = vld [vmem:[#allocation8 + $0x80] ss:$16 sps:$4 sm:$0xff]   ;;  %v7955_v41 = vld [vmem:[#allocation8 + $0x88] ss:$16 sps:$4 sm:$0xff]  }
  0xad   :  { %166 = vadd.xlane.f32.xlu0 %v165_v19  ;;  %v172_v21 = vadd.f32 %v171_v20, %v8993_v16  ;;  %1634 = vmatpush1.bf16.msra.mxu1 %v7937_v29  ;;  %v7956_v42 = vld [vmem:[#allocation8 + $0xa4] ss:$16 sps:$4 sm:$0xff]   ;;  %v7958_v43 = vld [vmem:[#allocation8 + $0xac] ss:$16 sps:$4 sm:$0xff]   ;;  %v7960_v44 = vld [vmem:[#allocation8 + $0xa0] ss:$16 sps:$4 sm:$0xff]  }
  0xae   :  { %1506 = vmatprep.subr.bf16.mxu0 %v7938_v30  ;;  %1635 = vmatprep.subr.bf16.mxu1 %v7940_v31  ;;  %v7961_v45 = vld [vmem:[#allocation8 + $0xa8] ss:$16 sps:$4 sm:$0xff]   ;;  %v7962_v46 = vld [vmem:[#allocation8 + $0xc4] ss:$16 sps:$4 sm:$0xff]   ;;  %v7964_v47 = vld [vmem:[#allocation8 + $0xcc] ss:$16 sps:$4 sm:$0xff]  }
  0xaf   :  { %v7966_v48 = vld [vmem:[#allocation8 + $0xc0] ss:$16 sps:$4 sm:$0xff]   ;;  %v7967_v49 = vld [vmem:[#allocation8 + $0xc8] ss:$16 sps:$4 sm:$0xff]   ;;  %v7968_v50 = vld [vmem:[#allocation8 + $0xe4] ss:$16 sps:$4 sm:$0xff]  }
  0xb0   :  { %1507 = vmatpush1.bf16.msra.mxu0 %v7942_v32  ;;  %v7970_v51 = vld [vmem:[#allocation8 + $0xec] ss:$16 sps:$4 sm:$0xff]   ;;  %v7972_v52 = vld [vmem:[#allocation8 + $0xe0] ss:$16 sps:$4 sm:$0xff]   ;;  %v7973_v53 = vld [vmem:[#allocation8 + $0xe8] ss:$16 sps:$4 sm:$0xff]  }
  0xb1   :  { %173 = vadd.xlane.f32.xlu0 %v172_v21  ;;  %1636 = vmatpush1.bf16.msra.mxu1 %v7943_v33  ;;  %v7974_v54 = vld [vmem:[#allocation8 + $0x104] ss:$16 sps:$4 sm:$0xff]   ;;  %v7976_v55 = vld [vmem:[#allocation8 + $0x10c] ss:$16 sps:$4 sm:$0xff]   ;;  %v7978_v56 = vld [vmem:[#allocation8 + $0x100] ss:$16 sps:$4 sm:$0xff]  }
  0xb2   :  { %1508 = vmatprep.subr.bf16.mxu0 %v7944_v34  ;;  %1637 = vmatprep.subr.bf16.mxu1 %v7946_v35  ;;  %v7979_v57 = vld [vmem:[#allocation8 + $0x108] ss:$16 sps:$4 sm:$0xff]   ;;  %v7980_v58 = vld [vmem:[#allocation8 + $0x124] ss:$16 sps:$4 sm:$0xff]   ;;  %v7982_v59 = vld [vmem:[#allocation8 + $0x12c] ss:$16 sps:$4 sm:$0xff]  }
  0xb3   :  { %v7984_v35 = vld [vmem:[#allocation8 + $0x120] ss:$16 sps:$4 sm:$0xff]  }
  0xb4   :  { %1509 = vmatpush1.bf16.msra.mxu0 %v7948_v36  ;;  %v7985_v36 = vld [vmem:[#allocation8 + $0x128] ss:$16 sps:$4 sm:$0xff]  }
  0xb5   :  { %1638 = vmatpush1.bf16.msra.mxu1 %v7949_v37  ;;  %1510 = vmatprep.subr.bf16.mxu0 %v7950_v38  ;;  %v7988_v37 = vld [vmem:[#allocation8 + $0x14c] ss:$16 sps:$4 sm:$0xff]   ;;  %v7990_v38 = vld [vmem:[#allocation8 + $0x140] ss:$16 sps:$4 sm:$0xff]  }
  0xb6   :  { %1639 = vmatprep.subr.bf16.mxu1 %v7952_v39  ;;  %v7991_v39 = vld [vmem:[#allocation8 + $0x148] ss:$16 sps:$4 sm:$0xff]  }
  0xb8   :  { %1511 = vmatpush1.bf16.msra.mxu0 %v7954_v40  ;;  %v7992_v40 = vld [vmem:[#allocation8 + $0x164] ss:$16 sps:$4 sm:$0xff]  }
  0xb9   :  { %1640 = vmatpush1.bf16.msra.mxu1 %v7955_v41  ;;  %1512 = vmatprep.subr.bf16.mxu0 %v7956_v42  ;;  %v7994_v41 = vld [vmem:[#allocation8 + $0x16c] ss:$16 sps:$4 sm:$0xff]   ;;  %v7996_v42 = vld [vmem:[#allocation8 + $0x160] ss:$16 sps:$4 sm:$0xff]  }
  0xba   :  { %1641 = vmatprep.subr.bf16.mxu1 %v7958_v43  ;;  %v7997_v43 = vld [vmem:[#allocation8 + $0x168] ss:$16 sps:$4 sm:$0xff]  }
  0xbc   :  { %1513 = vmatpush1.bf16.msra.mxu0 %v7960_v44  ;;  %v7998_v44 = vld [vmem:[#allocation8 + $0x184] ss:$16 sps:$4 sm:$0xff]  }
  0xbd   :  { %1642 = vmatpush1.bf16.msra.mxu1 %v7961_v45  ;;  %1514 = vmatprep.subr.bf16.mxu0 %v7962_v46  ;;  %v8000_v45 = vld [vmem:[#allocation8 + $0x18c] ss:$16 sps:$4 sm:$0xff]   ;;  %v8002_v46 = vld [vmem:[#allocation8 + $0x180] ss:$16 sps:$4 sm:$0xff]  }
  0xbe   :  { %1643 = vmatprep.subr.bf16.mxu1 %v7964_v47  ;;  %v8003_v47 = vld [vmem:[#allocation8 + $0x188] ss:$16 sps:$4 sm:$0xff]  }
  0xc0   :  { %1515 = vmatpush1.bf16.msra.mxu0 %v7966_v48  ;;  %v8004_v48 = vld [vmem:[#allocation8 + $0x1a4] ss:$16 sps:$4 sm:$0xff]  }
  0xc1   :  { %1644 = vmatpush1.bf16.msra.mxu1 %v7967_v49  ;;  %1516 = vmatprep.subr.bf16.mxu0 %v7968_v50  ;;  %v8006_v49 = vld [vmem:[#allocation8 + $0x1ac] ss:$16 sps:$4 sm:$0xff]   ;;  %v8008_v50 = vld [vmem:[#allocation8 + $0x1a0] ss:$16 sps:$4 sm:$0xff]  }
  0xc2   :  { %1645 = vmatprep.subr.bf16.mxu1 %v7970_v51  ;;  %v8009_v51 = vld [vmem:[#allocation8 + $0x1a8] ss:$16 sps:$4 sm:$0xff]  }
  0xc4   :  { %1517 = vmatpush1.bf16.msra.mxu0 %v7972_v52  ;;  %v8010_v52 = vld [vmem:[#allocation8 + $0x1c4] ss:$16 sps:$4 sm:$0xff]  }
  0xc5   :  { %1646 = vmatpush1.bf16.msra.mxu1 %v7973_v53  ;;  %1518 = vmatprep.subr.bf16.mxu0 %v7974_v54  ;;  %v8012_v53 = vld [vmem:[#allocation8 + $0x1cc] ss:$16 sps:$4 sm:$0xff]   ;;  %v8014_v54 = vld [vmem:[#allocation8 + $0x1c0] ss:$16 sps:$4 sm:$0xff]  }
  0xc6   :  { %1647 = vmatprep.subr.bf16.mxu1 %v7976_v55  ;;  %v8015_v55 = vld [vmem:[#allocation8 + $0x1c8] ss:$16 sps:$4 sm:$0xff]  }
  0xc8   :  { %1519 = vmatpush1.bf16.msra.mxu0 %v7978_v56  ;;  %v8016_v56 = vld [vmem:[#allocation8 + $0x1e4] ss:$16 sps:$4 sm:$0xff]  }
  0xc9   :  { %1648 = vmatpush1.bf16.msra.mxu1 %v7979_v57  ;;  %1520 = vmatprep.subr.bf16.mxu0 %v7980_v58  ;;  %v8018_v57 = vld [vmem:[#allocation8 + $0x1ec] ss:$16 sps:$4 sm:$0xff]   ;;  %v8020_v58 = vld [vmem:[#allocation8 + $0x1e0] ss:$16 sps:$4 sm:$0xff]  }
  0xca   :  { %1649 = vmatprep.subr.bf16.mxu1 %v7982_v59  ;;  %v8021_v59 = vld [vmem:[#allocation8 + $0x1e8] ss:$16 sps:$4 sm:$0xff]  }
  0xcc   :  { %1521 = vmatpush1.bf16.msra.mxu0 %v7984_v35 }
  0xcd   :  { %1650 = vmatpush1.bf16.msra.mxu1 %v7985_v36 }
  0xce   :  { %1651 = vmatprep.subr.bf16.mxu1 %v7988_v37 }
  0xd1   :  { %1652 = vmatpush1.bf16.msra.mxu1 %v7991_v39 }
  0xd2   :  { %1653 = vmatprep.subr.bf16.mxu1 %v7994_v41 }
  0xd5   :  { %1654 = vmatpush1.bf16.msra.mxu1 %v7997_v43 }
  0xd6   :  { %1655 = vmatprep.subr.bf16.mxu1 %v8000_v45 }
  0xd9   :  { %1656 = vmatpush1.bf16.msra.mxu1 %v8003_v47 }
  0xda   :  { %1657 = vmatprep.subr.bf16.mxu1 %v8006_v49 }
  0xdd   :  { %1658 = vmatpush1.bf16.msra.mxu1 %v8009_v51 }
  0xde   :  { %1659 = vmatprep.subr.bf16.mxu1 %v8012_v53 }
  0xe1   :  { %1660 = vmatpush1.bf16.msra.mxu1 %v8015_v55 }
  0xe2   :  { %1661 = vmatprep.subr.bf16.mxu1 %v8018_v57 }
  0xe5   :  { %1662 = vmatpush1.bf16.msra.mxu1 %v8021_v59 }
 0x13a   :  { %v167_v60 = vpop.xlane.xlu0 %166 }
 0x13b   :  { %v176_v61 = vmul.f32 0.0013020834, %v167_v60  ;;  %v8024_v60 = vld [vmem:[#allocation8 + $0x204] ss:$16 sps:$4 sm:$0xff]  }
 0x13d   :  { %v9001_v62 = vsub.f32 %v8964_v0, %v176_v61  ;;  %v9004_v63 = vsub.f32 %v8966_v1, %v176_v61  ;;  %v9007_v4 = vsub.f32 %v8968_v2, %v176_v61  ;;  %v9010_v11 = vsub.f32 %v8970_v3, %v176_v61 }
 0x13e   :  { %v174_v9 = vpop.xlane.xlu0 %173  ;;  %v9017_v0 = vsub.f32 %v8980_v8, %v176_v61  ;;  %v9031_v20 = vsub.f32 %v8987_v12, %v176_v61  ;;  %v8027_v61 = vld [vmem:[#allocation8 + $0x20c] ss:$16 sps:$4 sm:$0xff]  }
 0x13f   :  { %v177_v14 = vmul.f32 0.0013020834, %v174_v9  ;;  %v190_v15 = vmul.f32 %v9001_v62, %v9001_v62  ;;  %v191_v17 = vmul.f32 %v9004_v63, %v9004_v63  ;;  %v192_v1 = vmul.f32 %v9007_v4, %v9007_v4  ;;  %1674 = vmatprep.subr.bf16.mxu1 %v8027_v61 }
 0x140   :  { %v193_v8 = vmul.f32 %v9010_v11, %v9010_v11 }
 0x141   :  { %v202_v18 = vadd.f32 %v191_v17, %v190_v15  ;;  %v9022_v2 = vsub.f32 %v8974_v5, %v177_v14  ;;  %v9025_v3 = vsub.f32 %v8976_v6, %v177_v14  ;;  %v9028_v19 = vsub.f32 %v8978_v7, %v177_v14 }
 0x142   :  { %v9036_v22 = vsub.f32 %v8983_v10, %v177_v14  ;;  %v194_v7 = vmul.f32 %v9017_v0, %v9017_v0  ;;  %v9045_v12 = vsub.f32 %v8989_v13, %v177_v14  ;;  %v195_v10 = vmul.f32 %v9031_v20, %v9031_v20 }
 0x143   :  { %v203_v21 = vadd.f32 %v202_v18, %v192_v1  ;;  %v196_v5 = vmul.f32 %v9022_v2, %v9022_v2  ;;  %v197_v6 = vmul.f32 %v9025_v3, %v9025_v3  ;;  %v198_v24 = vmul.f32 %v9028_v19, %v9028_v19 }
 0x144   :  { %v9052_v27 = vsub.f32 %v8993_v16, %v177_v14  ;;  %v199_v28 = vmul.f32 %v9036_v22, %v9036_v22  ;;  %v200_v13 = vmul.f32 %v9045_v12, %v9045_v12  ;;  %v7986_v16 = vld [vmem:[#allocation8 + $0x144] ss:$16 sps:$4 sm:$0xff]   ;;  %v236_v15 = vlaneseq }
 0x145   :  { %v204_v23 = vadd.f32 %v203_v21, %v193_v8  ;;  %v209_v25 = vadd.f32 %v197_v6, %v196_v5  ;;  %1522 = vmatprep.subr.bf16.mxu0 %v7986_v16 }
 0x146   :  { %v201_v32 = vmul.f32 %v9052_v27, %v9052_v27  ;;  %1523 = vmatpush1.bf16.msra.mxu0 %v7990_v38  ;;  %v9061_v8 = vshrl.u32 %v236_v15, 7 }
 0x147   :  { %v205_v26 = vadd.f32 %v204_v23, %v194_v7  ;;  %v210_v29 = vadd.f32 %v209_v25, %v198_v24  ;;  %1524 = vmatprep.subr.bf16.mxu0 %v7992_v40  ;;  %v234_v7 = vld [vmem:[#allocation5] sm:$0x3f] }
 0x148   :  { %v9064_v5 = vsub.s32 1, %v9061_v8  ;;  %v9067_v6 = vsub.s32 2, %v9061_v8  ;;  %v9070_v23 = vsub.s32 0, %v9061_v8  ;;  %v9073_v24 = vsub.s32 3, %v9061_v8 }
 0x149   :  { %v206_v30 = vadd.f32 %v205_v26, %v195_v10  ;;  %v211_v31 = vadd.f32 %v210_v29, %v199_v28  ;;  %v9076_v25 = vsub.s32 5, %v9061_v8  ;;  %v9079_v10 = vsub.s32 4, %v9061_v8  ;;  %v278_v28 = vld [vmem:[#allocation7] sm:$0x3f] }
 0x14a   :  { %1525 = vmatpush1.bf16.msra.mxu0 %v7996_v42  ;;  %v243_v26 = vrot.slane %v234_v7, %v9064_v5  ;;  %v247_v29 = vrot.slane %v234_v7, %v9067_v6  ;;  %v287_v37 = vrot.slane %v278_v28, %v9064_v5  ;;  %v291_v38 = vrot.slane %v278_v28, %v9067_v6 }
 0x14b   :  { %207 = vadd.xlane.f32.xlu1 %v206_v30  ;;  %v212_v33 = vadd.f32 %v211_v31, %v200_v13  ;;  %1526 = vmatprep.subr.bf16.mxu0 %v7998_v44  ;;  %v239_v13 = vrot.slane %v234_v7, %v9070_v23  ;;  %v251_v31 = vrot.slane %v234_v7, %v9073_v24 }
 0x14c   :  { %v283_v42 = vrot.slane %v278_v28, %v9070_v23 }
 0x14d   :  { %v213_v34 = vadd.f32 %v212_v33, %v201_v32  ;;  %v259_v32 = vrot.slane %v234_v7, %v9076_v25  ;;  %v255_v33 = vrot.slane %v234_v7, %v9079_v10 }
 0x14e   :  { %1527 = vmatpush1.bf16.msra.mxu0 %v8002_v46 }
 0x14f   :  { %214 = vadd.xlane.f32.xlu1 %v213_v34  ;;  %1528 = vmatprep.subr.bf16.mxu0 %v8004_v48 }
 0x152   :  { %1529 = vmatpush1.bf16.msra.mxu0 %v8008_v50 }
 0x153   :  { %1530 = vmatprep.subr.bf16.mxu0 %v8010_v52 }
 0x156   :  { %1531 = vmatpush1.bf16.msra.mxu0 %v8014_v54 }
 0x157   :  { %1532 = vmatprep.subr.bf16.mxu0 %v8016_v56 }
 0x15a   :  { %1533 = vmatpush1.bf16.msra.mxu0 %v8020_v58 }
 0x15b   :  { %1545 = vmatprep.subr.bf16.mxu0 %v8024_v60 }
 0x1d8   :  { %v208_v9 = vpop.xlane.xlu1 %207 }
 0x1d9   :  { %v216_v14 = vmul.f32 0.0013020834, %v208_v9 }
 0x1db   :  { %v218_v17 = vadd.f32 1e-05, %v216_v14 }
 0x1dc   :  { %v215_v1 = vpop.xlane.xlu1 %214 }
 0x1dd   :  { %8406 = vrsqrt.f32 %v218_v17  ;;  %v217_v18 = vmul.f32 0.0013020834, %v215_v1  ;;  %v8025_v1 = vld [vmem:[#allocation8 + $0x208] ss:$16 sps:$4 sm:$0xff]  }
 0x1df   :  { %v219_v21 = vadd.f32 1e-05, %v217_v18 }
 0x1e1   :  { %8408 = vrsqrt.f32 %v219_v21 }
 0x1e7   :  { %v8407_v30 = vpop.eup %8406 }
 0x1e8   :  { %v223_v34 = vmul.f32 %v8407_v30, %v9004_v63  ;;  %v222_v35 = vmul.f32 %v8407_v30, %v9001_v62  ;;  %v225_v36 = vmul.f32 %v8407_v30, %v9010_v11  ;;  %v224_v16 = vmul.f32 %v8407_v30, %v9007_v4 }
 0x1e9   :  { %v227_v39 = vmul.f32 %v8407_v30, %v9031_v20  ;;  %v226_v40 = vmul.f32 %v8407_v30, %v9017_v0  ;;  %v303_v63 = vrot.slane %v278_v28, %v9076_v25  ;;  %v295_v62 = vrot.slane %v278_v28, %v9073_v24 }
 0x1ea   :  { %v267_v41 = vmul.f32 %v243_v26, %v223_v34  ;;  %v268_v43 = vmul.f32 %v247_v29, %v224_v16  ;;  %v299_v4 = vrot.slane %v278_v28, %v9079_v10  ;;  %v266_v20 = vmul.f32 %v239_v13, %v222_v35  ;;  %v8033_v28 = vld [vmem:[#allocation8 + $0x22c] ss:$16 sps:$4 sm:$0xff]   ;;  %v8034_v35 = vld [vmem:[#allocation8 + $0x240] ss:$16 sps:$4 sm:$0xff]   ;;  %v8042_v16 = vld [vmem:[#allocation8 + $0x264] ss:$16 sps:$4 sm:$0xff]  }
 0x1eb   :  { %v8409_v44 = vpop.eup %8408  ;;  %v271_v11 = vmul.f32 %v259_v32, %v227_v39  ;;  %v270_v45 = vmul.f32 %v255_v33, %v226_v40  ;;  %v269_v48 = vmul.f32 %v251_v31, %v225_v36  ;;  %v8039_v34 = vld [vmem:[#allocation8 + $0x24c] ss:$16 sps:$4 sm:$0xff]   ;;  %v8037_v36 = vld [vmem:[#allocation8 + $0x248] ss:$16 sps:$4 sm:$0xff]   ;;  %v8048_v40 = vld [vmem:[#allocation8 + $0x284] ss:$16 sps:$4 sm:$0xff]  }
 0x1ec   :  { %v229_v46 = vmul.f32 %v8409_v44, %v9025_v3  ;;  %v228_v47 = vmul.f32 %v8409_v44, %v9022_v2  ;;  %v311_v0 = vadd.f32 %v287_v37, %v267_v41  ;;  %v231_v49 = vmul.f32 %v8409_v44, %v9036_v22  ;;  %v8043_v39 = vld [vmem:[#allocation8 + $0x268] ss:$16 sps:$4 sm:$0xff]   ;;  %v8051_v41 = vld [vmem:[#allocation8 + $0x28c] ss:$16 sps:$4 sm:$0xff]  }
 0x1ed   :  { %v230_v50 = vmul.f32 %v8409_v44, %v9028_v19  ;;  %v312_v51 = vadd.f32 %v291_v38, %v268_v43  ;;  %v233_v54 = vmul.f32 %v8409_v44, %v9052_v27  ;;  %v315_v55 = vadd.f32 %v303_v63, %v271_v11  ;;  %v8022_v19 = vld [vmem:[#allocation8 + $0x200] ss:$16 sps:$4 sm:$0xff]   ;;  %v8049_v43 = vld [vmem:[#allocation8 + $0x288] ss:$16 sps:$4 sm:$0xff]  }
 0x1ee   :  { %v273_v52 = vmul.f32 %v243_v26, %v229_v46  ;;  %v272_v53 = vmul.f32 %v239_v13, %v228_v47  ;;  %v275_v56 = vmul.f32 %v251_v31, %v231_v49  ;;  %v232_v58 = vmul.f32 %v8409_v44, %v9045_v12  ;;  %v8030_v12 = vld [vmem:[#allocation8 + $0x224] ss:$16 sps:$4 sm:$0xff]   ;;  %v8028_v31 = vld [vmem:[#allocation8 + $0x220] ss:$16 sps:$4 sm:$0xff]   ;;  %v8057_v44 = vld [vmem:[#allocation8 + $0x2ac] ss:$16 sps:$4 sm:$0xff]  }
 0x1ef   :  { %v274_v57 = vmul.f32 %v247_v29, %v230_v50  ;;  %v314_v3 = vadd.f32 %v299_v4, %v270_v45  ;;  %v310_v2 = vadd.f32 %v283_v42, %v266_v20  ;;  %v277_v61 = vmul.f32 %v259_v32, %v233_v54  ;;  %v8031_v32 = vld [vmem:[#allocation8 + $0x228] ss:$16 sps:$4 sm:$0xff]   ;;  %v8060_v45 = vld [vmem:[#allocation8 + $0x2c4] ss:$16 sps:$4 sm:$0xff]   ;;  %v8058_v46 = vld [vmem:[#allocation8 + $0x2c0] ss:$16 sps:$4 sm:$0xff]  }
 0x1f0   :  { %v317_v59 = vadd.f32 %v287_v37, %v273_v52  ;;  %v316_v60 = vadd.f32 %v283_v42, %v272_v53  ;;  %v319_v9 = vadd.f32 %v295_v62, %v275_v56  ;;  %v276_v22 = vmul.f32 %v255_v33, %v232_v58  ;;  %v8036_v33 = vld [vmem:[#allocation8 + $0x244] ss:$16 sps:$4 sm:$0xff]   ;;  %v8045_v37 = vld [vmem:[#allocation8 + $0x26c] ss:$16 sps:$4 sm:$0xff]   ;;  %v8046_v42 = vld [vmem:[#allocation8 + $0x280] ss:$16 sps:$4 sm:$0xff]  }
 0x1f1   :  { %v318_v14 = vadd.f32 %v291_v38, %v274_v57  ;;  %v321_v21 = vadd.f32 %v303_v63, %v277_v61  ;;  %v313_v7 = vadd.f32 %v295_v62, %v269_v48  ;;  %v8040_v38 = vld [vmem:[#allocation8 + $0x260] ss:$16 sps:$4 sm:$0xff]   ;;  %v8054_v63 = vld [vmem:[#allocation8 + $0x2a4] ss:$16 sps:$4 sm:$0xff]   ;;  %v8055_v11 = vld [vmem:[#allocation8 + $0x2a8] ss:$16 sps:$4 sm:$0xff]  }
 0x1f2   :  { %v323_v17 = vpack.c.bf16 %v317_v59, %v311_v0  ;;  %v322_v18 = vpack.c.bf16 %v316_v60, %v310_v2  ;;  %v320_v26 = vadd.f32 %v299_v4, %v276_v22  ;;  %v8052_v62 = vld [vmem:[#allocation8 + $0x2a0] ss:$16 sps:$4 sm:$0xff]   ;;  %v8063_v4 = vld [vmem:[#allocation8 + $0x2cc] ss:$16 sps:$4 sm:$0xff]   ;;  %v8061_v47 = vld [vmem:[#allocation8 + $0x2c8] ss:$16 sps:$4 sm:$0xff]  }
 0x1f3   :  { %v9105_v27 = vpack.c.bf16 %v318_v14, %v312_v51  ;;  %v9107_v29 = vpack.c.bf16 %v321_v21, %v315_v55  ;;  %v325_v30 = vpack.c.bf16 %v319_v9, %v313_v7  ;;  %v8066_v20 = vld [vmem:[#allocation8 + $0x2e4] ss:$16 sps:$4 sm:$0xff]   ;;  %v8069_v48 = vld [vmem:[#allocation8 + $0x2ec] ss:$16 sps:$4 sm:$0xff]   ;;  %v8064_v0 = vld [vmem:[#allocation8 + $0x2e0] ss:$16 sps:$4 sm:$0xff]  }
 0x1f4   :  { %1534 = vmatprep.mubr.bf16.mxu0 %v323_v17  ;;  %1663 = vmatprep.mubr.bf16.mxu1 %v323_v17  ;;  %v9109_v13 = vpack.c.bf16 %v320_v26, %v314_v3  ;;  %v8067_v49 = vld [vmem:[#allocation8 + $0x2e8] ss:$16 sps:$4 sm:$0xff]   ;;  %v8072_v50 = vld [vmem:[#allocation8 + $0x304] ss:$16 sps:$4 sm:$0xff]   ;;  %v8075_v51 = vld [vmem:[#allocation8 + $0x30c] ss:$16 sps:$4 sm:$0xff]  }
 0x1f5   :  { %1535 = vmatmul.mubr.bf16.vlgmr.msra.gmra.mrb[0].mxu0 %v322_v18  ;;  %1664 = vmatmul.mubr.bf16.vlgmr.msra.gmra.mrb[0].mxu1 %v322_v18  ;;  %v8070_v52 = vld [vmem:[#allocation8 + $0x300] ss:$16 sps:$4 sm:$0xff]   ;;  %v8073_v53 = vld [vmem:[#allocation8 + $0x308] ss:$16 sps:$4 sm:$0xff]   ;;  %v8078_v54 = vld [vmem:[#allocation8 + $0x324] ss:$16 sps:$4 sm:$0xff]  }
 0x1f6   :  { %1546 = vmatpush1.bf16.msra.mxu0 %v8022_v19  ;;  %1675 = vmatpush1.bf16.msra.mxu1 %v8025_v1  ;;  %v8081_v55 = vld [vmem:[#allocation8 + $0x32c] ss:$16 sps:$4 sm:$0xff]   ;;  %v8076_v56 = vld [vmem:[#allocation8 + $0x320] ss:$16 sps:$4 sm:$0xff]   ;;  %v8079_v57 = vld [vmem:[#allocation8 + $0x328] ss:$16 sps:$4 sm:$0xff]  }
 0x1f7   :  { %1577 = vmatprep.mubr.bf16.mxu0 %v325_v30  ;;  %1706 = vmatprep.mubr.bf16.mxu1 %v325_v30  ;;  %v8084_v58 = vld [vmem:[#allocation8 + $0x344] ss:$16 sps:$4 sm:$0xff]   ;;  %v8087_v3 = vld [vmem:[#allocation8 + $0x34c] ss:$16 sps:$4 sm:$0xff]   ;;  %v8082_v59 = vld [vmem:[#allocation8 + $0x340] ss:$16 sps:$4 sm:$0xff]  }
 0x1f8   :  { %1547 = vmatprep.subr.bf16.mxu0 %v8030_v12  ;;  %1676 = vmatprep.subr.bf16.mxu1 %v8033_v28  ;;  %v8085_v2 = vld [vmem:[#allocation8 + $0x348] ss:$16 sps:$4 sm:$0xff]   ;;  %v8090_v60 = vld [vmem:[#allocation8 + $0x364] ss:$16 sps:$4 sm:$0xff]   ;;  %v8093_v61 = vld [vmem:[#allocation8 + $0x36c] ss:$16 sps:$4 sm:$0xff]  }
 0x1f9   :  { %v8088_v9 = vld [vmem:[#allocation8 + $0x360] ss:$16 sps:$4 sm:$0xff]   ;;  %v8091_v14 = vld [vmem:[#allocation8 + $0x368] ss:$16 sps:$4 sm:$0xff]   ;;  %v8096_v22 = vld [vmem:[#allocation8 + $0x384] ss:$16 sps:$4 sm:$0xff]  }
 0x1fa   :  { %1548 = vmatpush1.bf16.msra.mxu0 %v8028_v31  ;;  %1677 = vmatpush1.bf16.msra.mxu1 %v8031_v32  ;;  %v8099_v17 = vld [vmem:[#allocation8 + $0x38c] ss:$16 sps:$4 sm:$0xff]   ;;  %v8094_v19 = vld [vmem:[#allocation8 + $0x380] ss:$16 sps:$4 sm:$0xff]   ;;  %v8097_v1 = vld [vmem:[#allocation8 + $0x388] ss:$16 sps:$4 sm:$0xff]  }
 0x1fb   :  { %1549 = vmatprep.subr.bf16.mxu0 %v8036_v33  ;;  %1678 = vmatprep.subr.bf16.mxu1 %v8039_v34  ;;  %v8102_v18 = vld [vmem:[#allocation8 + $0x3a4] ss:$16 sps:$4 sm:$0xff]   ;;  %v8105_v21 = vld [vmem:[#allocation8 + $0x3ac] ss:$16 sps:$4 sm:$0xff]   ;;  %v8100_v7 = vld [vmem:[#allocation8 + $0x3a0] ss:$16 sps:$4 sm:$0xff]  }
 0x1fc   :  { %v8103_v26 = vld [vmem:[#allocation8 + $0x3a8] ss:$16 sps:$4 sm:$0xff]   ;;  %v8108_v12 = vld [vmem:[#allocation8 + $0x3c4] ss:$16 sps:$4 sm:$0xff]   ;;  %v8111_v28 = vld [vmem:[#allocation8 + $0x3cc] ss:$16 sps:$4 sm:$0xff]  }
 0x1fd   :  { %v8106_v30 = vld [vmem:[#allocation8 + $0x3c0] ss:$16 sps:$4 sm:$0xff]   ;;  %v8109_v31 = vld [vmem:[#allocation8 + $0x3c8] ss:$16 sps:$4 sm:$0xff]   ;;  %v8114_v32 = vld [vmem:[#allocation8 + $0x3e4] ss:$16 sps:$4 sm:$0xff]  }
 0x1fe   :  { %1550 = vmatpush1.bf16.msra.mxu0 %v8034_v35  ;;  %1679 = vmatpush1.bf16.msra.mxu1 %v8037_v36  ;;  %v8117_v33 = vld [vmem:[#allocation8 + $0x3ec] ss:$16 sps:$4 sm:$0xff]   ;;  %v8112_v34 = vld [vmem:[#allocation8 + $0x3e0] ss:$16 sps:$4 sm:$0xff]   ;;  %v8115_v35 = vld [vmem:[#allocation8 + $0x3e8] ss:$16 sps:$4 sm:$0xff]  }
 0x1ff   :  { %1551 = vmatprep.subr.bf16.mxu0 %v8042_v16  ;;  %1680 = vmatprep.subr.bf16.mxu1 %v8045_v37  ;;  %v8120_v36 = vld [vmem:[#allocation8 + $0x404] ss:$16 sps:$4 sm:$0xff]   ;;  %v8123_v16 = vld [vmem:[#allocation8 + $0x40c] ss:$16 sps:$4 sm:$0xff]   ;;  %v8118_v37 = vld [vmem:[#allocation8 + $0x400] ss:$16 sps:$4 sm:$0xff]  }
 0x202   :  { %1552 = vmatpush1.bf16.msra.mxu0 %v8040_v38  ;;  %1681 = vmatpush1.bf16.msra.mxu1 %v8043_v39  ;;  %v8121_v38 = vld [vmem:[#allocation8 + $0x408] ss:$16 sps:$4 sm:$0xff]   ;;  %v8126_v39 = vld [vmem:[#allocation8 + $0x424] ss:$16 sps:$4 sm:$0xff]  }
 0x203   :  { %1553 = vmatprep.subr.bf16.mxu0 %v8048_v40  ;;  %1682 = vmatprep.subr.bf16.mxu1 %v8051_v41  ;;  %v8129_v40 = vld [vmem:[#allocation8 + $0x42c] ss:$16 sps:$4 sm:$0xff]   ;;  %v8124_v41 = vld [vmem:[#allocation8 + $0x420] ss:$16 sps:$4 sm:$0xff]  }
 0x206   :  { %1554 = vmatpush1.bf16.msra.mxu0 %v8046_v42  ;;  %1683 = vmatpush1.bf16.msra.mxu1 %v8049_v43  ;;  %v8127_v42 = vld [vmem:[#allocation8 + $0x428] ss:$16 sps:$4 sm:$0xff]   ;;  %v8132_v43 = vld [vmem:[#allocation8 + $0x444] ss:$16 sps:$4 sm:$0xff]  }
 0x207   :  { %1555 = vmatprep.subr.bf16.mxu0 %v8054_v63  ;;  %1684 = vmatprep.subr.bf16.mxu1 %v8057_v44  ;;  %v8135_v63 = vld [vmem:[#allocation8 + $0x44c] ss:$16 sps:$4 sm:$0xff]   ;;  %v8130_v44 = vld [vmem:[#allocation8 + $0x440] ss:$16 sps:$4 sm:$0xff]  }
 0x20a   :  { %1556 = vmatpush1.bf16.msra.mxu0 %v8052_v62  ;;  %1685 = vmatpush1.bf16.msra.mxu1 %v8055_v11  ;;  %v8133_v62 = vld [vmem:[#allocation8 + $0x448] ss:$16 sps:$4 sm:$0xff]   ;;  %v8138_v11 = vld [vmem:[#allocation8 + $0x464] ss:$16 sps:$4 sm:$0xff]  }
 0x20b   :  { %1557 = vmatprep.subr.bf16.mxu0 %v8060_v45  ;;  %1686 = vmatprep.subr.bf16.mxu1 %v8063_v4  ;;  %v8136_v45 = vld [vmem:[#allocation8 + $0x460] ss:$16 sps:$4 sm:$0xff]   ;;  %v8139_v4 = vld [vmem:[#allocation8 + $0x468] ss:$16 sps:$4 sm:$0xff]  }
 0x20e   :  { %1558 = vmatpush1.bf16.msra.mxu0 %v8058_v46  ;;  %1687 = vmatpush1.bf16.msra.mxu1 %v8061_v47  ;;  %v8144_v46 = vld [vmem:[#allocation8 + $0x484] ss:$16 sps:$4 sm:$0xff]   ;;  %v8142_v47 = vld [vmem:[#allocation8 + $0x480] ss:$16 sps:$4 sm:$0xff]  }
 0x20f   :  { %1559 = vmatprep.subr.bf16.mxu0 %v8066_v20  ;;  %1688 = vmatprep.subr.bf16.mxu1 %v8069_v48  ;;  %v8145_v20 = vld [vmem:[#allocation8 + $0x488] ss:$16 sps:$4 sm:$0xff]   ;;  %v8150_v48 = vld [vmem:[#allocation8 + $0x4a4] ss:$16 sps:$4 sm:$0xff]  }
 0x212   :  { %1560 = vmatpush1.bf16.msra.mxu0 %v8064_v0  ;;  %1689 = vmatpush1.bf16.msra.mxu1 %v8067_v49  ;;  %v8153_v0 = vld [vmem:[#allocation8 + $0x4ac] ss:$16 sps:$4 sm:$0xff]   ;;  %v8148_v49 = vld [vmem:[#allocation8 + $0x4a0] ss:$16 sps:$4 sm:$0xff]  }
 0x213   :  { %1561 = vmatprep.subr.bf16.mxu0 %v8072_v50  ;;  %1690 = vmatprep.subr.bf16.mxu1 %v8075_v51  ;;  %v8151_v50 = vld [vmem:[#allocation8 + $0x4a8] ss:$16 sps:$4 sm:$0xff]   ;;  %v8156_v51 = vld [vmem:[#allocation8 + $0x4c4] ss:$16 sps:$4 sm:$0xff]  }
 0x216   :  { %1562 = vmatpush1.bf16.msra.mxu0 %v8070_v52  ;;  %1691 = vmatpush1.bf16.msra.mxu1 %v8073_v53  ;;  %v8159_v52 = vld [vmem:[#allocation8 + $0x4cc] ss:$16 sps:$4 sm:$0xff]   ;;  %v8154_v53 = vld [vmem:[#allocation8 + $0x4c0] ss:$16 sps:$4 sm:$0xff]  }
 0x217   :  { %1563 = vmatprep.subr.bf16.mxu0 %v8078_v54  ;;  %1692 = vmatprep.subr.bf16.mxu1 %v8081_v55  ;;  %v8157_v54 = vld [vmem:[#allocation8 + $0x4c8] ss:$16 sps:$4 sm:$0xff]   ;;  %v8162_v55 = vld [vmem:[#allocation8 + $0x4e4] ss:$16 sps:$4 sm:$0xff]  }
 0x21a   :  { %1564 = vmatpush1.bf16.msra.mxu0 %v8076_v56  ;;  %1693 = vmatpush1.bf16.msra.mxu1 %v8079_v57  ;;  %v8165_v56 = vld [vmem:[#allocation8 + $0x4ec] ss:$16 sps:$4 sm:$0xff]   ;;  %v8160_v57 = vld [vmem:[#allocation8 + $0x4e0] ss:$16 sps:$4 sm:$0xff]  }
 0x21b   :  { %1565 = vmatprep.subr.bf16.mxu0 %v8084_v58  ;;  %1694 = vmatprep.subr.bf16.mxu1 %v8087_v3  ;;  %v8163_v58 = vld [vmem:[#allocation8 + $0x4e8] ss:$16 sps:$4 sm:$0xff]   ;;  %v8168_v3 = vld [vmem:[#allocation8 + $0x504] ss:$16 sps:$4 sm:$0xff]  }
 0x21e   :  { %1566 = vmatpush1.bf16.msra.mxu0 %v8082_v59  ;;  %1695 = vmatpush1.bf16.msra.mxu1 %v8085_v2  ;;  %v8171_v59 = vld [vmem:[#allocation8 + $0x50c] ss:$16 sps:$4 sm:$0xff]   ;;  %v8166_v2 = vld [vmem:[#allocation8 + $0x500] ss:$16 sps:$4 sm:$0xff]  }
 0x21f   :  { %1567 = vmatprep.subr.bf16.mxu0 %v8090_v60  ;;  %1696 = vmatprep.subr.bf16.mxu1 %v8093_v61  ;;  %v8169_v60 = vld [vmem:[#allocation8 + $0x508] ss:$16 sps:$4 sm:$0xff]   ;;  %v8174_v61 = vld [vmem:[#allocation8 + $0x524] ss:$16 sps:$4 sm:$0xff]  }
 0x222   :  { %1568 = vmatpush1.bf16.msra.mxu0 %v8088_v9  ;;  %1697 = vmatpush1.bf16.msra.mxu1 %v8091_v14  ;;  %v8177_v9 = vld [vmem:[#allocation8 + $0x52c] ss:$16 sps:$4 sm:$0xff]   ;;  %v8172_v14 = vld [vmem:[#allocation8 + $0x520] ss:$16 sps:$4 sm:$0xff]  }
 0x223   :  { %1569 = vmatprep.subr.bf16.mxu0 %v8096_v22  ;;  %1698 = vmatprep.subr.bf16.mxu1 %v8099_v17  ;;  %v8175_v22 = vld [vmem:[#allocation8 + $0x528] ss:$16 sps:$4 sm:$0xff]   ;;  %v8180_v17 = vld [vmem:[#allocation8 + $0x544] ss:$16 sps:$4 sm:$0xff]  }
 0x226   :  { %1570 = vmatpush1.bf16.msra.mxu0 %v8094_v19  ;;  %1699 = vmatpush1.bf16.msra.mxu1 %v8097_v1  ;;  %v8183_v19 = vld [vmem:[#allocation8 + $0x54c] ss:$16 sps:$4 sm:$0xff]   ;;  %v8178_v1 = vld [vmem:[#allocation8 + $0x540] ss:$16 sps:$4 sm:$0xff]  }
 0x227   :  { %1571 = vmatprep.subr.bf16.mxu0 %v8102_v18  ;;  %1700 = vmatprep.subr.bf16.mxu1 %v8105_v21  ;;  %v8181_v18 = vld [vmem:[#allocation8 + $0x548] ss:$16 sps:$4 sm:$0xff]   ;;  %v8186_v21 = vld [vmem:[#allocation8 + $0x564] ss:$16 sps:$4 sm:$0xff]  }
 0x22a   :  { %1572 = vmatpush1.bf16.msra.mxu0 %v8100_v7  ;;  %1701 = vmatpush1.bf16.msra.mxu1 %v8103_v26  ;;  %v8189_v7 = vld [vmem:[#allocation8 + $0x56c] ss:$16 sps:$4 sm:$0xff]   ;;  %v8184_v26 = vld [vmem:[#allocation8 + $0x560] ss:$16 sps:$4 sm:$0xff]  }
 0x22b   :  { %1573 = vmatprep.subr.bf16.mxu0 %v8108_v12  ;;  %1702 = vmatprep.subr.bf16.mxu1 %v8111_v28  ;;  %v8187_v12 = vld [vmem:[#allocation8 + $0x568] ss:$16 sps:$4 sm:$0xff]   ;;  %v8192_v28 = vld [vmem:[#allocation8 + $0x584] ss:$16 sps:$4 sm:$0xff]  }
 0x22e   :  { %1574 = vmatpush1.bf16.msra.mxu0 %v8106_v30  ;;  %1703 = vmatpush1.bf16.msra.mxu1 %v8109_v31  ;;  %v8195_v30 = vld [vmem:[#allocation8 + $0x58c] ss:$16 sps:$4 sm:$0xff]   ;;  %v8190_v31 = vld [vmem:[#allocation8 + $0x580] ss:$16 sps:$4 sm:$0xff]  }
 0x22f   :  { %1575 = vmatprep.subr.bf16.mxu0 %v8114_v32  ;;  %1704 = vmatprep.subr.bf16.mxu1 %v8117_v33  ;;  %v8193_v32 = vld [vmem:[#allocation8 + $0x588] ss:$16 sps:$4 sm:$0xff]   ;;  %v8198_v33 = vld [vmem:[#allocation8 + $0x5a4] ss:$16 sps:$4 sm:$0xff]  }
 0x232   :  { %1576 = vmatpush1.bf16.msra.mxu0 %v8112_v34  ;;  %1705 = vmatpush1.bf16.msra.mxu1 %v8115_v35  ;;  %v8201_v34 = vld [vmem:[#allocation8 + $0x5ac] ss:$16 sps:$4 sm:$0xff]   ;;  %v8196_v35 = vld [vmem:[#allocation8 + $0x5a0] ss:$16 sps:$4 sm:$0xff]  }
 0x233   :  { %1588 = vmatprep.subr.bf16.mxu0 %v8120_v36  ;;  %1717 = vmatprep.subr.bf16.mxu1 %v8123_v16  ;;  %v8199_v36 = vld [vmem:[#allocation8 + $0x5a8] ss:$16 sps:$4 sm:$0xff]   ;;  %v8204_v16 = vld [vmem:[#allocation8 + $0x5c4] ss:$16 sps:$4 sm:$0xff]  }
 0x235   :  { %1578 = vmatmul.mubr.bf16.vlgmr.msra.gmra.mrb[0].mxu0 %v9105_v27  ;;  %1707 = vmatmul.mubr.bf16.vlgmr.msra.gmra.mrb[0].mxu1 %v9105_v27  ;;  %v8141_v27 = vld [vmem:[#allocation8 + $0x46c] ss:$16 sps:$4 sm:$0xff]  }
 0x236   :  { %1589 = vmatpush1.bf16.msra.mxu0 %v8118_v37  ;;  %1620 = vmatprep.mubr.bf16.mxu0 %v9107_v29  ;;  %v8207_v37 = vld [vmem:[#allocation8 + $0x5cc] ss:$16 sps:$4 sm:$0xff]  }
 0x237   :  { %1718 = vmatpush1.bf16.msra.mxu1 %v8121_v38  ;;  %1749 = vmatprep.mubr.bf16.mxu1 %v9107_v29  ;;  %v8147_v29 = vld [vmem:[#allocation8 + $0x48c] ss:$16 sps:$4 sm:$0xff]   ;;  %v8202_v38 = vld [vmem:[#allocation8 + $0x5c0] ss:$16 sps:$4 sm:$0xff]  }
 0x238   :  { %1590 = vmatprep.subr.bf16.mxu0 %v8126_v39  ;;  %1719 = vmatprep.subr.bf16.mxu1 %v8129_v40  ;;  %v8205_v39 = vld [vmem:[#allocation8 + $0x5c8] ss:$16 sps:$4 sm:$0xff]   ;;  %v8210_v40 = vld [vmem:[#allocation8 + $0x5e4] ss:$16 sps:$4 sm:$0xff]  }
 0x23a   :  { %1591 = vmatpush1.bf16.msra.mxu0 %v8124_v41  ;;  %v8213_v41 = vld [vmem:[#allocation8 + $0x5ec] ss:$16 sps:$4 sm:$0xff]  }
 0x23b   :  { %1720 = vmatpush1.bf16.msra.mxu1 %v8127_v42  ;;  %1592 = vmatprep.subr.bf16.mxu0 %v8132_v43  ;;  %v8208_v42 = vld [vmem:[#allocation8 + $0x5e0] ss:$16 sps:$4 sm:$0xff]   ;;  %v8211_v43 = vld [vmem:[#allocation8 + $0x5e8] ss:$16 sps:$4 sm:$0xff]  }
 0x23c   :  { %1721 = vmatprep.subr.bf16.mxu1 %v8135_v63  ;;  %v8216_v63 = vld [vmem:[#allocation11 + $0x4] ss:$16 sps:$4 sm:$0xff]  }
 0x23e   :  { %1593 = vmatpush1.bf16.msra.mxu0 %v8130_v44  ;;  %v8219_v44 = vld [vmem:[#allocation11 + $0xc] ss:$16 sps:$4 sm:$0xff]  }
 0x23f   :  { %1722 = vmatpush1.bf16.msra.mxu1 %v8133_v62  ;;  %1594 = vmatprep.subr.bf16.mxu0 %v8138_v11  ;;  %v8214_v62 = vld [vmem:[#allocation11] ss:$16 sps:$4 sm:$0xff]   ;;  %v8217_v11 = vld [vmem:[#allocation11 + $0x8] ss:$16 sps:$4 sm:$0xff]  }
 0x240   :  { %1723 = vmatprep.subr.bf16.mxu1 %v8141_v27  ;;  %v8222_v27 = vld [vmem:[#allocation11 + $0x24] ss:$16 sps:$4 sm:$0xff]  }
 0x242   :  { %1595 = vmatpush1.bf16.msra.mxu0 %v8136_v45  ;;  %v8225_v45 = vld [vmem:[#allocation11 + $0x2c] ss:$16 sps:$4 sm:$0xff]  }
 0x243   :  { %1724 = vmatpush1.bf16.msra.mxu1 %v8139_v4  ;;  %1596 = vmatprep.subr.bf16.mxu0 %v8144_v46  ;;  %v8220_v4 = vld [vmem:[#allocation11 + $0x20] ss:$16 sps:$4 sm:$0xff]   ;;  %v8223_v46 = vld [vmem:[#allocation11 + $0x28] ss:$16 sps:$4 sm:$0xff]  }
 0x244   :  { %1725 = vmatprep.subr.bf16.mxu1 %v8147_v29  ;;  %v8228_v29 = vld [vmem:[#allocation11 + $0x44] ss:$16 sps:$4 sm:$0xff]  }
 0x246   :  { %1597 = vmatpush1.bf16.msra.mxu0 %v8142_v47  ;;  %v8231_v47 = vld [vmem:[#allocation11 + $0x4c] ss:$16 sps:$4 sm:$0xff]  }
 0x247   :  { %1726 = vmatpush1.bf16.msra.mxu1 %v8145_v20  ;;  %1598 = vmatprep.subr.bf16.mxu0 %v8150_v48  ;;  %v8226_v20 = vld [vmem:[#allocation11 + $0x40] ss:$16 sps:$4 sm:$0xff]   ;;  %v8229_v48 = vld [vmem:[#allocation11 + $0x48] ss:$16 sps:$4 sm:$0xff]  }
 0x248   :  { %1727 = vmatprep.subr.bf16.mxu1 %v8153_v0  ;;  %v8234_v0 = vld [vmem:[#allocation11 + $0x64] ss:$16 sps:$4 sm:$0xff]  }
 0x24a   :  { %1599 = vmatpush1.bf16.msra.mxu0 %v8148_v49  ;;  %v8237_v49 = vld [vmem:[#allocation11 + $0x6c] ss:$16 sps:$4 sm:$0xff]  }
 0x24b   :  { %1728 = vmatpush1.bf16.msra.mxu1 %v8151_v50  ;;  %1600 = vmatprep.subr.bf16.mxu0 %v8156_v51  ;;  %v8232_v50 = vld [vmem:[#allocation11 + $0x60] ss:$16 sps:$4 sm:$0xff]   ;;  %v8240_v51 = vld [vmem:[#allocation11 + $0x84] ss:$16 sps:$4 sm:$0xff]  }
 0x24c   :  { %1729 = vmatprep.subr.bf16.mxu1 %v8159_v52  ;;  %v8243_v52 = vld [vmem:[#allocation11 + $0x8c] ss:$16 sps:$4 sm:$0xff]  }
 0x24e   :  { %1601 = vmatpush1.bf16.msra.mxu0 %v8154_v53  ;;  %v8238_v53 = vld [vmem:[#allocation11 + $0x80] ss:$16 sps:$4 sm:$0xff]  }
 0x24f   :  { %1730 = vmatpush1.bf16.msra.mxu1 %v8157_v54  ;;  %1602 = vmatprep.subr.bf16.mxu0 %v8162_v55  ;;  %v8241_v54 = vld [vmem:[#allocation11 + $0x88] ss:$16 sps:$4 sm:$0xff]   ;;  %v8246_v55 = vld [vmem:[#allocation11 + $0xa4] ss:$16 sps:$4 sm:$0xff]  }
 0x250   :  { %1731 = vmatprep.subr.bf16.mxu1 %v8165_v56  ;;  %v8249_v56 = vld [vmem:[#allocation11 + $0xac] ss:$16 sps:$4 sm:$0xff]  }
 0x252   :  { %1603 = vmatpush1.bf16.msra.mxu0 %v8160_v57  ;;  %v8244_v57 = vld [vmem:[#allocation11 + $0xa0] ss:$16 sps:$4 sm:$0xff]  }
 0x253   :  { %1732 = vmatpush1.bf16.msra.mxu1 %v8163_v58  ;;  %1604 = vmatprep.subr.bf16.mxu0 %v8168_v3  ;;  %v8247_v58 = vld [vmem:[#allocation11 + $0xa8] ss:$16 sps:$4 sm:$0xff]   ;;  %v8252_v3 = vld [vmem:[#allocation11 + $0xc4] ss:$16 sps:$4 sm:$0xff]  }
 0x254   :  { %1733 = vmatprep.subr.bf16.mxu1 %v8171_v59  ;;  %v8255_v59 = vld [vmem:[#allocation11 + $0xcc] ss:$16 sps:$4 sm:$0xff]  }
 0x256   :  { %1605 = vmatpush1.bf16.msra.mxu0 %v8166_v2  ;;  %v8250_v2 = vld [vmem:[#allocation11 + $0xc0] ss:$16 sps:$4 sm:$0xff]  }
 0x257   :  { %1734 = vmatpush1.bf16.msra.mxu1 %v8169_v60  ;;  %1606 = vmatprep.subr.bf16.mxu0 %v8174_v61  ;;  %v8253_v60 = vld [vmem:[#allocation11 + $0xc8] ss:$16 sps:$4 sm:$0xff]   ;;  %v8258_v61 = vld [vmem:[#allocation11 + $0xe4] ss:$16 sps:$4 sm:$0xff]  }
 0x258   :  { %1735 = vmatprep.subr.bf16.mxu1 %v8177_v9  ;;  %v8261_v9 = vld [vmem:[#allocation11 + $0xec] ss:$16 sps:$4 sm:$0xff]  }
 0x25a   :  { %1607 = vmatpush1.bf16.msra.mxu0 %v8172_v14  ;;  %v8256_v14 = vld [vmem:[#allocation11 + $0xe0] ss:$16 sps:$4 sm:$0xff]  }
 0x25b   :  { %1736 = vmatpush1.bf16.msra.mxu1 %v8175_v22  ;;  %1608 = vmatprep.subr.bf16.mxu0 %v8180_v17  ;;  %v8259_v22 = vld [vmem:[#allocation11 + $0xe8] ss:$16 sps:$4 sm:$0xff]   ;;  %v8264_v17 = vld [vmem:[#allocation11 + $0x104] ss:$16 sps:$4 sm:$0xff]  }
 0x25c   :  { %1737 = vmatprep.subr.bf16.mxu1 %v8183_v19  ;;  %v8267_v19 = vld [vmem:[#allocation11 + $0x10c] ss:$16 sps:$4 sm:$0xff]  }
 0x25e   :  { %1609 = vmatpush1.bf16.msra.mxu0 %v8178_v1  ;;  %v8262_v1 = vld [vmem:[#allocation11 + $0x100] ss:$16 sps:$4 sm:$0xff]  }
 0x25f   :  { %1738 = vmatpush1.bf16.msra.mxu1 %v8181_v18  ;;  %1610 = vmatprep.subr.bf16.mxu0 %v8186_v21  ;;  %v8265_v18 = vld [vmem:[#allocation11 + $0x108] ss:$16 sps:$4 sm:$0xff]   ;;  %v8270_v21 = vld [vmem:[#allocation11 + $0x124] ss:$16 sps:$4 sm:$0xff]  }
 0x260   :  { %1739 = vmatprep.subr.bf16.mxu1 %v8189_v7  ;;  %v8273_v7 = vld [vmem:[#allocation11 + $0x12c] ss:$16 sps:$4 sm:$0xff]  }
 0x262   :  { %1611 = vmatpush1.bf16.msra.mxu0 %v8184_v26  ;;  %v8268_v26 = vld [vmem:[#allocation11 + $0x120] ss:$16 sps:$4 sm:$0xff]  }
 0x263   :  { %1740 = vmatpush1.bf16.msra.mxu1 %v8187_v12  ;;  %1612 = vmatprep.subr.bf16.mxu0 %v8192_v28  ;;  %v8271_v12 = vld [vmem:[#allocation11 + $0x128] ss:$16 sps:$4 sm:$0xff]   ;;  %v8276_v28 = vld [vmem:[#allocation11 + $0x144] ss:$16 sps:$4 sm:$0xff]  }
 0x264   :  { %1741 = vmatprep.subr.bf16.mxu1 %v8195_v30  ;;  %v8279_v30 = vld [vmem:[#allocation11 + $0x14c] ss:$16 sps:$4 sm:$0xff]  }
 0x266   :  { %1613 = vmatpush1.bf16.msra.mxu0 %v8190_v31  ;;  %v8274_v31 = vld [vmem:[#allocation11 + $0x140] ss:$16 sps:$4 sm:$0xff]  }
 0x267   :  { %1742 = vmatpush1.bf16.msra.mxu1 %v8193_v32  ;;  %1614 = vmatprep.subr.bf16.mxu0 %v8198_v33  ;;  %v8277_v32 = vld [vmem:[#allocation11 + $0x148] ss:$16 sps:$4 sm:$0xff]   ;;  %v8282_v33 = vld [vmem:[#allocation11 + $0x164] ss:$16 sps:$4 sm:$0xff]  }
 0x268   :  { %1743 = vmatprep.subr.bf16.mxu1 %v8201_v34  ;;  %v8285_v34 = vld [vmem:[#allocation11 + $0x16c] ss:$16 sps:$4 sm:$0xff]  }
 0x26a   :  { %1615 = vmatpush1.bf16.msra.mxu0 %v8196_v35  ;;  %v8280_v35 = vld [vmem:[#allocation11 + $0x160] ss:$16 sps:$4 sm:$0xff]  }
 0x26b   :  { %1744 = vmatpush1.bf16.msra.mxu1 %v8199_v36  ;;  %1616 = vmatprep.subr.bf16.mxu0 %v8204_v16  ;;  %v8283_v36 = vld [vmem:[#allocation11 + $0x168] ss:$16 sps:$4 sm:$0xff]   ;;  %v8288_v16 = vld [vmem:[#allocation11 + $0x184] ss:$16 sps:$4 sm:$0xff]  }
 0x26c   :  { %1745 = vmatprep.subr.bf16.mxu1 %v8207_v37  ;;  %v8291_v37 = vld [vmem:[#allocation11 + $0x18c] ss:$16 sps:$4 sm:$0xff]  }
 0x26e   :  { %1617 = vmatpush1.bf16.msra.mxu0 %v8202_v38  ;;  %v8286_v38 = vld [vmem:[#allocation11 + $0x180] ss:$16 sps:$4 sm:$0xff]  }
 0x26f   :  { %1746 = vmatpush1.bf16.msra.mxu1 %v8205_v39  ;;  %1618 = vmatprep.subr.bf16.mxu0 %v8210_v40  ;;  %v8289_v39 = vld [vmem:[#allocation11 + $0x188] ss:$16 sps:$4 sm:$0xff]   ;;  %v8294_v40 = vld [vmem:[#allocation11 + $0x1a4] ss:$16 sps:$4 sm:$0xff]  }
 0x270   :  { %1747 = vmatprep.subr.bf16.mxu1 %v8213_v41  ;;  %v8297_v41 = vld [vmem:[#allocation11 + $0x1ac] ss:$16 sps:$4 sm:$0xff]  }
 0x272   :  { %1619 = vmatpush1.bf16.msra.mxu0 %v8208_v42  ;;  %v8292_v42 = vld [vmem:[#allocation11 + $0x1a0] ss:$16 sps:$4 sm:$0xff]  }
 0x273   :  { %1748 = vmatpush1.bf16.msra.mxu1 %v8211_v43  ;;  %2594 = vmatprep.subr.bf16.mxu0 %v8216_v63  ;;  %v8295_v43 = vld [vmem:[#allocation11 + $0x1a8] ss:$16 sps:$4 sm:$0xff]   ;;  %v8300_v63 = vld [vmem:[#allocation11 + $0x1c4] ss:$16 sps:$4 sm:$0xff]  }
 0x274   :  { %2680 = vmatprep.subr.bf16.mxu1 %v8219_v44  ;;  %v8303_v44 = vld [vmem:[#allocation11 + $0x1cc] ss:$16 sps:$4 sm:$0xff]  }
 0x275   :  { %1621 = vmatmul.mubr.bf16.vlgmr.msra.gmra.mrb[0].mxu0 %v9109_v13 }
 0x276   :  { %1750 = vmatmul.mubr.bf16.vlgmr.msra.gmra.mrb[0].mxu1 %v9109_v13  ;;  %2595 = vmatpush1.bf16.msra.mxu0 %v8214_v62  ;;  %v8235_v13 = vld [vmem:[#allocation11 + $0x68] ss:$16 sps:$4 sm:$0xff]   ;;  %v8298_v62 = vld [vmem:[#allocation11 + $0x1c0] ss:$16 sps:$4 sm:$0xff]  }
 0x277   :  { %2681 = vmatpush1.bf16.msra.mxu1 %v8217_v11  ;;  %2596 = vmatprep.subr.bf16.mxu0 %v8222_v27  ;;  %v8301_v11 = vld [vmem:[#allocation11 + $0x1c8] ss:$16 sps:$4 sm:$0xff]   ;;  %v8306_v27 = vld [vmem:[#allocation11 + $0x1e4] ss:$16 sps:$4 sm:$0xff]  }
 0x278   :  { %2682 = vmatprep.subr.bf16.mxu1 %v8225_v45  ;;  %v8309_v45 = vld [vmem:[#allocation11 + $0x1ec] ss:$16 sps:$4 sm:$0xff]  }
 0x27a   :  { %2597 = vmatpush1.bf16.msra.mxu0 %v8220_v4  ;;  %v8304_v4 = vld [vmem:[#allocation11 + $0x1e0] ss:$16 sps:$4 sm:$0xff]  }
 0x27b   :  { %2683 = vmatpush1.bf16.msra.mxu1 %v8223_v46  ;;  %2598 = vmatprep.subr.bf16.mxu0 %v8228_v29  ;;  %v8307_v46 = vld [vmem:[#allocation11 + $0x1e8] ss:$16 sps:$4 sm:$0xff]   ;;  %v8312_v29 = vld [vmem:[#allocation11 + $0x204] ss:$16 sps:$4 sm:$0xff]  }
 0x27c   :  { %2684 = vmatprep.subr.bf16.mxu1 %v8231_v47  ;;  %v8315_v47 = vld [vmem:[#allocation11 + $0x20c] ss:$16 sps:$4 sm:$0xff]  }
 0x27e   :  { %2599 = vmatpush1.bf16.msra.mxu0 %v8226_v20  ;;  %v520_v20 = vld [vmem:[#allocation10] sm:$0xf] }
 0x27f   :  { %2685 = vmatpush1.bf16.msra.mxu1 %v8229_v48  ;;  %2600 = vmatprep.subr.bf16.mxu0 %v8234_v0  ;;  %v525_v48 = vrot.slane %v520_v20, %v9070_v23  ;;  %v533_v0 = vrot.slane %v520_v20, %v9067_v6 }
 0x280   :  { %2686 = vmatprep.subr.bf16.mxu1 %v8237_v49  ;;  %v529_v49 = vrot.slane %v520_v20, %v9064_v5 }
 0x282   :  { %2601 = vmatpush1.bf16.msra.mxu0 %v8232_v50  ;;  %v537_v50 = vrot.slane %v520_v20, %v9073_v24 }
 0x283   :  { %2687 = vmatpush1.bf16.msra.mxu1 %v8235_v13  ;;  %2602 = vmatprep.subr.bf16.mxu0 %v8240_v51 }
 0x284   :  { %2688 = vmatprep.subr.bf16.mxu1 %v8243_v52 }
 0x286   :  { %2603 = vmatpush1.bf16.msra.mxu0 %v8238_v53 }
 0x287   :  { %2689 = vmatpush1.bf16.msra.mxu1 %v8241_v54  ;;  %2604 = vmatprep.subr.bf16.mxu0 %v8246_v55 }
 0x288   :  { %2690 = vmatprep.subr.bf16.mxu1 %v8249_v56 }
 0x28a   :  { %2605 = vmatpush1.bf16.msra.mxu0 %v8244_v57 }
 0x28b   :  { %2691 = vmatpush1.bf16.msra.mxu1 %v8247_v58  ;;  %2606 = vmatprep.subr.bf16.mxu0 %v8252_v3 }
 0x28c   :  { %2692 = vmatprep.subr.bf16.mxu1 %v8255_v59 }
 0x28e   :  { %2607 = vmatpush1.bf16.msra.mxu0 %v8250_v2 }
 0x28f   :  { %2693 = vmatpush1.bf16.msra.mxu1 %v8253_v60  ;;  %2608 = vmatprep.subr.bf16.mxu0 %v8258_v61 }
 0x290   :  { %2694 = vmatprep.subr.bf16.mxu1 %v8261_v9 }
 0x292   :  { %2609 = vmatpush1.bf16.msra.mxu0 %v8256_v14 }
 0x293   :  { %2695 = vmatpush1.bf16.msra.mxu1 %v8259_v22  ;;  %2610 = vmatprep.subr.bf16.mxu0 %v8264_v17 }
 0x294   :  { %2696 = vmatprep.subr.bf16.mxu1 %v8267_v19 }
 0x296   :  { %2611 = vmatpush1.bf16.msra.mxu0 %v8262_v1 }
 0x297   :  { %2697 = vmatpush1.bf16.msra.mxu1 %v8265_v18  ;;  %2612 = vmatprep.subr.bf16.mxu0 %v8270_v21 }
 0x298   :  { %2698 = vmatprep.subr.bf16.mxu1 %v8273_v7 }
 0x29a   :  { %2613 = vmatpush1.bf16.msra.mxu0 %v8268_v26 }
 0x29b   :  { %2699 = vmatpush1.bf16.msra.mxu1 %v8271_v12  ;;  %2614 = vmatprep.subr.bf16.mxu0 %v8276_v28 }
 0x29c   :  { %2700 = vmatprep.subr.bf16.mxu1 %v8279_v30 }
 0x29e   :  { %2615 = vmatpush1.bf16.msra.mxu0 %v8274_v31 }
 0x29f   :  { %2701 = vmatpush1.bf16.msra.mxu1 %v8277_v32  ;;  %2616 = vmatprep.subr.bf16.mxu0 %v8282_v33 }
 0x2a0   :  { %2702 = vmatprep.subr.bf16.mxu1 %v8285_v34 }
 0x2a2   :  { %2617 = vmatpush1.bf16.msra.mxu0 %v8280_v35 }
 0x2a3   :  { %2703 = vmatpush1.bf16.msra.mxu1 %v8283_v36  ;;  %2618 = vmatprep.subr.bf16.mxu0 %v8288_v16 }
 0x2a4   :  { %2704 = vmatprep.subr.bf16.mxu1 %v8291_v37 }
 0x2a6   :  { %2619 = vmatpush1.bf16.msra.mxu0 %v8286_v38 }
 0x2a7   :  { %2705 = vmatpush1.bf16.msra.mxu1 %v8289_v39  ;;  %2620 = vmatprep.subr.bf16.mxu0 %v8294_v40 }
 0x2a8   :  { %2706 = vmatprep.subr.bf16.mxu1 %v8297_v41 }
 0x2aa   :  { %2621 = vmatpush1.bf16.msra.mxu0 %v8292_v42 }
 0x2ab   :  { %2707 = vmatpush1.bf16.msra.mxu1 %v8295_v43  ;;  %2622 = vmatprep.subr.bf16.mxu0 %v8300_v63 }
 0x2ac   :  { %2708 = vmatprep.subr.bf16.mxu1 %v8303_v44 }
 0x2ae   :  { %2623 = vmatpush1.bf16.msra.mxu0 %v8298_v62 }
 0x2af   :  { %2709 = vmatpush1.bf16.msra.mxu1 %v8301_v11  ;;  %2624 = vmatprep.subr.bf16.mxu0 %v8306_v27 }
 0x2b0   :  { %2710 = vmatprep.subr.bf16.mxu1 %v8309_v45 }
 0x2b2   :  { %2625 = vmatpush1.bf16.msra.mxu0 %v8304_v4 }
 0x2b3   :  { %2711 = vmatpush1.bf16.msra.mxu1 %v8307_v46  ;;  %2637 = vmatprep.subr.bf16.mxu0 %v8312_v29 }
 0x2b4   :  { %2723 = vmatprep.subr.bf16.mxu1 %v8315_v47 }
 0x348   :  { %v1622_v13 = vpop.f32.mrb[0].mxu0 }
 0x349   :  { %v7802_v51 = vadd.f32 %v1622_v13, %v525_v48  ;;  %v1751_v52 = vpop.f32.mrb[0].mxu1  ;;  %v1624_v53 = vpop.f32.mrb[1].mxu0 }
 0x34a   :  { %v7806_v54 = vadd.f32 %v1751_v52, %v533_v0  ;;  %v7803_v55 = vadd.f32 %v1624_v53, %v529_v49  ;;  %v1753_v56 = vpop.f32.mrb[1].mxu1  ;;  %v1626_v57 = vpop.f32.mrb[2].mxu0  ;;  %v8310_v53 = vld [vmem:[#allocation11 + $0x200] ss:$16 sps:$4 sm:$0xff]  }
 0x34b   :  { %v1768_v58 = vmul.f32 0.70710677, %v7802_v51  ;;  %v7807_v3 = vadd.f32 %v1753_v56, %v537_v50  ;;  %v7804_v59 = vadd.f32 %v1626_v57, %v525_v48  ;;  %v1755_v2 = vpop.f32.mrb[2].mxu1  ;;  %v1628_v60 = vpop.f32.mrb[3].mxu0  ;;  %v1760_v34 = vmul.f32 0.5, %v7802_v51 }
 0x34c   :  { %v1770_v61 = vmul.f32 0.70710677, %v7806_v54  ;;  %v1769_v9 = vmul.f32 0.70710677, %v7803_v55  ;;  %v1757_v22 = vpop.f32.mrb[3].mxu1  ;;  %v7808_v19 = vadd.f32 %v1755_v2, %v533_v0  ;;  %v7805_v1 = vadd.f32 %v1628_v60, %v529_v49 }
 0x34d   :  { %8410 = verf.f32 %v1768_v58  ;;  %v1771_v14 = vmul.f32 0.70710677, %v7807_v3  ;;  %v1772_v17 = vmul.f32 0.70710677, %v7804_v59  ;;  %v7809_v18 = vadd.f32 %v1757_v22, %v537_v50  ;;  %v8318_v56 = vld [vmem:[#allocation11 + $0x224] ss:$16 sps:$4 sm:$0xff]  }
 0x34e   :  { %8412 = verf.f32 %v1770_v61  ;;  %v1774_v21 = vmul.f32 0.70710677, %v7808_v19  ;;  %v1773_v7 = vmul.f32 0.70710677, %v7805_v1  ;;  %v1762_v35 = vmul.f32 0.5, %v7806_v54 }
 0x34f   :  { %8414 = verf.f32 %v1769_v9  ;;  %v1775_v26 = vmul.f32 0.70710677, %v7809_v18  ;;  %v1761_v37 = vmul.f32 0.5, %v7803_v55  ;;  %v1764_v39 = vmul.f32 0.5, %v7804_v59  ;;  %v8313_v54 = vld [vmem:[#allocation11 + $0x208] ss:$16 sps:$4 sm:$0xff]  }
 0x350   :  { %8416 = verf.f32 %v1771_v14  ;;  %v1763_v42 = vmul.f32 0.5, %v7807_v3  ;;  %v1766_v63 = vmul.f32 0.5, %v7808_v19  ;;  %v1765_v45 = vmul.f32 0.5, %v7805_v1  ;;  %v8321_v57 = vld [vmem:[#allocation11 + $0x22c] ss:$16 sps:$4 sm:$0xff]  }
 0x351   :  { %8418 = verf.f32 %v1772_v17  ;;  %v1767_v47 = vmul.f32 0.5, %v7809_v18  ;;  %v8316_v58 = vld [vmem:[#allocation11 + $0x220] ss:$16 sps:$4 sm:$0xff]   ;;  %v8319_v3 = vld [vmem:[#allocation11 + $0x228] ss:$16 sps:$4 sm:$0xff]  }
 0x352   :  { %8420 = verf.f32 %v1774_v21  ;;  %v8324_v59 = vld [vmem:[#allocation11 + $0x244] ss:$16 sps:$4 sm:$0xff]   ;;  %v8327_v2 = vld [vmem:[#allocation11 + $0x24c] ss:$16 sps:$4 sm:$0xff]   ;;  %v8322_v60 = vld [vmem:[#allocation11 + $0x240] ss:$16 sps:$4 sm:$0xff]  }
 0x353   :  { %8422 = verf.f32 %v1773_v7  ;;  %v8325_v61 = vld [vmem:[#allocation11 + $0x248] ss:$16 sps:$4 sm:$0xff]   ;;  %v8330_v9 = vld [vmem:[#allocation11 + $0x264] ss:$16 sps:$4 sm:$0xff]   ;;  %v8333_v14 = vld [vmem:[#allocation11 + $0x26c] ss:$16 sps:$4 sm:$0xff]  }
 0x354   :  { %8424 = verf.f32 %v1775_v26  ;;  %v8328_v22 = vld [vmem:[#allocation11 + $0x260] ss:$16 sps:$4 sm:$0xff]   ;;  %v8331_v17 = vld [vmem:[#allocation11 + $0x268] ss:$16 sps:$4 sm:$0xff]   ;;  %v8336_v19 = vld [vmem:[#allocation11 + $0x284] ss:$16 sps:$4 sm:$0xff]  }
 0x355   :  { %v8339_v1 = vld [vmem:[#allocation11 + $0x28c] ss:$16 sps:$4 sm:$0xff]   ;;  %v8334_v18 = vld [vmem:[#allocation11 + $0x280] ss:$16 sps:$4 sm:$0xff]   ;;  %v8337_v21 = vld [vmem:[#allocation11 + $0x288] ss:$16 sps:$4 sm:$0xff]  }
 0x356   :  { %v8342_v7 = vld [vmem:[#allocation11 + $0x2a4] ss:$16 sps:$4 sm:$0xff]   ;;  %v8345_v26 = vld [vmem:[#allocation11 + $0x2ac] ss:$16 sps:$4 sm:$0xff]  }
 0x357   :  { %v8411_v12 = vpop.eup %8410 }
 0x358   :  { %v8413_v28 = vpop.eup %8412  ;;  %v1784_v32 = vadd.f32 1.0, %v8411_v12  ;;  %v8340_v12 = vld [vmem:[#allocation11 + $0x2a0] ss:$16 sps:$4 sm:$0xff]  }
 0x359   :  { %v8415_v30 = vpop.eup %8414  ;;  %v1786_v36 = vadd.f32 1.0, %v8413_v28  ;;  %v8343_v28 = vld [vmem:[#allocation11 + $0x2a8] ss:$16 sps:$4 sm:$0xff]  }
 0x35a   :  { %v8417_v31 = vpop.eup %8416  ;;  %v1785_v38 = vadd.f32 1.0, %v8415_v30  ;;  %v1792_v11 = vmul.f32 %v1784_v32, %v1760_v34  ;;  %v8348_v30 = vld [vmem:[#allocation11 + $0x2c4] ss:$16 sps:$4 sm:$0xff]   ;;  %v8346_v32 = vld [vmem:[#allocation11 + $0x2c0] ss:$16 sps:$4 sm:$0xff]  }
 0x35b   :  { %v8419_v33 = vpop.eup %8418  ;;  %v1787_v43 = vadd.f32 1.0, %v8417_v31  ;;  %v1794_v46 = vmul.f32 %v1786_v36, %v1762_v35  ;;  %v8351_v31 = vld [vmem:[#allocation11 + $0x2cc] ss:$16 sps:$4 sm:$0xff]   ;;  %v8354_v34 = vld [vmem:[#allocation11 + $0x2e4] ss:$16 sps:$4 sm:$0xff]  }
 0x35c   :  { %v8421_v16 = vpop.eup %8420  ;;  %v1788_v40 = vadd.f32 1.0, %v8419_v33  ;;  %v1793_v48 = vmul.f32 %v1785_v38, %v1761_v37  ;;  %v8349_v33 = vld [vmem:[#allocation11 + $0x2c8] ss:$16 sps:$4 sm:$0xff]   ;;  %v8357_v35 = vld [vmem:[#allocation11 + $0x2ec] ss:$16 sps:$4 sm:$0xff]  }
 0x35d   :  { %v8423_v41 = vpop.eup %8422  ;;  %v1790_v44 = vadd.f32 1.0, %v8421_v16  ;;  %v1795_v50 = vmul.f32 %v1787_v43, %v1763_v42  ;;  %v8352_v36 = vld [vmem:[#allocation11 + $0x2e0] ss:$16 sps:$4 sm:$0xff]   ;;  %v8355_v16 = vld [vmem:[#allocation11 + $0x2e8] ss:$16 sps:$4 sm:$0xff]  }
 0x35e   :  { %v8425_v62 = vpop.eup %8424  ;;  %v1796_v27 = vmul.f32 %v1788_v40, %v1764_v39  ;;  %v1789_v4 = vadd.f32 1.0, %v8423_v41  ;;  %v8360_v37 = vld [vmem:[#allocation11 + $0x304] ss:$16 sps:$4 sm:$0xff]   ;;  %v8363_v38 = vld [vmem:[#allocation11 + $0x30c] ss:$16 sps:$4 sm:$0xff]  }
 0x35f   :  { %v1798_v29 = vmul.f32 %v1790_v44, %v1766_v63  ;;  %v1791_v20 = vadd.f32 1.0, %v8425_v62  ;;  %v8358_v39 = vld [vmem:[#allocation11 + $0x300] ss:$16 sps:$4 sm:$0xff]   ;;  %v8361_v40 = vld [vmem:[#allocation11 + $0x308] ss:$16 sps:$4 sm:$0xff]  }
 0x360   :  { %v1800_v0 = vpack.c.bf16 %v1796_v27, %v1792_v11  ;;  %v1797_v49 = vmul.f32 %v1789_v4, %v1765_v45  ;;  %v8366_v41 = vld [vmem:[#allocation11 + $0x324] ss:$16 sps:$4 sm:$0xff]   ;;  %v8369_v42 = vld [vmem:[#allocation11 + $0x32c] ss:$16 sps:$4 sm:$0xff]   ;;  %v8364_v43 = vld [vmem:[#allocation11 + $0x320] ss:$16 sps:$4 sm:$0xff]  }
 0x361   :  { %v9121_v13 = vpack.c.bf16 %v1798_v29, %v1794_v46  ;;  %v1799_v51 = vmul.f32 %v1791_v20, %v1767_v47  ;;  %v8367_v63 = vld [vmem:[#allocation11 + $0x328] ss:$16 sps:$4 sm:$0xff]   ;;  %v8372_v44 = vld [vmem:[#allocation11 + $0x344] ss:$16 sps:$4 sm:$0xff]   ;;  %v8375_v62 = vld [vmem:[#allocation11 + $0x34c] ss:$16 sps:$4 sm:$0xff]  }
 0x362   :  { %v1801_v52 = vpack.c.bf16 %v1797_v49, %v1793_v48  ;;  %v8370_v11 = vld [vmem:[#allocation11 + $0x340] ss:$16 sps:$4 sm:$0xff]   ;;  %v8373_v27 = vld [vmem:[#allocation11 + $0x348] ss:$16 sps:$4 sm:$0xff]   ;;  %v8378_v45 = vld [vmem:[#allocation11 + $0x364] ss:$16 sps:$4 sm:$0xff]  }
 0x363   :  { %v1803_v55 = vpack.c.bf16 %v1799_v51, %v1795_v50  ;;  %v8381_v4 = vld [vmem:[#allocation11 + $0x36c] ss:$16 sps:$4 sm:$0xff]   ;;  %v8376_v46 = vld [vmem:[#allocation11 + $0x360] ss:$16 sps:$4 sm:$0xff]   ;;  %v8379_v29 = vld [vmem:[#allocation11 + $0x368] ss:$16 sps:$4 sm:$0xff]  }
 0x364   :  { %2626 = vmatprep.mubr.bf16.mxu0 %v1801_v52  ;;  %2712 = vmatprep.mubr.bf16.mxu1 %v1801_v52  ;;  %v8384_v47 = vld [vmem:[#allocation11 + $0x384] ss:$16 sps:$4 sm:$0xff]   ;;  %v8387_v20 = vld [vmem:[#allocation11 + $0x38c] ss:$16 sps:$4 sm:$0xff]   ;;  %v8382_v48 = vld [vmem:[#allocation11 + $0x380] ss:$16 sps:$4 sm:$0xff]  }
 0x365   :  { %2627 = vmatmul.mubr.bf16.vlgmr.msra.gmra.mrb[4].mxu0 %v1800_v0  ;;  %2713 = vmatmul.mubr.bf16.vlgmr.msra.gmra.mrb[4].mxu1 %v1800_v0  ;;  %v8385_v0 = vld [vmem:[#allocation11 + $0x388] ss:$16 sps:$4 sm:$0xff]   ;;  %v8390_v49 = vld [vmem:[#allocation11 + $0x3a4] ss:$16 sps:$4 sm:$0xff]   ;;  %v8393_v50 = vld [vmem:[#allocation11 + $0x3ac] ss:$16 sps:$4 sm:$0xff]  }
 0x366   :  { %2638 = vmatpush1.bf16.msra.mxu0 %v8310_v53  ;;  %2724 = vmatpush1.bf16.msra.mxu1 %v8313_v54  ;;  %v8388_v51 = vld [vmem:[#allocation11 + $0x3a0] ss:$16 sps:$4 sm:$0xff]   ;;  %v8391_v52 = vld [vmem:[#allocation11 + $0x3a8] ss:$16 sps:$4 sm:$0xff]   ;;  %v8396_v53 = vld [vmem:[#allocation11 + $0x3c4] ss:$16 sps:$4 sm:$0xff]  }
 0x367   :  { %2669 = vmatprep.mubr.bf16.mxu0 %v1803_v55  ;;  %2755 = vmatprep.mubr.bf16.mxu1 %v1803_v55  ;;  %v8399_v54 = vld [vmem:[#allocation11 + $0x3cc] ss:$16 sps:$4 sm:$0xff]   ;;  %v8394_v55 = vld [vmem:[#allocation11 + $0x3c0] ss:$16 sps:$4 sm:$0xff]  }
 0x368   :  { %2639 = vmatprep.subr.bf16.mxu0 %v8318_v56  ;;  %2725 = vmatprep.subr.bf16.mxu1 %v8321_v57  ;;  %v8397_v56 = vld [vmem:[#allocation11 + $0x3c8] ss:$16 sps:$4 sm:$0xff]   ;;  %v8402_v57 = vld [vmem:[#allocation11 + $0x3e4] ss:$16 sps:$4 sm:$0xff]  }
 0x36a   :  { %2640 = vmatpush1.bf16.msra.mxu0 %v8316_v58  ;;  %2726 = vmatpush1.bf16.msra.mxu1 %v8319_v3  ;;  %v8405_v58 = vld [vmem:[#allocation11 + $0x3ec] ss:$16 sps:$4 sm:$0xff]   ;;  %v2810_v3 = vld [vmem:[#allocation14] sm:$0xff] }
 0x36b   :  { %2641 = vmatprep.subr.bf16.mxu0 %v8324_v59  ;;  %2727 = vmatprep.subr.bf16.mxu1 %v8327_v2  ;;  %v2818_v59 = vld [vmem:[#allocation14 + $0x40] sm:$0xff]  ;;  %v2811_v2 = vld [vmem:[#allocation14 + $0x8] sm:$0xff] }
 0x36e   :  { %2642 = vmatpush1.bf16.msra.mxu0 %v8322_v60  ;;  %2728 = vmatpush1.bf16.msra.mxu1 %v8325_v61  ;;  %v2819_v60 = vld [vmem:[#allocation14 + $0x48] sm:$0xff] }
 0x36f   :  { %2643 = vmatprep.subr.bf16.mxu0 %v8330_v9  ;;  %2729 = vmatprep.subr.bf16.mxu1 %v8333_v14  ;;  %v8400_v61 = vld [vmem:[#allocation11 + $0x3e0] ss:$16 sps:$4 sm:$0xff]   ;;  %v8403_v9 = vld [vmem:[#allocation11 + $0x3e8] ss:$16 sps:$4 sm:$0xff]   ;;  %v7291_v14 = vcombine.high %v2810_v3, %v2818_v59 }
 0x372   :  { %2644 = vmatpush1.bf16.msra.mxu0 %v8328_v22  ;;  %2730 = vmatpush1.bf16.msra.mxu1 %v8331_v17  ;;  %v7293_v22 = vcombine.high %v2811_v2, %v2819_v60  ;;  %v2826_v17 = vld [vmem:[#allocation14 + $0x80] sm:$0xff] }
 0x373   :  { %2645 = vmatprep.subr.bf16.mxu0 %v8336_v19  ;;  %2731 = vmatprep.subr.bf16.mxu1 %v8339_v1  ;;  %v2834_v19 = vld [vmem:[#allocation14 + $0xc0] sm:$0xff]  ;;  %v2827_v1 = vld [vmem:[#allocation14 + $0x88] sm:$0xff] }
 0x376   :  { %2646 = vmatpush1.bf16.msra.mxu0 %v8334_v18  ;;  %2732 = vmatpush1.bf16.msra.mxu1 %v8337_v21  ;;  %v2835_v18 = vld [vmem:[#allocation14 + $0xc8] sm:$0xff]  ;;  %v7290_v21 = vcombine.low %v2810_v3, %v2818_v59  ;;  %v2922_v3 = vld [vmem:[#allocation14 + $0x380] sm:$0xff] }
 0x377   :  { %2647 = vmatprep.subr.bf16.mxu0 %v8342_v7  ;;  %2733 = vmatprep.subr.bf16.mxu1 %v8345_v26  ;;  %v7292_v7 = vcombine.low %v2811_v2, %v2819_v60  ;;  %v7307_v26 = vcombine.high %v2826_v17, %v2834_v19  ;;  %v2930_v59 = vld [vmem:[#allocation14 + $0x3c0] sm:$0xff]  ;;  %v2923_v2 = vld [vmem:[#allocation14 + $0x388] sm:$0xff] }
 0x378   :  { %v2931_v60 = vld [vmem:[#allocation14 + $0x3c8] sm:$0xff] }
 0x37a   :  { %2648 = vmatpush1.bf16.msra.mxu0 %v8340_v12  ;;  %2734 = vmatpush1.bf16.msra.mxu1 %v8343_v28  ;;  %v7309_v12 = vcombine.high %v2827_v1, %v2835_v18  ;;  %v2842_v28 = vld [vmem:[#allocation14 + $0x100] sm:$0xff] }
 0x37b   :  { %2649 = vmatprep.subr.bf16.mxu0 %v8348_v30  ;;  %2735 = vmatprep.subr.bf16.mxu1 %v8351_v31  ;;  %v2850_v30 = vld [vmem:[#allocation14 + $0x140] sm:$0xff]  ;;  %v2843_v31 = vld [vmem:[#allocation14 + $0x108] sm:$0xff] }
 0x37e   :  { %2650 = vmatpush1.bf16.msra.mxu0 %v8346_v32  ;;  %2736 = vmatpush1.bf16.msra.mxu1 %v8349_v33  ;;  %v2851_v32 = vld [vmem:[#allocation14 + $0x148] sm:$0xff]  ;;  %v7306_v33 = vcombine.low %v2826_v17, %v2834_v19  ;;  %v2938_v17 = vld [vmem:[#allocation14 + $0x400] sm:$0xff] }
 0x37f   :  { %2651 = vmatprep.subr.bf16.mxu0 %v8354_v34  ;;  %2737 = vmatprep.subr.bf16.mxu1 %v8357_v35  ;;  %v7308_v34 = vcombine.low %v2827_v1, %v2835_v18  ;;  %v7323_v35 = vcombine.high %v2842_v28, %v2850_v30  ;;  %v2946_v19 = vld [vmem:[#allocation14 + $0x440] sm:$0xff]  ;;  %v2939_v1 = vld [vmem:[#allocation14 + $0x408] sm:$0xff] }
 0x380   :  { %v2947_v18 = vld [vmem:[#allocation14 + $0x448] sm:$0xff] }
 0x382   :  { %2652 = vmatpush1.bf16.msra.mxu0 %v8352_v36  ;;  %2738 = vmatpush1.bf16.msra.mxu1 %v8355_v16  ;;  %v7325_v36 = vcombine.high %v2843_v31, %v2851_v32  ;;  %v2858_v16 = vld [vmem:[#allocation14 + $0x180] sm:$0xff] }
 0x383   :  { %2653 = vmatprep.subr.bf16.mxu0 %v8360_v37  ;;  %2739 = vmatprep.subr.bf16.mxu1 %v8363_v38  ;;  %v2866_v37 = vld [vmem:[#allocation14 + $0x1c0] sm:$0xff]  ;;  %v2859_v38 = vld [vmem:[#allocation14 + $0x188] sm:$0xff] }
 0x386   :  { %2654 = vmatpush1.bf16.msra.mxu0 %v8358_v39  ;;  %2740 = vmatpush1.bf16.msra.mxu1 %v8361_v40  ;;  %v2867_v39 = vld [vmem:[#allocation14 + $0x1c8] sm:$0xff]  ;;  %v7322_v40 = vcombine.low %v2842_v28, %v2850_v30  ;;  %v2954_v28 = vld [vmem:[#allocation14 + $0x480] sm:$0xff] }
 0x387   :  { %2655 = vmatprep.subr.bf16.mxu0 %v8366_v41  ;;  %2741 = vmatprep.subr.bf16.mxu1 %v8369_v42  ;;  %v7324_v41 = vcombine.low %v2843_v31, %v2851_v32  ;;  %v7339_v42 = vcombine.high %v2858_v16, %v2866_v37  ;;  %v2962_v30 = vld [vmem:[#allocation14 + $0x4c0] sm:$0xff]  ;;  %v2955_v31 = vld [vmem:[#allocation14 + $0x488] sm:$0xff] }
 0x388   :  { %v2963_v32 = vld [vmem:[#allocation14 + $0x4c8] sm:$0xff] }
 0x38a   :  { %2656 = vmatpush1.bf16.msra.mxu0 %v8364_v43  ;;  %2742 = vmatpush1.bf16.msra.mxu1 %v8367_v63  ;;  %v2874_v43 = vld [vmem:[#allocation14 + $0x200] sm:$0xff] }
 0x38b   :  { %2657 = vmatprep.subr.bf16.mxu0 %v8372_v44  ;;  %2743 = vmatprep.subr.bf16.mxu1 %v8375_v62  ;;  %v2882_v63 = vld [vmem:[#allocation14 + $0x240] sm:$0xff]  ;;  %v2875_v44 = vld [vmem:[#allocation14 + $0x208] sm:$0xff] }
 0x38c   :  { %v2883_v62 = vld [vmem:[#allocation14 + $0x248] sm:$0xff] }
 0x38e   :  { %2658 = vmatpush1.bf16.msra.mxu0 %v8370_v11  ;;  %2744 = vmatpush1.bf16.msra.mxu1 %v8373_v27  ;;  %v7338_v11 = vcombine.low %v2858_v16, %v2866_v37  ;;  %v7340_v27 = vcombine.low %v2859_v38, %v2867_v39  ;;  %v7434_v16 = vcombine.low %v2954_v28, %v2962_v30 }
 0x38f   :  { %2659 = vmatprep.subr.bf16.mxu0 %v8378_v45  ;;  %2745 = vmatprep.subr.bf16.mxu1 %v8381_v4  ;;  %v7355_v45 = vcombine.high %v2874_v43, %v2882_v63  ;;  %v7357_v4 = vcombine.high %v2875_v44, %v2883_v62  ;;  %v7436_v37 = vcombine.low %v2955_v31, %v2963_v32 }
 0x392   :  { %2660 = vmatpush1.bf16.msra.mxu0 %v8376_v46  ;;  %2746 = vmatpush1.bf16.msra.mxu1 %v8379_v29  ;;  %v2890_v46 = vld [vmem:[#allocation14 + $0x280] sm:$0xff] }
 0x393   :  { %2661 = vmatprep.subr.bf16.mxu0 %v8384_v47  ;;  %2747 = vmatprep.subr.bf16.mxu1 %v8387_v20  ;;  %v2898_v29 = vld [vmem:[#allocation14 + $0x2c0] sm:$0xff]  ;;  %v2891_v47 = vld [vmem:[#allocation14 + $0x288] sm:$0xff] }
 0x394   :  { %v2899_v20 = vld [vmem:[#allocation14 + $0x2c8] sm:$0xff] }
 0x396   :  { %2662 = vmatpush1.bf16.msra.mxu0 %v8382_v48  ;;  %2748 = vmatpush1.bf16.msra.mxu1 %v8385_v0  ;;  %v7354_v48 = vcombine.low %v2874_v43, %v2882_v63  ;;  %v7356_v0 = vcombine.low %v2875_v44, %v2883_v62  ;;  %v2986_v44 = vld [vmem:[#allocation14 + $0x580] sm:$0xff] }
 0x397   :  { %2663 = vmatprep.subr.bf16.mxu0 %v8390_v49  ;;  %2749 = vmatprep.subr.bf16.mxu1 %v8393_v50  ;;  %v7371_v49 = vcombine.high %v2890_v46, %v2898_v29  ;;  %v7373_v50 = vcombine.high %v2891_v47, %v2899_v20  ;;  %v2994_v62 = vld [vmem:[#allocation14 + $0x5c0] sm:$0xff] }
 0x39a   :  { %2664 = vmatpush1.bf16.msra.mxu0 %v8388_v51  ;;  %2750 = vmatpush1.bf16.msra.mxu1 %v8391_v52  ;;  %v2906_v51 = vld [vmem:[#allocation14 + $0x300] sm:$0xff] }
 0x39b   :  { %2665 = vmatprep.subr.bf16.mxu0 %v8396_v53  ;;  %2751 = vmatprep.subr.bf16.mxu1 %v8399_v54  ;;  %v2914_v52 = vld [vmem:[#allocation14 + $0x340] sm:$0xff]  ;;  %v2907_v53 = vld [vmem:[#allocation14 + $0x308] sm:$0xff] }
 0x39c   :  { %v2915_v54 = vld [vmem:[#allocation14 + $0x348] sm:$0xff] }
 0x39e   :  { %2666 = vmatpush1.bf16.msra.mxu0 %v8394_v55  ;;  %2752 = vmatpush1.bf16.msra.mxu1 %v8397_v56  ;;  %v7370_v55 = vcombine.low %v2890_v46, %v2898_v29  ;;  %v7372_v56 = vcombine.low %v2891_v47, %v2899_v20  ;;  %v3002_v47 = vld [vmem:[#allocation14 + $0x600] sm:$0xff] }
 0x39f   :  { %2667 = vmatprep.subr.bf16.mxu0 %v8402_v57  ;;  %2753 = vmatprep.subr.bf16.mxu1 %v8405_v58  ;;  %v7387_v57 = vcombine.high %v2906_v51, %v2914_v52  ;;  %v7389_v58 = vcombine.high %v2907_v53, %v2915_v54  ;;  %v3010_v20 = vld [vmem:[#allocation14 + $0x640] sm:$0xff] }
 0x3a2   :  { %2668 = vmatpush1.bf16.msra.mxu0 %v8400_v61  ;;  %2754 = vmatpush1.bf16.msra.mxu1 %v8403_v9  ;;  %v7386_v61 = vcombine.low %v2906_v51, %v2914_v52  ;;  %v7388_v9 = vcombine.low %v2907_v53, %v2915_v54  ;;  %v3018_v53 = vld [vmem:[#allocation14 + $0x680] sm:$0xff] }
 0x3a3   :  { %5966 = vmatprep.subr.bf16.mxu0 %v7291_v14  ;;  %6052 = vmatprep.subr.bf16.mxu1 %v7293_v22  ;;  %v7403_v14 = vcombine.high %v2922_v3, %v2930_v59  ;;  %v7405_v22 = vcombine.high %v2923_v2, %v2931_v60  ;;  %v3026_v54 = vld [vmem:[#allocation14 + $0x6c0] sm:$0xff] }
 0x3a5   :  { %2670 = vmatmul.mubr.bf16.vlgmr.msra.gmra.mrb[4].mxu0 %v9121_v13  ;;  %2756 = vmatmul.mubr.bf16.vlgmr.msra.gmra.mrb[4].mxu1 %v9121_v13  ;;  %v7341_v13 = vcombine.high %v2859_v38, %v2867_v39  ;;  %v2970_v38 = vld [vmem:[#allocation14 + $0x500] sm:$0xff] }
 0x3a6   :  { %5967 = vmatpush1.bf16.msra.mxu0 %v7290_v21  ;;  %6053 = vmatpush1.bf16.msra.mxu1 %v7292_v7  ;;  %v7402_v21 = vcombine.low %v2922_v3, %v2930_v59  ;;  %v7404_v7 = vcombine.low %v2923_v2, %v2931_v60  ;;  %v2978_v39 = vld [vmem:[#allocation14 + $0x540] sm:$0xff] }
 0x3a7   :  { %5968 = vmatprep.subr.bf16.mxu0 %v7307_v26  ;;  %6054 = vmatprep.subr.bf16.mxu1 %v7309_v12  ;;  %v7419_v26 = vcombine.high %v2938_v17, %v2946_v19  ;;  %v7421_v12 = vcombine.high %v2939_v1, %v2947_v18  ;;  %v3034_v2 = vld [vmem:[#allocation14 + $0x700] sm:$0xff] }
 0x3a8   :  { %v3042_v60 = vld [vmem:[#allocation14 + $0x740] sm:$0xff] }
 0x3aa   :  { %5969 = vmatpush1.bf16.msra.mxu0 %v7306_v33  ;;  %6055 = vmatpush1.bf16.msra.mxu1 %v7308_v34  ;;  %v7418_v33 = vcombine.low %v2938_v17, %v2946_v19  ;;  %v7420_v34 = vcombine.low %v2939_v1, %v2947_v18  ;;  %v3050_v1 = vld [vmem:[#allocation14 + $0x780] sm:$0xff] }
 0x3ab   :  { %5970 = vmatprep.subr.bf16.mxu0 %v7323_v35  ;;  %6056 = vmatprep.subr.bf16.mxu1 %v7325_v36  ;;  %v7435_v35 = vcombine.high %v2954_v28, %v2962_v30  ;;  %v7437_v36 = vcombine.high %v2955_v31, %v2963_v32  ;;  %v3058_v18 = vld [vmem:[#allocation14 + $0x7c0] sm:$0xff] }
 0x3ac   :  { %v9125_v31 = vld [vmem:[#allocation14 + $0x800] sm:$0xff] }
 0x3ad   :  { %v9127_v32 = vld [vmem:[#allocation14 + $0x840] sm:$0xff] }
 0x3ae   :  { %5971 = vmatpush1.bf16.msra.mxu0 %v7322_v40  ;;  %6057 = vmatpush1.bf16.msra.mxu1 %v7324_v41  ;;  %v2971_v40 = vld [vmem:[#allocation14 + $0x508] sm:$0xff]  ;;  %v7451_v41 = vcombine.high %v2970_v38, %v2978_v39 }
 0x3af   :  { %5972 = vmatprep.subr.bf16.mxu0 %v7339_v42  ;;  %6058 = vmatprep.subr.bf16.mxu1 %v7341_v13  ;;  %v2979_v42 = vld [vmem:[#allocation14 + $0x548] sm:$0xff]  ;;  %v7450_v13 = vcombine.low %v2970_v38, %v2978_v39  ;;  %v1932_v38 = vld [vmem:[#allocation13] sm:$0xf] }
 0x3b0   :  { %v7452_v43 = vcombine.low %v2971_v40, %v2979_v42  ;;  %v7453_v63 = vcombine.high %v2971_v40, %v2979_v42  ;;  %v1937_v39 = vrot.slane %v1932_v38, %v9070_v23  ;;  %v1945_v40 = vrot.slane %v1932_v38, %v9067_v6 }
 0x3b1   :  { %v1949_v42 = vrot.slane %v1932_v38, %v9073_v24 }
 0x3b2   :  { %5973 = vmatpush1.bf16.msra.mxu0 %v7338_v11  ;;  %6059 = vmatpush1.bf16.msra.mxu1 %v7340_v27  ;;  %v2987_v11 = vld [vmem:[#allocation14 + $0x588] sm:$0xff]  ;;  %v7467_v27 = vcombine.high %v2986_v44, %v2994_v62 }
 0x3b3   :  { %5974 = vmatprep.subr.bf16.mxu0 %v7355_v45  ;;  %6060 = vmatprep.subr.bf16.mxu1 %v7357_v4  ;;  %v2995_v45 = vld [vmem:[#allocation14 + $0x5c8] sm:$0xff]  ;;  %v7466_v4 = vcombine.low %v2986_v44, %v2994_v62 }
 0x3b4   :  { %v7468_v46 = vcombine.low %v2987_v11, %v2995_v45  ;;  %v7469_v29 = vcombine.high %v2987_v11, %v2995_v45 }
 0x3b6   :  { %5975 = vmatpush1.bf16.msra.mxu0 %v7354_v48  ;;  %6061 = vmatpush1.bf16.msra.mxu1 %v7356_v0  ;;  %v3003_v48 = vld [vmem:[#allocation14 + $0x608] sm:$0xff]  ;;  %v7483_v0 = vcombine.high %v3002_v47, %v3010_v20 }
 0x3b7   :  { %5976 = vmatprep.subr.bf16.mxu0 %v7371_v49  ;;  %6062 = vmatprep.subr.bf16.mxu1 %v7373_v50  ;;  %v3011_v49 = vld [vmem:[#allocation14 + $0x648] sm:$0xff]  ;;  %v7482_v50 = vcombine.low %v3002_v47, %v3010_v20 }
 0x3b8   :  { %v7484_v51 = vcombine.low %v3003_v48, %v3011_v49  ;;  %v7485_v52 = vcombine.high %v3003_v48, %v3011_v49 }
 0x3ba   :  { %5977 = vmatpush1.bf16.msra.mxu0 %v7370_v55  ;;  %6063 = vmatpush1.bf16.msra.mxu1 %v7372_v56  ;;  %v3019_v55 = vld [vmem:[#allocation14 + $0x688] sm:$0xff]  ;;  %v7499_v56 = vcombine.high %v3018_v53, %v3026_v54 }
 0x3bb   :  { %5978 = vmatprep.subr.bf16.mxu0 %v7387_v57  ;;  %6064 = vmatprep.subr.bf16.mxu1 %v7389_v58  ;;  %v3027_v57 = vld [vmem:[#allocation14 + $0x6c8] sm:$0xff]  ;;  %v7498_v58 = vcombine.low %v3018_v53, %v3026_v54 }
 0x3bc   :  { %v7500_v3 = vcombine.low %v3019_v55, %v3027_v57  ;;  %v7501_v59 = vcombine.high %v3019_v55, %v3027_v57 }
 0x3be   :  { %5979 = vmatpush1.bf16.msra.mxu0 %v7386_v61  ;;  %6065 = vmatpush1.bf16.msra.mxu1 %v7388_v9  ;;  %v3035_v61 = vld [vmem:[#allocation14 + $0x708] sm:$0xff]  ;;  %v7515_v9 = vcombine.high %v3034_v2, %v3042_v60 }
 0x3bf   :  { %5980 = vmatprep.subr.bf16.mxu0 %v7403_v14  ;;  %6066 = vmatprep.subr.bf16.mxu1 %v7405_v22  ;;  %v3043_v14 = vld [vmem:[#allocation14 + $0x748] sm:$0xff]  ;;  %v7514_v22 = vcombine.low %v3034_v2, %v3042_v60 }
 0x3c0   :  { %v7516_v17 = vcombine.low %v3035_v61, %v3043_v14  ;;  %v7517_v19 = vcombine.high %v3035_v61, %v3043_v14 }
 0x3c2   :  { %5981 = vmatpush1.bf16.msra.mxu0 %v7402_v21  ;;  %6067 = vmatpush1.bf16.msra.mxu1 %v7404_v7  ;;  %v3051_v21 = vld [vmem:[#allocation14 + $0x788] sm:$0xff]  ;;  %v7531_v7 = vcombine.high %v3050_v1, %v3058_v18 }
 0x3c3   :  { %5982 = vmatprep.subr.bf16.mxu0 %v7419_v26  ;;  %6068 = vmatprep.subr.bf16.mxu1 %v7421_v12  ;;  %v3059_v26 = vld [vmem:[#allocation14 + $0x7c8] sm:$0xff]  ;;  %v7530_v12 = vcombine.low %v3050_v1, %v3058_v18 }
 0x3c4   :  { %v7532_v28 = vcombine.low %v3051_v21, %v3059_v26  ;;  %v7533_v30 = vcombine.high %v3051_v21, %v3059_v26 }
 0x3c6   :  { %5983 = vmatpush1.bf16.msra.mxu0 %v7418_v33  ;;  %6069 = vmatpush1.bf16.msra.mxu1 %v7420_v34  ;;  %v9129_v33 = vld [vmem:[#allocation14 + $0x808] sm:$0xff]  ;;  %v7547_v34 = vcombine.high %v9125_v31, %v9127_v32 }
 0x3c7   :  { %5984 = vmatprep.subr.bf16.mxu0 %v7435_v35  ;;  %6070 = vmatprep.subr.bf16.mxu1 %v7437_v36  ;;  %v9133_v35 = vld [vmem:[#allocation14 + $0x848] sm:$0xff]  ;;  %v7546_v36 = vcombine.low %v9125_v31, %v9127_v32 }
 0x3ca   :  { %5985 = vmatpush1.bf16.msra.mxu0 %v7434_v16  ;;  %6071 = vmatpush1.bf16.msra.mxu1 %v7436_v37  ;;  %v7548_v16 = vcombine.low %v9129_v33, %v9133_v35  ;;  %v7549_v37 = vcombine.high %v9129_v33, %v9133_v35 }
 0x3cb   :  { %5986 = vmatprep.subr.bf16.mxu0 %v7451_v41  ;;  %6072 = vmatprep.subr.bf16.mxu1 %v7453_v63  ;;  %v1941_v41 = vrot.slane %v1932_v38, %v9064_v5 }
 0x3ce   :  { %5987 = vmatpush1.bf16.msra.mxu0 %v7450_v13  ;;  %6073 = vmatpush1.bf16.msra.mxu1 %v7452_v43 }
 0x3cf   :  { %5988 = vmatprep.subr.bf16.mxu0 %v7467_v27  ;;  %6074 = vmatprep.subr.bf16.mxu1 %v7469_v29 }
 0x3d2   :  { %5989 = vmatpush1.bf16.msra.mxu0 %v7466_v4  ;;  %6075 = vmatpush1.bf16.msra.mxu1 %v7468_v46 }
 0x3d3   :  { %5990 = vmatprep.subr.bf16.mxu0 %v7483_v0  ;;  %6076 = vmatprep.subr.bf16.mxu1 %v7485_v52 }
 0x3d6   :  { %5991 = vmatpush1.bf16.msra.mxu0 %v7482_v50  ;;  %6077 = vmatpush1.bf16.msra.mxu1 %v7484_v51 }
 0x3d7   :  { %5992 = vmatprep.subr.bf16.mxu0 %v7499_v56  ;;  %6078 = vmatprep.subr.bf16.mxu1 %v7501_v59 }
 0x3da   :  { %5993 = vmatpush1.bf16.msra.mxu0 %v7498_v58  ;;  %6079 = vmatpush1.bf16.msra.mxu1 %v7500_v3 }
 0x3db   :  { %5994 = vmatprep.subr.bf16.mxu0 %v7515_v9  ;;  %6080 = vmatprep.subr.bf16.mxu1 %v7517_v19 }
 0x3de   :  { %5995 = vmatpush1.bf16.msra.mxu0 %v7514_v22  ;;  %6081 = vmatpush1.bf16.msra.mxu1 %v7516_v17 }
 0x3df   :  { %5996 = vmatprep.subr.bf16.mxu0 %v7531_v7  ;;  %6082 = vmatprep.subr.bf16.mxu1 %v7533_v30 }
 0x3e2   :  { %5997 = vmatpush1.bf16.msra.mxu0 %v7530_v12  ;;  %6083 = vmatpush1.bf16.msra.mxu1 %v7532_v28 }
 0x3e3   :  { %6009 = vmatprep.subr.bf16.mxu0 %v7547_v34  ;;  %6095 = vmatprep.subr.bf16.mxu1 %v7549_v37 }
 0x478   :  { %v2671_v13 = vpop.f32.mrb[4].mxu0  ;;  %v2757_v43 = vpop.f32.mrb[4].mxu1 }
 0x479   :  { %v7810_v63 = vadd.f32 %v2671_v13, %v1937_v39  ;;  %v7814_v44 = vadd.f32 %v2757_v43, %v1945_v40  ;;  %v2673_v62 = vpop.f32.mrb[5].mxu0  ;;  %v2759_v11 = vpop.f32.mrb[5].mxu1 }
 0x47a   :  { %v7811_v27 = vadd.f32 %v2673_v62, %v1941_v41  ;;  %v7815_v45 = vadd.f32 %v2759_v11, %v1949_v42  ;;  %v2675_v4 = vpop.f32.mrb[6].mxu0  ;;  %v2761_v46 = vpop.f32.mrb[6].mxu1  ;;  %v3082_v11 = vld [vmem:[#allocation14 + $0x880] sm:$0xff] }
 0x47b   :  { %v2774_v29 = vmul.f32 0.70710677, %v7810_v63  ;;  %v2776_v47 = vmul.f32 0.70710677, %v7814_v44  ;;  %v7812_v0 = vadd.f32 %v2675_v4, %v1937_v39  ;;  %v7816_v49 = vadd.f32 %v2761_v46, %v1945_v40  ;;  %v2677_v50 = vpop.f32.mrb[7].mxu0  ;;  %v2763_v51 = vpop.f32.mrb[7].mxu1 }
 0x47c   :  { %v2775_v20 = vmul.f32 0.70710677, %v7811_v27  ;;  %v2777_v48 = vmul.f32 0.70710677, %v7815_v45  ;;  %v7813_v52 = vadd.f32 %v2677_v50, %v1941_v41  ;;  %v7817_v53 = vadd.f32 %v2763_v51, %v1949_v42  ;;  %v3090_v46 = vld [vmem:[#allocation14 + $0x8c0] sm:$0xff] }
 0x47d   :  { %8426 = verf.f32 %v2774_v29  ;;  %v2778_v54 = vmul.f32 0.70710677, %v7812_v0  ;;  %v2780_v55 = vmul.f32 0.70710677, %v7816_v49  ;;  %v2766_v9 = vmul.f32 0.5, %v7810_v63  ;;  %v3083_v29 = vld [vmem:[#allocation14 + $0x888] sm:$0xff] }
 0x47e   :  { %8428 = verf.f32 %v2776_v47  ;;  %v2779_v56 = vmul.f32 0.70710677, %v7813_v52  ;;  %v2781_v57 = vmul.f32 0.70710677, %v7817_v53  ;;  %v2768_v14 = vmul.f32 0.5, %v7814_v44  ;;  %v3091_v47 = vld [vmem:[#allocation14 + $0x8c8] sm:$0xff] }
 0x47f   :  { %8430 = verf.f32 %v2775_v20  ;;  %v2767_v19 = vmul.f32 0.5, %v7811_v27  ;;  %v2770_v18 = vmul.f32 0.5, %v7812_v0  ;;  %v2769_v26 = vmul.f32 0.5, %v7815_v45  ;;  %v3098_v0 = vld [vmem:[#allocation14 + $0x900] sm:$0xff] }
 0x480   :  { %8432 = verf.f32 %v2777_v48  ;;  %v2772_v28 = vmul.f32 0.5, %v7816_v49  ;;  %v2771_v39 = vmul.f32 0.5, %v7813_v52  ;;  %v2773_v13 = vmul.f32 0.5, %v7817_v53  ;;  %v3106_v51 = vld [vmem:[#allocation14 + $0x940] sm:$0xff]  ;;  %v3099_v52 = vld [vmem:[#allocation14 + $0x908] sm:$0xff] }
 0x481   :  { %8434 = verf.f32 %v2778_v54  ;;  %v7563_v49 = vcombine.high %v3082_v11, %v3090_v46  ;;  %v7565_v50 = vcombine.high %v3083_v29, %v3091_v47  ;;  %v3107_v53 = vld [vmem:[#allocation14 + $0x948] sm:$0xff]  ;;  %v7562_v54 = vcombine.low %v3082_v11, %v3090_v46 }
 0x482   :  { %8436 = verf.f32 %v2780_v55  ;;  %v7564_v55 = vcombine.low %v3083_v29, %v3091_v47  ;;  %v7578_v31 = vcombine.low %v3098_v0, %v3106_v51  ;;  %v7580_v32 = vcombine.low %v3099_v52, %v3107_v53  ;;  %v3194_v29 = vld [vmem:[#allocation14 + $0xc00] sm:$0xff] }
 0x483   :  { %8438 = verf.f32 %v2779_v56  ;;  %v7579_v56 = vcombine.high %v3098_v0, %v3106_v51  ;;  %v3202_v47 = vld [vmem:[#allocation14 + $0xc40] sm:$0xff]  ;;  %v3195_v0 = vld [vmem:[#allocation14 + $0xc08] sm:$0xff] }
 0x484   :  { %8440 = verf.f32 %v2781_v57  ;;  %v7581_v57 = vcombine.high %v3099_v52, %v3107_v53  ;;  %v7675_v52 = vcombine.high %v3194_v29, %v3202_v47 }
 0x487   :  { %v8427_v58 = vpop.eup %8426 }
 0x488   :  { %v8429_v3 = vpop.eup %8428  ;;  %v2790_v60 = vadd.f32 1.0, %v8427_v58  ;;  %v3114_v58 = vld [vmem:[#allocation14 + $0x980] sm:$0xff] }
 0x489   :  { %v8431_v59 = vpop.eup %8430  ;;  %v2792_v22 = vadd.f32 1.0, %v8429_v3  ;;  %v3122_v3 = vld [vmem:[#allocation14 + $0x9c0] sm:$0xff] }
 0x48a   :  { %v8433_v2 = vpop.eup %8432  ;;  %v2791_v1 = vadd.f32 1.0, %v8431_v59  ;;  %v2798_v37 = vmul.f32 %v2790_v60, %v2766_v9  ;;  %v3115_v59 = vld [vmem:[#allocation14 + $0x988] sm:$0xff]  ;;  %v7595_v33 = vcombine.high %v3114_v58, %v3122_v3  ;;  %v7594_v9 = vcombine.low %v3114_v58, %v3122_v3 }
 0x48b   :  { %v8435_v61 = vpop.eup %8434  ;;  %v2793_v12 = vadd.f32 1.0, %v8433_v2  ;;  %v2800_v41 = vmul.f32 %v2792_v22, %v2768_v14  ;;  %v3123_v2 = vld [vmem:[#allocation14 + $0x9c8] sm:$0xff]  ;;  %v7674_v58 = vcombine.low %v3194_v29, %v3202_v47 }
 0x48c   :  { %v8437_v17 = vpop.eup %8436  ;;  %v2794_v21 = vadd.f32 1.0, %v8435_v61  ;;  %v2799_v63 = vmul.f32 %v2791_v1, %v2767_v19  ;;  %v7597_v35 = vcombine.high %v3115_v59, %v3123_v2  ;;  %v3131_v60 = vld [vmem:[#allocation14 + $0xa08] sm:$0xff]  ;;  %v7596_v14 = vcombine.low %v3115_v59, %v3123_v2  ;;  %v3146_v19 = vld [vmem:[#allocation14 + $0xa80] sm:$0xff] }
 0x48d   :  { %v8439_v7 = vpop.eup %8438  ;;  %v2796_v30 = vadd.f32 1.0, %v8437_v17  ;;  %v2801_v27 = vmul.f32 %v2793_v12, %v2769_v26  ;;  %v3139_v61 = vld [vmem:[#allocation14 + $0xa48] sm:$0xff]  ;;  %v3154_v1 = vld [vmem:[#allocation14 + $0xac0] sm:$0xff] }
 0x48e   :  { %v8441_v34 = vpop.eup %8440  ;;  %v2802_v38 = vmul.f32 %v2794_v21, %v2770_v18  ;;  %v2795_v40 = vadd.f32 1.0, %v8439_v7  ;;  %v7613_v17 = vcombine.high %v3131_v60, %v3139_v61  ;;  %v3147_v18 = vld [vmem:[#allocation14 + $0xa88] sm:$0xff]  ;;  %v7612_v26 = vcombine.low %v3131_v60, %v3139_v61 }
 0x48f   :  { %v2804_v42 = vmul.f32 %v2796_v30, %v2772_v28  ;;  %v2797_v43 = vadd.f32 1.0, %v8441_v34  ;;  %v3155_v21 = vld [vmem:[#allocation14 + $0xac8] sm:$0xff]  ;;  %v7627_v12 = vcombine.high %v3146_v19, %v3154_v1  ;;  %v3162_v30 = vld [vmem:[#allocation14 + $0xb00] sm:$0xff] }
 0x490   :  { %v9145_v44 = vpack.c.bf16 %v2802_v38, %v2798_v37  ;;  %v2803_v62 = vmul.f32 %v2795_v40, %v2771_v39  ;;  %v7629_v28 = vcombine.high %v3147_v18, %v3155_v21  ;;  %v3170_v34 = vld [vmem:[#allocation14 + $0xb40] sm:$0xff]  ;;  %v3163_v37 = vld [vmem:[#allocation14 + $0xb08] sm:$0xff]  ;;  %v7626_v39 = vcombine.low %v3146_v19, %v3154_v1 }
 0x491   :  { %v9147_v4 = vpack.c.bf16 %v2804_v42, %v2800_v41  ;;  %v2805_v45 = vmul.f32 %v2797_v43, %v2773_v13  ;;  %v3171_v38 = vld [vmem:[#allocation14 + $0xb48] sm:$0xff]  ;;  %v7628_v40 = vcombine.low %v3147_v18, %v3155_v21  ;;  %v7643_v41 = vcombine.high %v3162_v30, %v3170_v34  ;;  %v3178_v13 = vld [vmem:[#allocation14 + $0xb80] sm:$0xff] }
 0x492   :  { %v9149_v20 = vpack.c.bf16 %v2803_v62, %v2799_v63  ;;  %v7645_v42 = vcombine.high %v3163_v37, %v3171_v38  ;;  %v3186_v43 = vld [vmem:[#allocation14 + $0xbc0] sm:$0xff]  ;;  %v3179_v63 = vld [vmem:[#allocation14 + $0xb88] sm:$0xff]  ;;  %v7642_v11 = vcombine.low %v3162_v30, %v3170_v34 }
 0x493   :  { %v9151_v48 = vpack.c.bf16 %v2805_v45, %v2801_v27  ;;  %v3187_v62 = vld [vmem:[#allocation14 + $0xbc8] sm:$0xff]  ;;  %v7644_v27 = vcombine.low %v3163_v37, %v3171_v38  ;;  %v7659_v45 = vcombine.high %v3178_v13, %v3186_v43 }
 0x494   :  { %5998 = vmatprep.mubr.bf16.mxu0 %v9149_v20  ;;  %6084 = vmatprep.mubr.bf16.mxu1 %v9149_v20  ;;  %v7661_v46 = vcombine.high %v3179_v63, %v3187_v62  ;;  %v7660_v51 = vcombine.low %v3179_v63, %v3187_v62 }
 0x495   :  { %5999 = vmatmul.mubr.bf16.vlgmr.msra.gmra.mrb[8].mxu0 %v9145_v44  ;;  %6085 = vmatmul.mubr.bf16.vlgmr.msra.gmra.mrb[8].mxu1 %v9145_v44 }
 0x496   :  { %6010 = vmatpush1.bf16.msra.mxu0 %v7546_v36  ;;  %6096 = vmatpush1.bf16.msra.mxu1 %v7548_v16  ;;  %v3130_v36 = vld [vmem:[#allocation14 + $0xa00] sm:$0xff] }
 0x497   :  { %6041 = vmatprep.mubr.bf16.mxu0 %v9151_v48  ;;  %6127 = vmatprep.mubr.bf16.mxu1 %v9151_v48  ;;  %v3138_v16 = vld [vmem:[#allocation14 + $0xa40] sm:$0xff] }
 0x498   :  { %6011 = vmatprep.subr.bf16.mxu0 %v7563_v49  ;;  %6097 = vmatprep.subr.bf16.mxu1 %v7565_v50  ;;  %v7611_v22 = vcombine.high %v3130_v36, %v3138_v16  ;;  %v7610_v7 = vcombine.low %v3130_v36, %v3138_v16  ;;  %v3203_v49 = vld [vmem:[#allocation14 + $0xc48] sm:$0xff]  ;;  %v7658_v50 = vcombine.low %v3178_v13, %v3186_v43 }
 0x499   :  { %v7677_v53 = vcombine.high %v3195_v0, %v3203_v49  ;;  %v7676_v3 = vcombine.low %v3195_v0, %v3203_v49 }
 0x49a   :  { %6012 = vmatpush1.bf16.msra.mxu0 %v7562_v54  ;;  %6098 = vmatpush1.bf16.msra.mxu1 %v7564_v55  ;;  %v3210_v54 = vld [vmem:[#allocation14 + $0xc80] sm:$0xff] }
 0x49b   :  { %6013 = vmatprep.subr.bf16.mxu0 %v7579_v56  ;;  %6099 = vmatprep.subr.bf16.mxu1 %v7581_v57  ;;  %v3218_v55 = vld [vmem:[#allocation14 + $0xcc0] sm:$0xff]  ;;  %v3211_v56 = vld [vmem:[#allocation14 + $0xc88] sm:$0xff] }
 0x49c   :  { %v3219_v57 = vld [vmem:[#allocation14 + $0xcc8] sm:$0xff]  ;;  %v7691_v59 = vcombine.high %v3210_v54, %v3218_v55  ;;  %v7690_v36 = vcombine.low %v3210_v54, %v3218_v55 }
 0x49d   :  { %v7693_v2 = vcombine.high %v3211_v56, %v3219_v57  ;;  %v7692_v16 = vcombine.low %v3211_v56, %v3219_v57 }
 0x49e   :  { %6014 = vmatpush1.bf16.msra.mxu0 %v7578_v31  ;;  %6100 = vmatpush1.bf16.msra.mxu1 %v7580_v32  ;;  %v3226_v31 = vld [vmem:[#allocation14 + $0xd00] sm:$0xff] }
 0x49f   :  { %6015 = vmatprep.subr.bf16.mxu0 %v7595_v33  ;;  %6101 = vmatprep.subr.bf16.mxu1 %v7597_v35  ;;  %v3234_v32 = vld [vmem:[#allocation14 + $0xd40] sm:$0xff]  ;;  %v3227_v33 = vld [vmem:[#allocation14 + $0xd08] sm:$0xff] }
 0x4a0   :  { %v3235_v35 = vld [vmem:[#allocation14 + $0xd48] sm:$0xff]  ;;  %v7707_v60 = vcombine.high %v3226_v31, %v3234_v32  ;;  %v7706_v19 = vcombine.low %v3226_v31, %v3234_v32 }
 0x4a1   :  { %v7709_v61 = vcombine.high %v3227_v33, %v3235_v35  ;;  %v7708_v1 = vcombine.low %v3227_v33, %v3235_v35 }
 0x4a2   :  { %6016 = vmatpush1.bf16.msra.mxu0 %v7594_v9  ;;  %6102 = vmatpush1.bf16.msra.mxu1 %v7596_v14  ;;  %v3242_v9 = vld [vmem:[#allocation14 + $0xd80] sm:$0xff] }
 0x4a3   :  { %6017 = vmatprep.subr.bf16.mxu0 %v7611_v22  ;;  %6103 = vmatprep.subr.bf16.mxu1 %v7613_v17  ;;  %v3250_v14 = vld [vmem:[#allocation14 + $0xdc0] sm:$0xff]  ;;  %v3243_v22 = vld [vmem:[#allocation14 + $0xd88] sm:$0xff] }
 0x4a4   :  { %v3251_v17 = vld [vmem:[#allocation14 + $0xdc8] sm:$0xff]  ;;  %v7723_v18 = vcombine.high %v3242_v9, %v3250_v14  ;;  %v7722_v30 = vcombine.low %v3242_v9, %v3250_v14 }
 0x4a5   :  { %v7725_v21 = vcombine.high %v3243_v22, %v3251_v17  ;;  %v7724_v34 = vcombine.low %v3243_v22, %v3251_v17 }
 0x4a6   :  { %6018 = vmatpush1.bf16.msra.mxu0 %v7610_v7  ;;  %6104 = vmatpush1.bf16.msra.mxu1 %v7612_v26  ;;  %v3258_v7 = vld [vmem:[#allocation14 + $0xe00] sm:$0xff] }
 0x4a7   :  { %6019 = vmatprep.subr.bf16.mxu0 %v7627_v12  ;;  %6105 = vmatprep.subr.bf16.mxu1 %v7629_v28  ;;  %v3266_v26 = vld [vmem:[#allocation14 + $0xe40] sm:$0xff]  ;;  %v3259_v12 = vld [vmem:[#allocation14 + $0xe08] sm:$0xff] }
 0x4a8   :  { %v3267_v28 = vld [vmem:[#allocation14 + $0xe48] sm:$0xff]  ;;  %v7739_v37 = vcombine.high %v3258_v7, %v3266_v26  ;;  %v7738_v13 = vcombine.low %v3258_v7, %v3266_v26 }
 0x4a9   :  { %v7741_v38 = vcombine.high %v3259_v12, %v3267_v28  ;;  %v7740_v43 = vcombine.low %v3259_v12, %v3267_v28 }
 0x4aa   :  { %6020 = vmatpush1.bf16.msra.mxu0 %v7626_v39  ;;  %6106 = vmatpush1.bf16.msra.mxu1 %v7628_v40  ;;  %v3274_v39 = vld [vmem:[#allocation14 + $0xe80] sm:$0xff] }
 0x4ab   :  { %6021 = vmatprep.subr.bf16.mxu0 %v7643_v41  ;;  %6107 = vmatprep.subr.bf16.mxu1 %v7645_v42  ;;  %v3282_v40 = vld [vmem:[#allocation14 + $0xec0] sm:$0xff]  ;;  %v3275_v41 = vld [vmem:[#allocation14 + $0xe88] sm:$0xff] }
 0x4ac   :  { %v3283_v42 = vld [vmem:[#allocation14 + $0xec8] sm:$0xff]  ;;  %v7755_v63 = vcombine.high %v3274_v39, %v3282_v40  ;;  %v7754_v29 = vcombine.low %v3274_v39, %v3282_v40 }
 0x4ad   :  { %v7757_v62 = vcombine.high %v3275_v41, %v3283_v42  ;;  %v7756_v47 = vcombine.low %v3275_v41, %v3283_v42 }
 0x4ae   :  { %6022 = vmatpush1.bf16.msra.mxu0 %v7642_v11  ;;  %6108 = vmatpush1.bf16.msra.mxu1 %v7644_v27  ;;  %v3290_v11 = vld [vmem:[#allocation14 + $0xf00] sm:$0xff] }
 0x4af   :  { %6023 = vmatprep.subr.bf16.mxu0 %v7659_v45  ;;  %6109 = vmatprep.subr.bf16.mxu1 %v7661_v46  ;;  %v3298_v27 = vld [vmem:[#allocation14 + $0xf40] sm:$0xff]  ;;  %v3291_v45 = vld [vmem:[#allocation14 + $0xf08] sm:$0xff] }
 0x4b0   :  { %v3299_v46 = vld [vmem:[#allocation14 + $0xf48] sm:$0xff]  ;;  %v7771_v0 = vcombine.high %v3290_v11, %v3298_v27  ;;  %v7770_v54 = vcombine.low %v3290_v11, %v3298_v27 }
 0x4b1   :  { %v7773_v49 = vcombine.high %v3291_v45, %v3299_v46  ;;  %v7772_v55 = vcombine.low %v3291_v45, %v3299_v46 }
 0x4b2   :  { %6024 = vmatpush1.bf16.msra.mxu0 %v7658_v50  ;;  %6110 = vmatpush1.bf16.msra.mxu1 %v7660_v51  ;;  %v3306_v50 = vld [vmem:[#allocation14 + $0xf80] sm:$0xff] }
 0x4b3   :  { %6025 = vmatprep.subr.bf16.mxu0 %v7675_v52  ;;  %6111 = vmatprep.subr.bf16.mxu1 %v7677_v53  ;;  %v3314_v51 = vld [vmem:[#allocation14 + $0xfc0] sm:$0xff]  ;;  %v3307_v52 = vld [vmem:[#allocation14 + $0xf88] sm:$0xff] }
 0x4b4   :  { %v3315_v53 = vld [vmem:[#allocation14 + $0xfc8] sm:$0xff]  ;;  %v7787_v56 = vcombine.high %v3306_v50, %v3314_v51  ;;  %v7786_v31 = vcombine.low %v3306_v50, %v3314_v51 }
 0x4b5   :  { %v7789_v57 = vcombine.high %v3307_v52, %v3315_v53  ;;  %v7788_v32 = vcombine.low %v3307_v52, %v3315_v53 }
 0x4b6   :  { %6026 = vmatpush1.bf16.msra.mxu0 %v7674_v58  ;;  %6112 = vmatpush1.bf16.msra.mxu1 %v7676_v3  ;;  %v2812_v58 = vld [vmem:[#allocation14 + $0x10] sm:$0xff] }
 0x4b7   :  { %6027 = vmatprep.subr.bf16.mxu0 %v7691_v59  ;;  %6113 = vmatprep.subr.bf16.mxu1 %v7693_v2  ;;  %v2820_v3 = vld [vmem:[#allocation14 + $0x50] sm:$0xff]  ;;  %v2813_v59 = vld [vmem:[#allocation14 + $0x18] sm:$0xff] }
 0x4b8   :  { %v2821_v2 = vld [vmem:[#allocation14 + $0x58] sm:$0xff]  ;;  %v7295_v33 = vcombine.high %v2812_v58, %v2820_v3  ;;  %v7294_v9 = vcombine.low %v2812_v58, %v2820_v3 }
 0x4b9   :  { %v7297_v35 = vcombine.high %v2813_v59, %v2821_v2  ;;  %v7296_v14 = vcombine.low %v2813_v59, %v2821_v2 }
 0x4ba   :  { %6028 = vmatpush1.bf16.msra.mxu0 %v7690_v36  ;;  %6114 = vmatpush1.bf16.msra.mxu1 %v7692_v16  ;;  %v2828_v36 = vld [vmem:[#allocation14 + $0x90] sm:$0xff] }
 0x4bb   :  { %6029 = vmatprep.subr.bf16.mxu0 %v7707_v60  ;;  %6115 = vmatprep.subr.bf16.mxu1 %v7709_v61  ;;  %v2836_v16 = vld [vmem:[#allocation14 + $0xd0] sm:$0xff]  ;;  %v2829_v60 = vld [vmem:[#allocation14 + $0x98] sm:$0xff] }
 0x4bc   :  { %v2837_v61 = vld [vmem:[#allocation14 + $0xd8] sm:$0xff]  ;;  %v7311_v22 = vcombine.high %v2828_v36, %v2836_v16  ;;  %v7310_v7 = vcombine.low %v2828_v36, %v2836_v16 }
 0x4bd   :  { %v7313_v17 = vcombine.high %v2829_v60, %v2837_v61  ;;  %v7312_v26 = vcombine.low %v2829_v60, %v2837_v61 }
 0x4be   :  { %6030 = vmatpush1.bf16.msra.mxu0 %v7706_v19  ;;  %6116 = vmatpush1.bf16.msra.mxu1 %v7708_v1  ;;  %v2844_v19 = vld [vmem:[#allocation14 + $0x110] sm:$0xff] }
 0x4bf   :  { %6031 = vmatprep.subr.bf16.mxu0 %v7723_v18  ;;  %6117 = vmatprep.subr.bf16.mxu1 %v7725_v21  ;;  %v2852_v1 = vld [vmem:[#allocation14 + $0x150] sm:$0xff]  ;;  %v2845_v18 = vld [vmem:[#allocation14 + $0x118] sm:$0xff] }
 0x4c0   :  { %v2853_v21 = vld [vmem:[#allocation14 + $0x158] sm:$0xff]  ;;  %v7327_v12 = vcombine.high %v2844_v19, %v2852_v1  ;;  %v7326_v39 = vcombine.low %v2844_v19, %v2852_v1 }
 0x4c1   :  { %v7329_v28 = vcombine.high %v2845_v18, %v2853_v21  ;;  %v7328_v40 = vcombine.low %v2845_v18, %v2853_v21 }
 0x4c2   :  { %6032 = vmatpush1.bf16.msra.mxu0 %v7722_v30  ;;  %6118 = vmatpush1.bf16.msra.mxu1 %v7724_v34  ;;  %v2860_v30 = vld [vmem:[#allocation14 + $0x190] sm:$0xff] }
 0x4c3   :  { %6033 = vmatprep.subr.bf16.mxu0 %v7739_v37  ;;  %6119 = vmatprep.subr.bf16.mxu1 %v7741_v38  ;;  %v2868_v34 = vld [vmem:[#allocation14 + $0x1d0] sm:$0xff]  ;;  %v2861_v37 = vld [vmem:[#allocation14 + $0x198] sm:$0xff] }
 0x4c4   :  { %v2869_v38 = vld [vmem:[#allocation14 + $0x1d8] sm:$0xff]  ;;  %v7343_v41 = vcombine.high %v2860_v30, %v2868_v34  ;;  %v7342_v11 = vcombine.low %v2860_v30, %v2868_v34 }
 0x4c5   :  { %v7345_v42 = vcombine.high %v2861_v37, %v2869_v38  ;;  %v7344_v27 = vcombine.low %v2861_v37, %v2869_v38 }
 0x4c6   :  { %6034 = vmatpush1.bf16.msra.mxu0 %v7738_v13  ;;  %6120 = vmatpush1.bf16.msra.mxu1 %v7740_v43  ;;  %v2876_v13 = vld [vmem:[#allocation14 + $0x210] sm:$0xff] }
 0x4c7   :  { %6035 = vmatprep.subr.bf16.mxu0 %v7755_v63  ;;  %6121 = vmatprep.subr.bf16.mxu1 %v7757_v62  ;;  %v2884_v43 = vld [vmem:[#allocation14 + $0x250] sm:$0xff]  ;;  %v2877_v63 = vld [vmem:[#allocation14 + $0x218] sm:$0xff] }
 0x4c8   :  { %v2885_v62 = vld [vmem:[#allocation14 + $0x258] sm:$0xff]  ;;  %v7359_v45 = vcombine.high %v2876_v13, %v2884_v43  ;;  %v7358_v50 = vcombine.low %v2876_v13, %v2884_v43 }
 0x4c9   :  { %v7361_v46 = vcombine.high %v2877_v63, %v2885_v62  ;;  %v7360_v51 = vcombine.low %v2877_v63, %v2885_v62 }
 0x4ca   :  { %6036 = vmatpush1.bf16.msra.mxu0 %v7754_v29  ;;  %6122 = vmatpush1.bf16.msra.mxu1 %v7756_v47  ;;  %v2892_v29 = vld [vmem:[#allocation14 + $0x290] sm:$0xff] }
 0x4cb   :  { %6037 = vmatprep.subr.bf16.mxu0 %v7771_v0  ;;  %6123 = vmatprep.subr.bf16.mxu1 %v7773_v49  ;;  %v2900_v47 = vld [vmem:[#allocation14 + $0x2d0] sm:$0xff]  ;;  %v2893_v0 = vld [vmem:[#allocation14 + $0x298] sm:$0xff] }
 0x4cc   :  { %v2901_v49 = vld [vmem:[#allocation14 + $0x2d8] sm:$0xff]  ;;  %v7375_v52 = vcombine.high %v2892_v29, %v2900_v47  ;;  %v7374_v58 = vcombine.low %v2892_v29, %v2900_v47 }
 0x4cd   :  { %v7377_v53 = vcombine.high %v2893_v0, %v2901_v49  ;;  %v7376_v3 = vcombine.low %v2893_v0, %v2901_v49 }
 0x4ce   :  { %6038 = vmatpush1.bf16.msra.mxu0 %v7770_v54  ;;  %6124 = vmatpush1.bf16.msra.mxu1 %v7772_v55  ;;  %v2908_v54 = vld [vmem:[#allocation14 + $0x310] sm:$0xff] }
 0x4cf   :  { %6039 = vmatprep.subr.bf16.mxu0 %v7787_v56  ;;  %6125 = vmatprep.subr.bf16.mxu1 %v7789_v57  ;;  %v2916_v55 = vld [vmem:[#allocation14 + $0x350] sm:$0xff]  ;;  %v2909_v56 = vld [vmem:[#allocation14 + $0x318] sm:$0xff] }
 0x4d0   :  { %v2917_v57 = vld [vmem:[#allocation14 + $0x358] sm:$0xff]  ;;  %v7391_v59 = vcombine.high %v2908_v54, %v2916_v55  ;;  %v7390_v36 = vcombine.low %v2908_v54, %v2916_v55 }
 0x4d1   :  { %v7393_v2 = vcombine.high %v2909_v56, %v2917_v57  ;;  %v7392_v16 = vcombine.low %v2909_v56, %v2917_v57 }
 0x4d2   :  { %6040 = vmatpush1.bf16.msra.mxu0 %v7786_v31  ;;  %6126 = vmatpush1.bf16.msra.mxu1 %v7788_v32  ;;  %v2924_v31 = vld [vmem:[#allocation14 + $0x390] sm:$0xff] }
 0x4d3   :  { %6138 = vmatprep.subr.bf16.mxu0 %v7295_v33  ;;  %6224 = vmatprep.subr.bf16.mxu1 %v7297_v35  ;;  %v2932_v32 = vld [vmem:[#allocation14 + $0x3d0] sm:$0xff]  ;;  %v2925_v33 = vld [vmem:[#allocation14 + $0x398] sm:$0xff] }
 0x4d4   :  { %v2933_v35 = vld [vmem:[#allocation14 + $0x3d8] sm:$0xff]  ;;  %v7407_v60 = vcombine.high %v2924_v31, %v2932_v32  ;;  %v7406_v19 = vcombine.low %v2924_v31, %v2932_v32 }
 0x4d5   :  { %6042 = vmatmul.mubr.bf16.vlgmr.msra.gmra.mrb[8].mxu0 %v9147_v4  ;;  %6128 = vmatmul.mubr.bf16.vlgmr.msra.gmra.mrb[8].mxu1 %v9147_v4  ;;  %v7409_v61 = vcombine.high %v2925_v33, %v2933_v35  ;;  %v7408_v1 = vcombine.low %v2925_v33, %v2933_v35 }
 0x4d6   :  { %6139 = vmatpush1.bf16.msra.mxu0 %v7294_v9  ;;  %6170 = vmatprep.mubr.bf16.mxu0 %v9149_v20  ;;  %v2940_v9 = vld [vmem:[#allocation14 + $0x410] sm:$0xff] }
 0x4d7   :  { %6225 = vmatpush1.bf16.msra.mxu1 %v7296_v14  ;;  %6256 = vmatprep.mubr.bf16.mxu1 %v9149_v20  ;;  %v2948_v14 = vld [vmem:[#allocation14 + $0x450] sm:$0xff] }
 0x4d8   :  { %6140 = vmatprep.subr.bf16.mxu0 %v7311_v22  ;;  %6226 = vmatprep.subr.bf16.mxu1 %v7313_v17  ;;  %v2941_v22 = vld [vmem:[#allocation14 + $0x418] sm:$0xff]  ;;  %v7423_v18 = vcombine.high %v2940_v9, %v2948_v14  ;;  %v7422_v30 = vcombine.low %v2940_v9, %v2948_v14 }
 0x4d9   :  { %v2949_v17 = vld [vmem:[#allocation14 + $0x458] sm:$0xff] }
 0x4da   :  { %6141 = vmatpush1.bf16.msra.mxu0 %v7310_v7  ;;  %v7425_v21 = vcombine.high %v2941_v22, %v2949_v17  ;;  %v2956_v7 = vld [vmem:[#allocation14 + $0x490] sm:$0xff]  ;;  %v7424_v34 = vcombine.low %v2941_v22, %v2949_v17 }
 0x4db   :  { %6227 = vmatpush1.bf16.msra.mxu1 %v7312_v26  ;;  %6142 = vmatprep.subr.bf16.mxu0 %v7327_v12  ;;  %v2964_v26 = vld [vmem:[#allocation14 + $0x4d0] sm:$0xff]  ;;  %v2957_v12 = vld [vmem:[#allocation14 + $0x498] sm:$0xff] }
 0x4dc   :  { %6228 = vmatprep.subr.bf16.mxu1 %v7329_v28  ;;  %v2965_v28 = vld [vmem:[#allocation14 + $0x4d8] sm:$0xff]  ;;  %v7439_v37 = vcombine.high %v2956_v7, %v2964_v26  ;;  %v7438_v13 = vcombine.low %v2956_v7, %v2964_v26 }
 0x4dd   :  { %v7441_v38 = vcombine.high %v2957_v12, %v2965_v28  ;;  %v7440_v43 = vcombine.low %v2957_v12, %v2965_v28 }
 0x4de   :  { %6143 = vmatpush1.bf16.msra.mxu0 %v7326_v39  ;;  %v2972_v39 = vld [vmem:[#allocation14 + $0x510] sm:$0xff] }
 0x4df   :  { %6229 = vmatpush1.bf16.msra.mxu1 %v7328_v40  ;;  %6144 = vmatprep.subr.bf16.mxu0 %v7343_v41  ;;  %v2980_v40 = vld [vmem:[#allocation14 + $0x550] sm:$0xff]  ;;  %v2973_v41 = vld [vmem:[#allocation14 + $0x518] sm:$0xff] }
 0x4e0   :  { %6230 = vmatprep.subr.bf16.mxu1 %v7345_v42  ;;  %v2981_v42 = vld [vmem:[#allocation14 + $0x558] sm:$0xff]  ;;  %v7455_v63 = vcombine.high %v2972_v39, %v2980_v40  ;;  %v7454_v29 = vcombine.low %v2972_v39, %v2980_v40 }
 0x4e1   :  { %v7457_v62 = vcombine.high %v2973_v41, %v2981_v42  ;;  %v7456_v47 = vcombine.low %v2973_v41, %v2981_v42 }
 0x4e2   :  { %6145 = vmatpush1.bf16.msra.mxu0 %v7342_v11  ;;  %v2988_v11 = vld [vmem:[#allocation14 + $0x590] sm:$0xff] }
 0x4e3   :  { %6231 = vmatpush1.bf16.msra.mxu1 %v7344_v27  ;;  %6146 = vmatprep.subr.bf16.mxu0 %v7359_v45  ;;  %v2996_v27 = vld [vmem:[#allocation14 + $0x5d0] sm:$0xff]  ;;  %v2989_v45 = vld [vmem:[#allocation14 + $0x598] sm:$0xff] }
 0x4e4   :  { %6232 = vmatprep.subr.bf16.mxu1 %v7361_v46  ;;  %v2997_v46 = vld [vmem:[#allocation14 + $0x5d8] sm:$0xff]  ;;  %v7471_v0 = vcombine.high %v2988_v11, %v2996_v27  ;;  %v7470_v54 = vcombine.low %v2988_v11, %v2996_v27 }
 0x4e5   :  { %v7473_v49 = vcombine.high %v2989_v45, %v2997_v46  ;;  %v7472_v55 = vcombine.low %v2989_v45, %v2997_v46  ;;  %v3093_v11 = vld [vmem:[#allocation14 + $0x8d8] sm:$0xff]  ;;  %v3100_v46 = vld [vmem:[#allocation14 + $0x910] sm:$0xff] }
 0x4e6   :  { %6147 = vmatpush1.bf16.msra.mxu0 %v7358_v50  ;;  %v3004_v50 = vld [vmem:[#allocation14 + $0x610] sm:$0xff] }
 0x4e7   :  { %6233 = vmatpush1.bf16.msra.mxu1 %v7360_v51  ;;  %6148 = vmatprep.subr.bf16.mxu0 %v7375_v52  ;;  %v3012_v51 = vld [vmem:[#allocation14 + $0x650] sm:$0xff]  ;;  %v3005_v52 = vld [vmem:[#allocation14 + $0x618] sm:$0xff] }
 0x4e8   :  { %6234 = vmatprep.subr.bf16.mxu1 %v7377_v53  ;;  %v3013_v53 = vld [vmem:[#allocation14 + $0x658] sm:$0xff]  ;;  %v7487_v56 = vcombine.high %v3004_v50, %v3012_v51  ;;  %v7486_v31 = vcombine.low %v3004_v50, %v3012_v51 }
 0x4e9   :  { %v7489_v57 = vcombine.high %v3005_v52, %v3013_v53  ;;  %v7488_v32 = vcombine.low %v3005_v52, %v3013_v53 }
 0x4ea   :  { %6149 = vmatpush1.bf16.msra.mxu0 %v7374_v58  ;;  %v3020_v58 = vld [vmem:[#allocation14 + $0x690] sm:$0xff] }
 0x4eb   :  { %6235 = vmatpush1.bf16.msra.mxu1 %v7376_v3  ;;  %6150 = vmatprep.subr.bf16.mxu0 %v7391_v59  ;;  %v3028_v3 = vld [vmem:[#allocation14 + $0x6d0] sm:$0xff]  ;;  %v3021_v59 = vld [vmem:[#allocation14 + $0x698] sm:$0xff] }
 0x4ec   :  { %6236 = vmatprep.subr.bf16.mxu1 %v7393_v2  ;;  %v3029_v2 = vld [vmem:[#allocation14 + $0x6d8] sm:$0xff]  ;;  %v7503_v33 = vcombine.high %v3020_v58, %v3028_v3  ;;  %v7502_v9 = vcombine.low %v3020_v58, %v3028_v3 }
 0x4ed   :  { %v7505_v35 = vcombine.high %v3021_v59, %v3029_v2  ;;  %v7504_v14 = vcombine.low %v3021_v59, %v3029_v2 }
 0x4ee   :  { %6151 = vmatpush1.bf16.msra.mxu0 %v7390_v36  ;;  %v3036_v36 = vld [vmem:[#allocation14 + $0x710] sm:$0xff] }
 0x4ef   :  { %6237 = vmatpush1.bf16.msra.mxu1 %v7392_v16  ;;  %6152 = vmatprep.subr.bf16.mxu0 %v7407_v60  ;;  %v3044_v16 = vld [vmem:[#allocation14 + $0x750] sm:$0xff]  ;;  %v3037_v60 = vld [vmem:[#allocation14 + $0x718] sm:$0xff] }
 0x4f0   :  { %6238 = vmatprep.subr.bf16.mxu1 %v7409_v61  ;;  %v3045_v61 = vld [vmem:[#allocation14 + $0x758] sm:$0xff]  ;;  %v7519_v22 = vcombine.high %v3036_v36, %v3044_v16  ;;  %v7518_v7 = vcombine.low %v3036_v36, %v3044_v16 }
 0x4f1   :  { %v7521_v17 = vcombine.high %v3037_v60, %v3045_v61  ;;  %v7520_v26 = vcombine.low %v3037_v60, %v3045_v61 }
 0x4f2   :  { %6153 = vmatpush1.bf16.msra.mxu0 %v7406_v19  ;;  %v3052_v19 = vld [vmem:[#allocation14 + $0x790] sm:$0xff] }
 0x4f3   :  { %6239 = vmatpush1.bf16.msra.mxu1 %v7408_v1  ;;  %6154 = vmatprep.subr.bf16.mxu0 %v7423_v18  ;;  %v3060_v1 = vld [vmem:[#allocation14 + $0x7d0] sm:$0xff]  ;;  %v3053_v18 = vld [vmem:[#allocation14 + $0x798] sm:$0xff] }
 0x4f4   :  { %6240 = vmatprep.subr.bf16.mxu1 %v7425_v21  ;;  %v3061_v21 = vld [vmem:[#allocation14 + $0x7d8] sm:$0xff]  ;;  %v7535_v12 = vcombine.high %v3052_v19, %v3060_v1  ;;  %v7534_v39 = vcombine.low %v3052_v19, %v3060_v1 }
 0x4f5   :  { %v7537_v28 = vcombine.high %v3053_v18, %v3061_v21  ;;  %v7536_v40 = vcombine.low %v3053_v18, %v3061_v21 }
 0x4f6   :  { %6155 = vmatpush1.bf16.msra.mxu0 %v7422_v30  ;;  %v3068_v30 = vld [vmem:[#allocation14 + $0x810] sm:$0xff] }
 0x4f7   :  { %6241 = vmatpush1.bf16.msra.mxu1 %v7424_v34  ;;  %6156 = vmatprep.subr.bf16.mxu0 %v7439_v37  ;;  %v3076_v34 = vld [vmem:[#allocation14 + $0x850] sm:$0xff]  ;;  %v3069_v37 = vld [vmem:[#allocation14 + $0x818] sm:$0xff] }
 0x4f8   :  { %6242 = vmatprep.subr.bf16.mxu1 %v7441_v38  ;;  %v3077_v38 = vld [vmem:[#allocation14 + $0x858] sm:$0xff]  ;;  %v7551_v41 = vcombine.high %v3068_v30, %v3076_v34 }
 0x4f9   :  { %v7553_v42 = vcombine.high %v3069_v37, %v3077_v38  ;;  %v7552_v27 = vcombine.low %v3069_v37, %v3077_v38 }
 0x4fa   :  { %6157 = vmatpush1.bf16.msra.mxu0 %v7438_v13  ;;  %v3084_v13 = vld [vmem:[#allocation14 + $0x890] sm:$0xff] }
 0x4fb   :  { %6243 = vmatpush1.bf16.msra.mxu1 %v7440_v43  ;;  %6158 = vmatprep.subr.bf16.mxu0 %v7455_v63  ;;  %v3092_v43 = vld [vmem:[#allocation14 + $0x8d0] sm:$0xff]  ;;  %v7550_v63 = vcombine.low %v3068_v30, %v3076_v34 }
 0x4fc   :  { %6244 = vmatprep.subr.bf16.mxu1 %v7457_v62  ;;  %v3085_v62 = vld [vmem:[#allocation14 + $0x898] sm:$0xff]  ;;  %v7567_v45 = vcombine.high %v3084_v13, %v3092_v43  ;;  %v7566_v50 = vcombine.low %v3084_v13, %v3092_v43 }
 0x4fd   :  { %v7568_v51 = vcombine.low %v3085_v62, %v3093_v11 }
 0x4fe   :  { %6159 = vmatpush1.bf16.msra.mxu0 %v7454_v29  ;;  %v3108_v29 = vld [vmem:[#allocation14 + $0x950] sm:$0xff] }
 0x4ff   :  { %6245 = vmatpush1.bf16.msra.mxu1 %v7456_v47  ;;  %6160 = vmatprep.subr.bf16.mxu0 %v7471_v0  ;;  %v7569_v47 = vcombine.high %v3085_v62, %v3093_v11  ;;  %v3101_v0 = vld [vmem:[#allocation14 + $0x918] sm:$0xff]  ;;  %v7583_v52 = vcombine.high %v3100_v46, %v3108_v29  ;;  %v7582_v58 = vcombine.low %v3100_v46, %v3108_v29  ;;  %v3196_v11 = vld [vmem:[#allocation14 + $0xc10] sm:$0xff] }
 0x500   :  { %6246 = vmatprep.subr.bf16.mxu1 %v7473_v49  ;;  %v3109_v49 = vld [vmem:[#allocation14 + $0x958] sm:$0xff] }
 0x501   :  { %v7585_v53 = vcombine.high %v3101_v0, %v3109_v49  ;;  %v7584_v3 = vcombine.low %v3101_v0, %v3109_v49  ;;  %v3205_v46 = vld [vmem:[#allocation14 + $0xc58] sm:$0xff] }
 0x502   :  { %6161 = vmatpush1.bf16.msra.mxu0 %v7470_v54  ;;  %v3116_v54 = vld [vmem:[#allocation14 + $0x990] sm:$0xff] }
 0x503   :  { %6247 = vmatpush1.bf16.msra.mxu1 %v7472_v55  ;;  %6162 = vmatprep.subr.bf16.mxu0 %v7487_v56  ;;  %v3124_v55 = vld [vmem:[#allocation14 + $0x9d0] sm:$0xff]  ;;  %v3117_v56 = vld [vmem:[#allocation14 + $0x998] sm:$0xff] }
 0x504   :  { %6248 = vmatprep.subr.bf16.mxu1 %v7489_v57  ;;  %v3125_v57 = vld [vmem:[#allocation14 + $0x9d8] sm:$0xff]  ;;  %v7599_v59 = vcombine.high %v3116_v54, %v3124_v55  ;;  %v7598_v36 = vcombine.low %v3116_v54, %v3124_v55 }
 0x505   :  { %v7601_v2 = vcombine.high %v3117_v56, %v3125_v57  ;;  %v7600_v16 = vcombine.low %v3117_v56, %v3125_v57 }
 0x506   :  { %6163 = vmatpush1.bf16.msra.mxu0 %v7486_v31  ;;  %v3132_v31 = vld [vmem:[#allocation14 + $0xa10] sm:$0xff] }
 0x507   :  { %6249 = vmatpush1.bf16.msra.mxu1 %v7488_v32  ;;  %6164 = vmatprep.subr.bf16.mxu0 %v7503_v33  ;;  %v3140_v32 = vld [vmem:[#allocation14 + $0xa50] sm:$0xff]  ;;  %v3133_v33 = vld [vmem:[#allocation14 + $0xa18] sm:$0xff] }
 0x508   :  { %6250 = vmatprep.subr.bf16.mxu1 %v7505_v35  ;;  %v3141_v35 = vld [vmem:[#allocation14 + $0xa58] sm:$0xff]  ;;  %v7615_v60 = vcombine.high %v3132_v31, %v3140_v32  ;;  %v7614_v19 = vcombine.low %v3132_v31, %v3140_v32 }
 0x509   :  { %v7617_v61 = vcombine.high %v3133_v33, %v3141_v35  ;;  %v7616_v1 = vcombine.low %v3133_v33, %v3141_v35 }
 0x50a   :  { %6165 = vmatpush1.bf16.msra.mxu0 %v7502_v9  ;;  %v3148_v9 = vld [vmem:[#allocation14 + $0xa90] sm:$0xff] }
 0x50b   :  { %6251 = vmatpush1.bf16.msra.mxu1 %v7504_v14  ;;  %6166 = vmatprep.subr.bf16.mxu0 %v7519_v22  ;;  %v3156_v14 = vld [vmem:[#allocation14 + $0xad0] sm:$0xff]  ;;  %v3149_v22 = vld [vmem:[#allocation14 + $0xa98] sm:$0xff] }
 0x50c   :  { %6252 = vmatprep.subr.bf16.mxu1 %v7521_v17  ;;  %v3157_v17 = vld [vmem:[#allocation14 + $0xad8] sm:$0xff]  ;;  %v7631_v18 = vcombine.high %v3148_v9, %v3156_v14  ;;  %v7630_v30 = vcombine.low %v3148_v9, %v3156_v14 }
 0x50d   :  { %v7633_v21 = vcombine.high %v3149_v22, %v3157_v17  ;;  %v7632_v34 = vcombine.low %v3149_v22, %v3157_v17 }
 0x50e   :  { %6167 = vmatpush1.bf16.msra.mxu0 %v7518_v7  ;;  %v3164_v7 = vld [vmem:[#allocation14 + $0xb10] sm:$0xff] }
 0x50f   :  { %6253 = vmatpush1.bf16.msra.mxu1 %v7520_v26  ;;  %6168 = vmatprep.subr.bf16.mxu0 %v7535_v12  ;;  %v3172_v26 = vld [vmem:[#allocation14 + $0xb50] sm:$0xff]  ;;  %v3165_v12 = vld [vmem:[#allocation14 + $0xb18] sm:$0xff] }
 0x510   :  { %6254 = vmatprep.subr.bf16.mxu1 %v7537_v28  ;;  %v3173_v28 = vld [vmem:[#allocation14 + $0xb58] sm:$0xff]  ;;  %v7647_v37 = vcombine.high %v3164_v7, %v3172_v26  ;;  %v7646_v13 = vcombine.low %v3164_v7, %v3172_v26 }
 0x511   :  { %v7649_v38 = vcombine.high %v3165_v12, %v3173_v28  ;;  %v7648_v43 = vcombine.low %v3165_v12, %v3173_v28 }
 0x512   :  { %6169 = vmatpush1.bf16.msra.mxu0 %v7534_v39  ;;  %v3180_v39 = vld [vmem:[#allocation14 + $0xb90] sm:$0xff] }
 0x513   :  { %6255 = vmatpush1.bf16.msra.mxu1 %v7536_v40  ;;  %6181 = vmatprep.subr.bf16.mxu0 %v7551_v41  ;;  %v3188_v40 = vld [vmem:[#allocation14 + $0xbd0] sm:$0xff]  ;;  %v3181_v41 = vld [vmem:[#allocation14 + $0xb98] sm:$0xff] }
 0x514   :  { %6267 = vmatprep.subr.bf16.mxu1 %v7553_v42  ;;  %v3189_v42 = vld [vmem:[#allocation14 + $0xbd8] sm:$0xff]  ;;  %v7662_v29 = vcombine.low %v3180_v39, %v3188_v40 }
 0x515   :  { %6171 = vmatmul.mubr.bf16.vlgmr.msra.gmra.mrb[12].mxu0 %v9145_v44  ;;  %v7665_v62 = vcombine.high %v3181_v41, %v3189_v42 }
 0x516   :  { %6257 = vmatmul.mubr.bf16.vlgmr.msra.gmra.mrb[12].mxu1 %v9145_v44  ;;  %6182 = vmatpush1.bf16.msra.mxu0 %v7550_v63  ;;  %v7663_v63 = vcombine.high %v3180_v39, %v3188_v40 }
 0x517   :  { %6213 = vmatprep.mubr.bf16.mxu0 %v9151_v48  ;;  %6268 = vmatpush1.bf16.msra.mxu1 %v7552_v27  ;;  %v3204_v27 = vld [vmem:[#allocation14 + $0xc50] sm:$0xff] }
 0x518   :  { %6299 = vmatprep.mubr.bf16.mxu1 %v9151_v48  ;;  %6183 = vmatprep.subr.bf16.mxu0 %v7567_v45  ;;  %v3197_v45 = vld [vmem:[#allocation14 + $0xc18] sm:$0xff]  ;;  %v7679_v0 = vcombine.high %v3196_v11, %v3204_v27  ;;  %v7678_v54 = vcombine.low %v3196_v11, %v3204_v27 }
 0x519   :  { %6269 = vmatprep.subr.bf16.mxu1 %v7569_v47  ;;  %v7664_v47 = vcombine.low %v3181_v41, %v3189_v42  ;;  %v7681_v49 = vcombine.high %v3197_v45, %v3205_v46  ;;  %v7680_v55 = vcombine.low %v3197_v45, %v3205_v46 }
 0x51a   :  { %6184 = vmatpush1.bf16.msra.mxu0 %v7566_v50  ;;  %v3212_v50 = vld [vmem:[#allocation14 + $0xc90] sm:$0xff] }
 0x51b   :  { %6270 = vmatpush1.bf16.msra.mxu1 %v7568_v51  ;;  %6185 = vmatprep.subr.bf16.mxu0 %v7583_v52  ;;  %v3220_v51 = vld [vmem:[#allocation14 + $0xcd0] sm:$0xff]  ;;  %v3213_v52 = vld [vmem:[#allocation14 + $0xc98] sm:$0xff] }
 0x51c   :  { %6271 = vmatprep.subr.bf16.mxu1 %v7585_v53  ;;  %v3221_v53 = vld [vmem:[#allocation14 + $0xcd8] sm:$0xff]  ;;  %v7695_v56 = vcombine.high %v3212_v50, %v3220_v51  ;;  %v7694_v31 = vcombine.low %v3212_v50, %v3220_v51 }
 0x51d   :  { %v7697_v57 = vcombine.high %v3213_v52, %v3221_v53  ;;  %v7696_v32 = vcombine.low %v3213_v52, %v3221_v53 }
 0x51e   :  { %6186 = vmatpush1.bf16.msra.mxu0 %v7582_v58  ;;  %v3228_v58 = vld [vmem:[#allocation14 + $0xd10] sm:$0xff] }
 0x51f   :  { %6272 = vmatpush1.bf16.msra.mxu1 %v7584_v3  ;;  %6187 = vmatprep.subr.bf16.mxu0 %v7599_v59  ;;  %v3236_v3 = vld [vmem:[#allocation14 + $0xd50] sm:$0xff]  ;;  %v3229_v59 = vld [vmem:[#allocation14 + $0xd18] sm:$0xff] }
 0x520   :  { %6273 = vmatprep.subr.bf16.mxu1 %v7601_v2  ;;  %v3237_v2 = vld [vmem:[#allocation14 + $0xd58] sm:$0xff]  ;;  %v7711_v33 = vcombine.high %v3228_v58, %v3236_v3  ;;  %v7710_v9 = vcombine.low %v3228_v58, %v3236_v3 }
 0x521   :  { %v7713_v35 = vcombine.high %v3229_v59, %v3237_v2  ;;  %v7712_v14 = vcombine.low %v3229_v59, %v3237_v2 }
 0x522   :  { %6188 = vmatpush1.bf16.msra.mxu0 %v7598_v36  ;;  %v3244_v36 = vld [vmem:[#allocation14 + $0xd90] sm:$0xff] }
 0x523   :  { %6274 = vmatpush1.bf16.msra.mxu1 %v7600_v16  ;;  %6189 = vmatprep.subr.bf16.mxu0 %v7615_v60  ;;  %v3252_v16 = vld [vmem:[#allocation14 + $0xdd0] sm:$0xff]  ;;  %v3245_v60 = vld [vmem:[#allocation14 + $0xd98] sm:$0xff] }
 0x524   :  { %6275 = vmatprep.subr.bf16.mxu1 %v7617_v61  ;;  %v3253_v61 = vld [vmem:[#allocation14 + $0xdd8] sm:$0xff]  ;;  %v7727_v22 = vcombine.high %v3244_v36, %v3252_v16  ;;  %v7726_v7 = vcombine.low %v3244_v36, %v3252_v16  ;;  %v2839_v36 = vld [vmem:[#allocation14 + $0xe8] sm:$0xff] }
 0x525   :  { %v7729_v17 = vcombine.high %v3245_v60, %v3253_v61  ;;  %v7728_v26 = vcombine.low %v3245_v60, %v3253_v61  ;;  %v2846_v61 = vld [vmem:[#allocation14 + $0x120] sm:$0xff] }
 0x526   :  { %6190 = vmatpush1.bf16.msra.mxu0 %v7614_v19  ;;  %v3260_v19 = vld [vmem:[#allocation14 + $0xe10] sm:$0xff] }
 0x527   :  { %6276 = vmatpush1.bf16.msra.mxu1 %v7616_v1  ;;  %6191 = vmatprep.subr.bf16.mxu0 %v7631_v18  ;;  %v3268_v1 = vld [vmem:[#allocation14 + $0xe50] sm:$0xff]  ;;  %v3261_v18 = vld [vmem:[#allocation14 + $0xe18] sm:$0xff] }
 0x528   :  { %6277 = vmatprep.subr.bf16.mxu1 %v7633_v21  ;;  %v3269_v21 = vld [vmem:[#allocation14 + $0xe58] sm:$0xff]  ;;  %v7743_v12 = vcombine.high %v3260_v19, %v3268_v1  ;;  %v7742_v39 = vcombine.low %v3260_v19, %v3268_v1 }
 0x529   :  { %v7745_v28 = vcombine.high %v3261_v18, %v3269_v21  ;;  %v7744_v40 = vcombine.low %v3261_v18, %v3269_v21 }
 0x52a   :  { %6192 = vmatpush1.bf16.msra.mxu0 %v7630_v30  ;;  %v3276_v30 = vld [vmem:[#allocation14 + $0xe90] sm:$0xff] }
 0x52b   :  { %6278 = vmatpush1.bf16.msra.mxu1 %v7632_v34  ;;  %6193 = vmatprep.subr.bf16.mxu0 %v7647_v37  ;;  %v3284_v34 = vld [vmem:[#allocation14 + $0xed0] sm:$0xff]  ;;  %v3277_v37 = vld [vmem:[#allocation14 + $0xe98] sm:$0xff] }
 0x52c   :  { %6279 = vmatprep.subr.bf16.mxu1 %v7649_v38  ;;  %v3285_v38 = vld [vmem:[#allocation14 + $0xed8] sm:$0xff]  ;;  %v7759_v41 = vcombine.high %v3276_v30, %v3284_v34  ;;  %v7758_v11 = vcombine.low %v3276_v30, %v3284_v34 }
 0x52d   :  { %v7761_v42 = vcombine.high %v3277_v37, %v3285_v38  ;;  %v7760_v27 = vcombine.low %v3277_v37, %v3285_v38 }
 0x52e   :  { %6194 = vmatpush1.bf16.msra.mxu0 %v7646_v13  ;;  %v3292_v13 = vld [vmem:[#allocation14 + $0xf10] sm:$0xff] }
 0x52f   :  { %6280 = vmatpush1.bf16.msra.mxu1 %v7648_v43  ;;  %6195 = vmatprep.subr.bf16.mxu0 %v7663_v63  ;;  %v3300_v43 = vld [vmem:[#allocation14 + $0xf50] sm:$0xff]  ;;  %v3293_v63 = vld [vmem:[#allocation14 + $0xf18] sm:$0xff] }
 0x530   :  { %6281 = vmatprep.subr.bf16.mxu1 %v7665_v62  ;;  %v3301_v62 = vld [vmem:[#allocation14 + $0xf58] sm:$0xff]  ;;  %v7775_v45 = vcombine.high %v3292_v13, %v3300_v43  ;;  %v7774_v50 = vcombine.low %v3292_v13, %v3300_v43 }
 0x531   :  { %v7777_v46 = vcombine.high %v3293_v63, %v3301_v62  ;;  %v7776_v51 = vcombine.low %v3293_v63, %v3301_v62 }
 0x532   :  { %6196 = vmatpush1.bf16.msra.mxu0 %v7662_v29  ;;  %v3308_v29 = vld [vmem:[#allocation14 + $0xf90] sm:$0xff] }
 0x533   :  { %6282 = vmatpush1.bf16.msra.mxu1 %v7664_v47  ;;  %6197 = vmatprep.subr.bf16.mxu0 %v7679_v0  ;;  %v3316_v47 = vld [vmem:[#allocation14 + $0xfd0] sm:$0xff]  ;;  %v3309_v0 = vld [vmem:[#allocation14 + $0xf98] sm:$0xff] }
 0x534   :  { %6283 = vmatprep.subr.bf16.mxu1 %v7681_v49  ;;  %v3317_v49 = vld [vmem:[#allocation14 + $0xfd8] sm:$0xff]  ;;  %v7791_v52 = vcombine.high %v3308_v29, %v3316_v47  ;;  %v7790_v58 = vcombine.low %v3308_v29, %v3316_v47 }
 0x535   :  { %v7793_v53 = vcombine.high %v3309_v0, %v3317_v49  ;;  %v7792_v3 = vcombine.low %v3309_v0, %v3317_v49 }
 0x536   :  { %6198 = vmatpush1.bf16.msra.mxu0 %v7678_v54  ;;  %v2814_v54 = vld [vmem:[#allocation14 + $0x20] sm:$0xff] }
 0x537   :  { %6284 = vmatpush1.bf16.msra.mxu1 %v7680_v55  ;;  %6199 = vmatprep.subr.bf16.mxu0 %v7695_v56  ;;  %v2822_v55 = vld [vmem:[#allocation14 + $0x60] sm:$0xff]  ;;  %v2815_v56 = vld [vmem:[#allocation14 + $0x28] sm:$0xff] }
 0x538   :  { %6285 = vmatprep.subr.bf16.mxu1 %v7697_v57  ;;  %v2823_v57 = vld [vmem:[#allocation14 + $0x68] sm:$0xff]  ;;  %v7299_v59 = vcombine.high %v2814_v54, %v2822_v55 }
 0x539   :  { %v7301_v2 = vcombine.high %v2815_v56, %v2823_v57  ;;  %v7300_v16 = vcombine.low %v2815_v56, %v2823_v57 }
 0x53a   :  { %6200 = vmatpush1.bf16.msra.mxu0 %v7694_v31  ;;  %v2830_v31 = vld [vmem:[#allocation14 + $0xa0] sm:$0xff] }
 0x53b   :  { %6286 = vmatpush1.bf16.msra.mxu1 %v7696_v32  ;;  %6201 = vmatprep.subr.bf16.mxu0 %v7711_v33  ;;  %v2838_v32 = vld [vmem:[#allocation14 + $0xe0] sm:$0xff]  ;;  %v7298_v33 = vcombine.low %v2814_v54, %v2822_v55 }
 0x53c   :  { %6287 = vmatprep.subr.bf16.mxu1 %v7713_v35  ;;  %v2831_v35 = vld [vmem:[#allocation14 + $0xa8] sm:$0xff]  ;;  %v7315_v60 = vcombine.high %v2830_v31, %v2838_v32  ;;  %v7314_v19 = vcombine.low %v2830_v31, %v2838_v32 }
 0x53d   :  { %v7316_v1 = vcombine.low %v2831_v35, %v2839_v36 }
 0x53e   :  { %6202 = vmatpush1.bf16.msra.mxu0 %v7710_v9  ;;  %v2854_v9 = vld [vmem:[#allocation14 + $0x160] sm:$0xff] }
 0x53f   :  { %6288 = vmatpush1.bf16.msra.mxu1 %v7712_v14  ;;  %6203 = vmatprep.subr.bf16.mxu0 %v7727_v22  ;;  %v7317_v14 = vcombine.high %v2831_v35, %v2839_v36  ;;  %v2847_v22 = vld [vmem:[#allocation14 + $0x128] sm:$0xff]  ;;  %v7331_v18 = vcombine.high %v2846_v61, %v2854_v9  ;;  %v7330_v30 = vcombine.low %v2846_v61, %v2854_v9  ;;  %v2942_v36 = vld [vmem:[#allocation14 + $0x420] sm:$0xff] }
 0x540   :  { %6289 = vmatprep.subr.bf16.mxu1 %v7729_v17  ;;  %v2855_v17 = vld [vmem:[#allocation14 + $0x168] sm:$0xff] }
 0x541   :  { %v7333_v21 = vcombine.high %v2847_v22, %v2855_v17  ;;  %v7332_v34 = vcombine.low %v2847_v22, %v2855_v17  ;;  %v2951_v61 = vld [vmem:[#allocation14 + $0x468] sm:$0xff] }
 0x542   :  { %6204 = vmatpush1.bf16.msra.mxu0 %v7726_v7  ;;  %v2862_v7 = vld [vmem:[#allocation14 + $0x1a0] sm:$0xff] }
 0x543   :  { %6290 = vmatpush1.bf16.msra.mxu1 %v7728_v26  ;;  %6205 = vmatprep.subr.bf16.mxu0 %v7743_v12  ;;  %v2870_v26 = vld [vmem:[#allocation14 + $0x1e0] sm:$0xff]  ;;  %v2863_v12 = vld [vmem:[#allocation14 + $0x1a8] sm:$0xff] }
 0x544   :  { %6291 = vmatprep.subr.bf16.mxu1 %v7745_v28  ;;  %v2871_v28 = vld [vmem:[#allocation14 + $0x1e8] sm:$0xff]  ;;  %v7347_v37 = vcombine.high %v2862_v7, %v2870_v26  ;;  %v7346_v13 = vcombine.low %v2862_v7, %v2870_v26 }
 0x545   :  { %v7349_v38 = vcombine.high %v2863_v12, %v2871_v28  ;;  %v7348_v43 = vcombine.low %v2863_v12, %v2871_v28 }
 0x546   :  { %6206 = vmatpush1.bf16.msra.mxu0 %v7742_v39  ;;  %v2878_v39 = vld [vmem:[#allocation14 + $0x220] sm:$0xff] }
 0x547   :  { %6292 = vmatpush1.bf16.msra.mxu1 %v7744_v40  ;;  %6207 = vmatprep.subr.bf16.mxu0 %v7759_v41  ;;  %v2886_v40 = vld [vmem:[#allocation14 + $0x260] sm:$0xff]  ;;  %v2879_v41 = vld [vmem:[#allocation14 + $0x228] sm:$0xff] }
 0x548   :  { %6293 = vmatprep.subr.bf16.mxu1 %v7761_v42  ;;  %v2887_v42 = vld [vmem:[#allocation14 + $0x268] sm:$0xff]  ;;  %v7363_v63 = vcombine.high %v2878_v39, %v2886_v40  ;;  %v7362_v29 = vcombine.low %v2878_v39, %v2886_v40 }
 0x549   :  { %v7365_v62 = vcombine.high %v2879_v41, %v2887_v42  ;;  %v7364_v47 = vcombine.low %v2879_v41, %v2887_v42 }
 0x54a   :  { %6208 = vmatpush1.bf16.msra.mxu0 %v7758_v11  ;;  %v2894_v11 = vld [vmem:[#allocation14 + $0x2a0] sm:$0xff] }
 0x54b   :  { %6294 = vmatpush1.bf16.msra.mxu1 %v7760_v27  ;;  %6209 = vmatprep.subr.bf16.mxu0 %v7775_v45  ;;  %v2902_v27 = vld [vmem:[#allocation14 + $0x2e0] sm:$0xff]  ;;  %v2895_v45 = vld [vmem:[#allocation14 + $0x2a8] sm:$0xff] }
 0x54c   :  { %6295 = vmatprep.subr.bf16.mxu1 %v7777_v46  ;;  %v2903_v46 = vld [vmem:[#allocation14 + $0x2e8] sm:$0xff]  ;;  %v7379_v0 = vcombine.high %v2894_v11, %v2902_v27  ;;  %v7378_v54 = vcombine.low %v2894_v11, %v2902_v27 }
 0x54d   :  { %v7381_v49 = vcombine.high %v2895_v45, %v2903_v46  ;;  %v7380_v55 = vcombine.low %v2895_v45, %v2903_v46 }
 0x54e   :  { %6210 = vmatpush1.bf16.msra.mxu0 %v7774_v50  ;;  %v2910_v50 = vld [vmem:[#allocation14 + $0x320] sm:$0xff] }
 0x54f   :  { %6296 = vmatpush1.bf16.msra.mxu1 %v7776_v51  ;;  %6211 = vmatprep.subr.bf16.mxu0 %v7791_v52  ;;  %v2918_v51 = vld [vmem:[#allocation14 + $0x360] sm:$0xff]  ;;  %v2911_v52 = vld [vmem:[#allocation14 + $0x328] sm:$0xff] }
 0x550   :  { %6297 = vmatprep.subr.bf16.mxu1 %v7793_v53  ;;  %v2919_v53 = vld [vmem:[#allocation14 + $0x368] sm:$0xff]  ;;  %v7395_v56 = vcombine.high %v2910_v50, %v2918_v51  ;;  %v7394_v31 = vcombine.low %v2910_v50, %v2918_v51 }
 0x551   :  { %v7397_v57 = vcombine.high %v2911_v52, %v2919_v53  ;;  %v7396_v32 = vcombine.low %v2911_v52, %v2919_v53 }
 0x552   :  { %6212 = vmatpush1.bf16.msra.mxu0 %v7790_v58  ;;  %v2926_v58 = vld [vmem:[#allocation14 + $0x3a0] sm:$0xff] }
 0x553   :  { %6298 = vmatpush1.bf16.msra.mxu1 %v7792_v3  ;;  %6310 = vmatprep.subr.bf16.mxu0 %v7299_v59  ;;  %v2934_v3 = vld [vmem:[#allocation14 + $0x3e0] sm:$0xff]  ;;  %v2927_v59 = vld [vmem:[#allocation14 + $0x3a8] sm:$0xff] }
 0x554   :  { %6396 = vmatprep.subr.bf16.mxu1 %v7301_v2  ;;  %v2935_v2 = vld [vmem:[#allocation14 + $0x3e8] sm:$0xff]  ;;  %v7410_v9 = vcombine.low %v2926_v58, %v2934_v3 }
 0x555   :  { %6214 = vmatmul.mubr.bf16.vlgmr.msra.gmra.mrb[12].mxu0 %v9147_v4  ;;  %v7413_v35 = vcombine.high %v2927_v59, %v2935_v2 }
 0x556   :  { %6300 = vmatmul.mubr.bf16.vlgmr.msra.gmra.mrb[12].mxu1 %v9147_v4  ;;  %6311 = vmatpush1.bf16.msra.mxu0 %v7298_v33  ;;  %v7411_v33 = vcombine.high %v2926_v58, %v2934_v3 }
 0x557   :  { %6342 = vmatprep.mubr.bf16.mxu0 %v9149_v20  ;;  %6397 = vmatpush1.bf16.msra.mxu1 %v7300_v16  ;;  %v2950_v16 = vld [vmem:[#allocation14 + $0x460] sm:$0xff] }
 0x558   :  { %6428 = vmatprep.mubr.bf16.mxu1 %v9149_v20  ;;  %6312 = vmatprep.subr.bf16.mxu0 %v7315_v60  ;;  %v2943_v60 = vld [vmem:[#allocation14 + $0x428] sm:$0xff]  ;;  %v7427_v22 = vcombine.high %v2942_v36, %v2950_v16  ;;  %v7426_v7 = vcombine.low %v2942_v36, %v2950_v16 }
 0x559   :  { %6398 = vmatprep.subr.bf16.mxu1 %v7317_v14  ;;  %v7412_v14 = vcombine.low %v2927_v59, %v2935_v2  ;;  %v7429_v17 = vcombine.high %v2943_v60, %v2951_v61  ;;  %v7428_v26 = vcombine.low %v2943_v60, %v2951_v61 }
 0x55a   :  { %6313 = vmatpush1.bf16.msra.mxu0 %v7314_v19  ;;  %v2958_v19 = vld [vmem:[#allocation14 + $0x4a0] sm:$0xff] }
 0x55b   :  { %6399 = vmatpush1.bf16.msra.mxu1 %v7316_v1  ;;  %6314 = vmatprep.subr.bf16.mxu0 %v7331_v18  ;;  %v2966_v1 = vld [vmem:[#allocation14 + $0x4e0] sm:$0xff]  ;;  %v2959_v18 = vld [vmem:[#allocation14 + $0x4a8] sm:$0xff] }
 0x55c   :  { %6400 = vmatprep.subr.bf16.mxu1 %v7333_v21  ;;  %v2967_v21 = vld [vmem:[#allocation14 + $0x4e8] sm:$0xff]  ;;  %v7443_v12 = vcombine.high %v2958_v19, %v2966_v1  ;;  %v7442_v39 = vcombine.low %v2958_v19, %v2966_v1 }
 0x55d   :  { %v7445_v28 = vcombine.high %v2959_v18, %v2967_v21  ;;  %v7444_v40 = vcombine.low %v2959_v18, %v2967_v21 }
 0x55e   :  { %6315 = vmatpush1.bf16.msra.mxu0 %v7330_v30  ;;  %v2974_v30 = vld [vmem:[#allocation14 + $0x520] sm:$0xff] }
 0x55f   :  { %6401 = vmatpush1.bf16.msra.mxu1 %v7332_v34  ;;  %6316 = vmatprep.subr.bf16.mxu0 %v7347_v37  ;;  %v2982_v34 = vld [vmem:[#allocation14 + $0x560] sm:$0xff]  ;;  %v2975_v37 = vld [vmem:[#allocation14 + $0x528] sm:$0xff] }
 0x560   :  { %6402 = vmatprep.subr.bf16.mxu1 %v7349_v38  ;;  %v2983_v38 = vld [vmem:[#allocation14 + $0x568] sm:$0xff]  ;;  %v7459_v41 = vcombine.high %v2974_v30, %v2982_v34  ;;  %v7458_v11 = vcombine.low %v2974_v30, %v2982_v34 }
 0x561   :  { %v7461_v42 = vcombine.high %v2975_v37, %v2983_v38  ;;  %v7460_v27 = vcombine.low %v2975_v37, %v2983_v38 }
 0x562   :  { %6317 = vmatpush1.bf16.msra.mxu0 %v7346_v13  ;;  %v2990_v13 = vld [vmem:[#allocation14 + $0x5a0] sm:$0xff] }
 0x563   :  { %6403 = vmatpush1.bf16.msra.mxu1 %v7348_v43  ;;  %6318 = vmatprep.subr.bf16.mxu0 %v7363_v63  ;;  %v2998_v43 = vld [vmem:[#allocation14 + $0x5e0] sm:$0xff]  ;;  %v2991_v63 = vld [vmem:[#allocation14 + $0x5a8] sm:$0xff] }
 0x564   :  { %6404 = vmatprep.subr.bf16.mxu1 %v7365_v62  ;;  %v2999_v62 = vld [vmem:[#allocation14 + $0x5e8] sm:$0xff]  ;;  %v7475_v45 = vcombine.high %v2990_v13, %v2998_v43  ;;  %v7474_v50 = vcombine.low %v2990_v13, %v2998_v43 }
 0x565   :  { %v7477_v46 = vcombine.high %v2991_v63, %v2999_v62  ;;  %v7476_v51 = vcombine.low %v2991_v63, %v2999_v62  ;;  %v3095_v13 = vld [vmem:[#allocation14 + $0x8e8] sm:$0xff]  ;;  %v3102_v62 = vld [vmem:[#allocation14 + $0x920] sm:$0xff] }
 0x566   :  { %6319 = vmatpush1.bf16.msra.mxu0 %v7362_v29  ;;  %v3006_v29 = vld [vmem:[#allocation14 + $0x620] sm:$0xff] }
 0x567   :  { %6405 = vmatpush1.bf16.msra.mxu1 %v7364_v47  ;;  %6320 = vmatprep.subr.bf16.mxu0 %v7379_v0  ;;  %v3014_v47 = vld [vmem:[#allocation14 + $0x660] sm:$0xff]  ;;  %v3007_v0 = vld [vmem:[#allocation14 + $0x628] sm:$0xff] }
 0x568   :  { %6406 = vmatprep.subr.bf16.mxu1 %v7381_v49  ;;  %v3015_v49 = vld [vmem:[#allocation14 + $0x668] sm:$0xff]  ;;  %v7491_v52 = vcombine.high %v3006_v29, %v3014_v47  ;;  %v7490_v58 = vcombine.low %v3006_v29, %v3014_v47 }
 0x569   :  { %v7493_v53 = vcombine.high %v3007_v0, %v3015_v49  ;;  %v7492_v3 = vcombine.low %v3007_v0, %v3015_v49 }
 0x56a   :  { %6321 = vmatpush1.bf16.msra.mxu0 %v7378_v54  ;;  %v3022_v54 = vld [vmem:[#allocation14 + $0x6a0] sm:$0xff] }
 0x56b   :  { %6407 = vmatpush1.bf16.msra.mxu1 %v7380_v55  ;;  %6322 = vmatprep.subr.bf16.mxu0 %v7395_v56  ;;  %v3030_v55 = vld [vmem:[#allocation14 + $0x6e0] sm:$0xff]  ;;  %v3023_v56 = vld [vmem:[#allocation14 + $0x6a8] sm:$0xff] }
 0x56c   :  { %6408 = vmatprep.subr.bf16.mxu1 %v7397_v57  ;;  %v3031_v57 = vld [vmem:[#allocation14 + $0x6e8] sm:$0xff]  ;;  %v7507_v59 = vcombine.high %v3022_v54, %v3030_v55  ;;  %v7506_v36 = vcombine.low %v3022_v54, %v3030_v55 }
 0x56d   :  { %v7509_v2 = vcombine.high %v3023_v56, %v3031_v57  ;;  %v7508_v16 = vcombine.low %v3023_v56, %v3031_v57 }
 0x56e   :  { %6323 = vmatpush1.bf16.msra.mxu0 %v7394_v31  ;;  %v3038_v31 = vld [vmem:[#allocation14 + $0x720] sm:$0xff] }
 0x56f   :  { %6409 = vmatpush1.bf16.msra.mxu1 %v7396_v32  ;;  %6324 = vmatprep.subr.bf16.mxu0 %v7411_v33  ;;  %v3046_v32 = vld [vmem:[#allocation14 + $0x760] sm:$0xff]  ;;  %v3039_v33 = vld [vmem:[#allocation14 + $0x728] sm:$0xff] }
 0x570   :  { %6410 = vmatprep.subr.bf16.mxu1 %v7413_v35  ;;  %v3047_v35 = vld [vmem:[#allocation14 + $0x768] sm:$0xff]  ;;  %v7523_v60 = vcombine.high %v3038_v31, %v3046_v32  ;;  %v7522_v19 = vcombine.low %v3038_v31, %v3046_v32 }
 0x571   :  { %v7525_v61 = vcombine.high %v3039_v33, %v3047_v35  ;;  %v7524_v1 = vcombine.low %v3039_v33, %v3047_v35 }
 0x572   :  { %6325 = vmatpush1.bf16.msra.mxu0 %v7410_v9  ;;  %v3054_v9 = vld [vmem:[#allocation14 + $0x7a0] sm:$0xff] }
 0x573   :  { %6411 = vmatpush1.bf16.msra.mxu1 %v7412_v14  ;;  %6326 = vmatprep.subr.bf16.mxu0 %v7427_v22  ;;  %v3062_v14 = vld [vmem:[#allocation14 + $0x7e0] sm:$0xff]  ;;  %v3055_v22 = vld [vmem:[#allocation14 + $0x7a8] sm:$0xff] }
 0x574   :  { %6412 = vmatprep.subr.bf16.mxu1 %v7429_v17  ;;  %v3063_v17 = vld [vmem:[#allocation14 + $0x7e8] sm:$0xff]  ;;  %v7539_v18 = vcombine.high %v3054_v9, %v3062_v14  ;;  %v7538_v30 = vcombine.low %v3054_v9, %v3062_v14  ;;  %v9181_v14 = vld [vmem:[#allocation16] sm:$0xff] }
 0x575   :  { %v7541_v21 = vcombine.high %v3055_v22, %v3063_v17  ;;  %v7540_v34 = vcombine.low %v3055_v22, %v3063_v17 }
 0x576   :  { %6327 = vmatpush1.bf16.msra.mxu0 %v7426_v7  ;;  %v3070_v7 = vld [vmem:[#allocation14 + $0x820] sm:$0xff] }
 0x577   :  { %6413 = vmatpush1.bf16.msra.mxu1 %v7428_v26  ;;  %6328 = vmatprep.subr.bf16.mxu0 %v7443_v12  ;;  %v3078_v26 = vld [vmem:[#allocation14 + $0x860] sm:$0xff]  ;;  %v3071_v12 = vld [vmem:[#allocation14 + $0x828] sm:$0xff] }
 0x578   :  { %6414 = vmatprep.subr.bf16.mxu1 %v7445_v28  ;;  %v3079_v28 = vld [vmem:[#allocation14 + $0x868] sm:$0xff]  ;;  %v7555_v37 = vcombine.high %v3070_v7, %v3078_v26 }
 0x579   :  { %v7557_v38 = vcombine.high %v3071_v12, %v3079_v28  ;;  %v7556_v43 = vcombine.low %v3071_v12, %v3079_v28  ;;  %v3175_v12 = vld [vmem:[#allocation14 + $0xb68] sm:$0xff]  ;;  %v3333_v28 = vrot.slane %v9181_v14, %v9064_v5 }
 0x57a   :  { %6329 = vmatpush1.bf16.msra.mxu0 %v7442_v39  ;;  %v3086_v39 = vld [vmem:[#allocation14 + $0x8a0] sm:$0xff] }
 0x57b   :  { %6415 = vmatpush1.bf16.msra.mxu1 %v7444_v40  ;;  %6330 = vmatprep.subr.bf16.mxu0 %v7459_v41  ;;  %v3094_v40 = vld [vmem:[#allocation14 + $0x8e0] sm:$0xff]  ;;  %v7554_v41 = vcombine.low %v3070_v7, %v3078_v26  ;;  %v3337_v7 = vrot.slane %v9181_v14, %v9067_v6  ;;  %v3167_v26 = vld [vmem:[#allocation14 + $0xb28] sm:$0xff] }
 0x57c   :  { %6416 = vmatprep.subr.bf16.mxu1 %v7461_v42  ;;  %v3087_v42 = vld [vmem:[#allocation14 + $0x8a8] sm:$0xff]  ;;  %v7571_v63 = vcombine.high %v3086_v39, %v3094_v40  ;;  %v7570_v29 = vcombine.low %v3086_v39, %v3094_v40 }
 0x57d   :  { %v7572_v47 = vcombine.low %v3087_v42, %v3095_v13 }
 0x57e   :  { %6331 = vmatpush1.bf16.msra.mxu0 %v7458_v11  ;;  %v3110_v11 = vld [vmem:[#allocation14 + $0x960] sm:$0xff] }
 0x57f   :  { %6417 = vmatpush1.bf16.msra.mxu1 %v7460_v27  ;;  %6332 = vmatprep.subr.bf16.mxu0 %v7475_v45  ;;  %v7573_v27 = vcombine.high %v3087_v42, %v3095_v13  ;;  %v3103_v45 = vld [vmem:[#allocation14 + $0x928] sm:$0xff]  ;;  %v7587_v0 = vcombine.high %v3102_v62, %v3110_v11  ;;  %v7586_v54 = vcombine.low %v3102_v62, %v3110_v11  ;;  %v3182_v42 = vld [vmem:[#allocation14 + $0xba0] sm:$0xff] }
 0x580   :  { %6418 = vmatprep.subr.bf16.mxu1 %v7477_v46  ;;  %v3111_v46 = vld [vmem:[#allocation14 + $0x968] sm:$0xff]  ;;  %v3190_v13 = vld [vmem:[#allocation14 + $0xbe0] sm:$0xff] }
 0x581   :  { %v7589_v49 = vcombine.high %v3103_v45, %v3111_v46  ;;  %v7588_v55 = vcombine.low %v3103_v45, %v3111_v46  ;;  %v3191_v45 = vld [vmem:[#allocation14 + $0xbe8] sm:$0xff] }
 0x582   :  { %6333 = vmatpush1.bf16.msra.mxu0 %v7474_v50  ;;  %v3118_v50 = vld [vmem:[#allocation14 + $0x9a0] sm:$0xff] }
 0x583   :  { %6419 = vmatpush1.bf16.msra.mxu1 %v7476_v51  ;;  %6334 = vmatprep.subr.bf16.mxu0 %v7491_v52  ;;  %v3126_v51 = vld [vmem:[#allocation14 + $0x9e0] sm:$0xff]  ;;  %v3119_v52 = vld [vmem:[#allocation14 + $0x9a8] sm:$0xff] }
 0x584   :  { %6420 = vmatprep.subr.bf16.mxu1 %v7493_v53  ;;  %v3127_v53 = vld [vmem:[#allocation14 + $0x9e8] sm:$0xff]  ;;  %v7603_v56 = vcombine.high %v3118_v50, %v3126_v51  ;;  %v7602_v31 = vcombine.low %v3118_v50, %v3126_v51 }
 0x585   :  { %v7605_v57 = vcombine.high %v3119_v52, %v3127_v53  ;;  %v7604_v32 = vcombine.low %v3119_v52, %v3127_v53  ;;  %v7652_v53 = vcombine.low %v3167_v26, %v3175_v12 }
 0x586   :  { %6335 = vmatpush1.bf16.msra.mxu0 %v7490_v58  ;;  %v3134_v58 = vld [vmem:[#allocation14 + $0xa20] sm:$0xff] }
 0x587   :  { %6421 = vmatpush1.bf16.msra.mxu1 %v7492_v3  ;;  %6336 = vmatprep.subr.bf16.mxu0 %v7507_v59  ;;  %v3142_v3 = vld [vmem:[#allocation14 + $0xa60] sm:$0xff]  ;;  %v3135_v59 = vld [vmem:[#allocation14 + $0xa28] sm:$0xff] }
 0x588   :  { %6422 = vmatprep.subr.bf16.mxu1 %v7509_v2  ;;  %v3143_v2 = vld [vmem:[#allocation14 + $0xa68] sm:$0xff]  ;;  %v7619_v33 = vcombine.high %v3134_v58, %v3142_v3  ;;  %v7618_v9 = vcombine.low %v3134_v58, %v3142_v3  ;;  %v3206_v58 = vld [vmem:[#allocation14 + $0xc60] sm:$0xff] }
 0x589   :  { %v7621_v35 = vcombine.high %v3135_v59, %v3143_v2  ;;  %v7620_v22 = vcombine.low %v3135_v59, %v3143_v2  ;;  %v3199_v59 = vld [vmem:[#allocation14 + $0xc28] sm:$0xff] }
 0x58a   :  { %6337 = vmatpush1.bf16.msra.mxu0 %v7506_v36  ;;  %v3150_v36 = vld [vmem:[#allocation14 + $0xaa0] sm:$0xff]  ;;  %v3207_v2 = vld [vmem:[#allocation14 + $0xc68] sm:$0xff] }
 0x58b   :  { %6423 = vmatpush1.bf16.msra.mxu1 %v7508_v16  ;;  %6338 = vmatprep.subr.bf16.mxu0 %v7523_v60  ;;  %v3158_v16 = vld [vmem:[#allocation14 + $0xae0] sm:$0xff]  ;;  %v3151_v60 = vld [vmem:[#allocation14 + $0xaa8] sm:$0xff] }
 0x58c   :  { %6424 = vmatprep.subr.bf16.mxu1 %v7525_v61  ;;  %v3159_v61 = vld [vmem:[#allocation14 + $0xae8] sm:$0xff]  ;;  %v7635_v17 = vcombine.high %v3150_v36, %v3158_v16 }
 0x58e   :  { %6339 = vmatpush1.bf16.msra.mxu0 %v7522_v19  ;;  %v7637_v19 = vcombine.high %v3151_v60, %v3159_v61 }
 0x58f   :  { %6425 = vmatpush1.bf16.msra.mxu1 %v7524_v1  ;;  %6340 = vmatprep.subr.bf16.mxu0 %v7539_v18  ;;  %v3166_v1 = vld [vmem:[#allocation14 + $0xb20] sm:$0xff] }
 0x590   :  { %6426 = vmatprep.subr.bf16.mxu1 %v7541_v21  ;;  %v3174_v18 = vld [vmem:[#allocation14 + $0xb60] sm:$0xff]  ;;  %v3329_v21 = vrot.slane %v9181_v14, %v9070_v23 }
 0x592   :  { %6341 = vmatpush1.bf16.msra.mxu0 %v7538_v30  ;;  %v3341_v30 = vrot.slane %v9181_v14, %v9073_v24 }
 0x593   :  { %6427 = vmatpush1.bf16.msra.mxu1 %v7540_v34  ;;  %6353 = vmatprep.subr.bf16.mxu0 %v7555_v37  ;;  %v7634_v34 = vcombine.low %v3150_v36, %v3158_v16  ;;  %v7636_v37 = vcombine.low %v3151_v60, %v3159_v61  ;;  %v7685_v36 = vcombine.high %v3199_v59, %v3207_v2  ;;  %v3214_v16 = vld [vmem:[#allocation14 + $0xca0] sm:$0xff]  ;;  %v3215_v61 = vld [vmem:[#allocation14 + $0xca8] sm:$0xff] }
 0x594   :  { %6439 = vmatprep.subr.bf16.mxu1 %v7557_v38  ;;  %v7651_v38 = vcombine.high %v3166_v1, %v3174_v18  ;;  %v3222_v60 = vld [vmem:[#allocation14 + $0xce0] sm:$0xff] }
 0x595   :  { %6343 = vmatmul.mubr.bf16.vlgmr.msra.gmra.mrb[16].mxu0 %v9145_v44 }
 0x596   :  { %6429 = vmatmul.mubr.bf16.vlgmr.msra.gmra.mrb[16].mxu1 %v9145_v44  ;;  %6354 = vmatpush1.bf16.msra.mxu0 %v7554_v41  ;;  %v7653_v41 = vcombine.high %v3167_v26, %v3175_v12  ;;  %v3231_v26 = vld [vmem:[#allocation14 + $0xd28] sm:$0xff] }
 0x597   :  { %6385 = vmatprep.mubr.bf16.mxu0 %v9151_v48  ;;  %6440 = vmatpush1.bf16.msra.mxu1 %v7556_v43  ;;  %v3239_v12 = vld [vmem:[#allocation14 + $0xd68] sm:$0xff] }
 0x598   :  { %6471 = vmatprep.mubr.bf16.mxu1 %v9151_v48  ;;  %6355 = vmatprep.subr.bf16.mxu0 %v7571_v63 }
 0x599   :  { %6441 = vmatprep.subr.bf16.mxu1 %v7573_v27  ;;  %v3183_v27 = vld [vmem:[#allocation14 + $0xba8] sm:$0xff] }
 0x59a   :  { %6356 = vmatpush1.bf16.msra.mxu0 %v7570_v29 }
 0x59b   :  { %6442 = vmatpush1.bf16.msra.mxu1 %v7572_v47  ;;  %6357 = vmatprep.subr.bf16.mxu0 %v7587_v0 }
 0x59c   :  { %6443 = vmatprep.subr.bf16.mxu1 %v7589_v49  ;;  %v7650_v49 = vcombine.low %v3166_v1, %v3174_v18  ;;  %v3230_v18 = vld [vmem:[#allocation14 + $0xd20] sm:$0xff] }
 0x59e   :  { %6358 = vmatpush1.bf16.msra.mxu0 %v7586_v54  ;;  %v7667_v54 = vcombine.high %v3182_v42, %v3190_v13 }
 0x59f   :  { %6444 = vmatpush1.bf16.msra.mxu1 %v7588_v55  ;;  %6359 = vmatprep.subr.bf16.mxu0 %v7603_v56  ;;  %v7669_v56 = vcombine.high %v3183_v27, %v3191_v45 }
 0x5a0   :  { %6445 = vmatprep.subr.bf16.mxu1 %v7605_v57  ;;  %v3198_v57 = vld [vmem:[#allocation14 + $0xc20] sm:$0xff] }
 0x5a2   :  { %6360 = vmatpush1.bf16.msra.mxu0 %v7602_v31 }
 0x5a3   :  { %6446 = vmatpush1.bf16.msra.mxu1 %v7604_v32  ;;  %6361 = vmatprep.subr.bf16.mxu0 %v7619_v33  ;;  %v7666_v32 = vcombine.low %v3182_v42, %v3190_v13  ;;  %v7668_v33 = vcombine.low %v3183_v27, %v3191_v45  ;;  %v3254_v42 = vld [vmem:[#allocation14 + $0xde0] sm:$0xff] }
 0x5a4   :  { %6447 = vmatprep.subr.bf16.mxu1 %v7621_v35  ;;  %v7683_v35 = vcombine.high %v3198_v57, %v3206_v58 }
 0x5a6   :  { %6362 = vmatpush1.bf16.msra.mxu0 %v7618_v9  ;;  %v3223_v9 = vld [vmem:[#allocation14 + $0xce8] sm:$0xff] }
 0x5a7   :  { %6448 = vmatpush1.bf16.msra.mxu1 %v7620_v22  ;;  %6363 = vmatprep.subr.bf16.mxu0 %v7635_v17  ;;  %v7682_v22 = vcombine.low %v3198_v57, %v3206_v58  ;;  %v7684_v17 = vcombine.low %v3199_v59, %v3207_v2  ;;  %v7701_v1 = vcombine.high %v3215_v61, %v3223_v9  ;;  %v3271_v57 = vld [vmem:[#allocation14 + $0xe68] sm:$0xff] }
 0x5a8   :  { %v6043_v39 = vpop.f32.mrb[8].mxu0  ;;  %v6129_v40 = vpop.f32.mrb[8].mxu1  ;;  %6449 = vmatprep.subr.bf16.mxu1 %v7637_v19  ;;  %v7699_v19 = vcombine.high %v3214_v16, %v3222_v60 }
 0x5a9   :  { %v9191_v43 = vadd.f32 %v6043_v39, %v3329_v21  ;;  %v9193_v63 = vadd.f32 %v6129_v40, %v3337_v7  ;;  %v6045_v62 = vpop.f32.mrb[9].mxu0  ;;  %v6131_v11 = vpop.f32.mrb[9].mxu1  ;;  %v7717_v40 = vcombine.high %v3231_v26, %v3239_v12 }
 0x5aa   :  { %v9195_v46 = vadd.f32 %v6045_v62, %v3333_v28  ;;  %v9197_v29 = vadd.f32 %v6131_v11, %v3341_v30  ;;  %v6047_v47 = vpop.f32.mrb[10].mxu0  ;;  %v6133_v0 = vpop.f32.mrb[10].mxu1  ;;  %6364 = vmatpush1.bf16.msra.mxu0 %v7634_v34  ;;  %v3247_v62 = vld [vmem:[#allocation14 + $0xda8] sm:$0xff] }
 0x5ab   :  { %8442 = vtanh.f32 %v9191_v43  ;;  %v9200_v50 = vadd.f32 %v6047_v47, %v3329_v21  ;;  %6450 = vmatpush1.bf16.msra.mxu1 %v7636_v37  ;;  %v6049_v51 = vpop.f32.mrb[11].mxu0  ;;  %v6135_v52 = vpop.f32.mrb[11].mxu1  ;;  %6365 = vmatprep.subr.bf16.mxu0 %v7651_v38  ;;  %v9203_v55 = vadd.f32 %v6133_v0, %v3337_v7  ;;  %v3238_v21 = vld [vmem:[#allocation14 + $0xd60] sm:$0xff]  ;;  %v7700_v37 = vcombine.low %v3215_v61, %v3223_v9  ;;  %v3255_v11 = vld [vmem:[#allocation14 + $0xde8] sm:$0xff] }
 0x5ac   :  { %8444 = vtanh.f32 %v9193_v63  ;;  %6451 = vmatprep.subr.bf16.mxu1 %v7653_v41  ;;  %v9206_v3 = vadd.f32 %v6049_v51, %v3333_v28  ;;  %v9209_v31 = vadd.f32 %v6135_v52, %v3341_v30  ;;  %v7698_v30 = vcombine.low %v3214_v16, %v3222_v60  ;;  %v3246_v41 = vld [vmem:[#allocation14 + $0xda0] sm:$0xff]  ;;  %v3287_v16 = vld [vmem:[#allocation14 + $0xee8] sm:$0xff] }
 0x5ad   :  { %8446 = vtanh.f32 %v9195_v46  ;;  %v7715_v38 = vcombine.high %v3230_v18, %v3238_v21  ;;  %v7714_v45 = vcombine.low %v3230_v18, %v3238_v21  ;;  %v7716_v0 = vcombine.low %v3231_v26, %v3239_v12  ;;  %v3303_v18 = vld [vmem:[#allocation14 + $0xf68] sm:$0xff] }
 0x5ae   :  { %8448 = vtanh.f32 %v9197_v29  ;;  %6366 = vmatpush1.bf16.msra.mxu0 %v7650_v49  ;;  %v7731_v49 = vcombine.high %v3246_v41, %v3254_v42  ;;  %v7733_v52 = vcombine.high %v3247_v62, %v3255_v11  ;;  %v7730_v58 = vcombine.low %v3246_v41, %v3254_v42  ;;  %v2816_v42 = vld [vmem:[#allocation14 + $0x30] sm:$0xff] }
 0x5af   :  { %8450 = vtanh.f32 %v9200_v50  ;;  %6452 = vmatpush1.bf16.msra.mxu1 %v7652_v53  ;;  %6367 = vmatprep.subr.bf16.mxu0 %v7667_v54  ;;  %v3262_v53 = vld [vmem:[#allocation14 + $0xe20] sm:$0xff]  ;;  %v7732_v59 = vcombine.low %v3247_v62, %v3255_v11  ;;  %v2817_v62 = vld [vmem:[#allocation14 + $0x38] sm:$0xff] }
 0x5b0   :  { %8452 = vtanh.f32 %v9203_v55  ;;  %6453 = vmatprep.subr.bf16.mxu1 %v7669_v56  ;;  %v3270_v54 = vld [vmem:[#allocation14 + $0xe60] sm:$0xff]  ;;  %v3263_v56 = vld [vmem:[#allocation14 + $0xe28] sm:$0xff]  ;;  %v2825_v11 = vld [vmem:[#allocation14 + $0x78] sm:$0xff] }
 0x5b1   :  { %8454 = vtanh.f32 %v9206_v3  ;;  %v7747_v2 = vcombine.high %v3262_v53, %v3270_v54  ;;  %v7746_v60 = vcombine.low %v3262_v53, %v3270_v54  ;;  %v7748_v61 = vcombine.low %v3263_v56, %v3271_v57  ;;  %v2833_v53 = vld [vmem:[#allocation14 + $0xb8] sm:$0xff] }
 0x5b2   :  { %8456 = vtanh.f32 %v9209_v31  ;;  %6368 = vmatpush1.bf16.msra.mxu0 %v7666_v32  ;;  %v7749_v32 = vcombine.high %v3263_v56, %v3271_v57  ;;  %v2841_v54 = vld [vmem:[#allocation14 + $0xf8] sm:$0xff]  ;;  %v7304_v56 = vcombine.low %v2817_v62, %v2825_v11 }
 0x5b3   :  { %6454 = vmatpush1.bf16.msra.mxu1 %v7668_v33  ;;  %6369 = vmatprep.subr.bf16.mxu0 %v7683_v35  ;;  %v3278_v33 = vld [vmem:[#allocation14 + $0xea0] sm:$0xff] }
 0x5b4   :  { %6455 = vmatprep.subr.bf16.mxu1 %v7685_v36  ;;  %v3286_v35 = vld [vmem:[#allocation14 + $0xee0] sm:$0xff]  ;;  %v3279_v36 = vld [vmem:[#allocation14 + $0xea8] sm:$0xff] }
 0x5b5   :  { %v8443_v7 = vpop.eup %8442  ;;  %v7763_v9 = vcombine.high %v3278_v33, %v3286_v35  ;;  %v7762_v21 = vcombine.low %v3278_v33, %v3286_v35  ;;  %v2857_v33 = vld [vmem:[#allocation14 + $0x178] sm:$0xff] }
 0x5b6   :  { %v8445_v28 = vpop.eup %8444  ;;  %6893 = vst [vmem:[#allocation17] sm:$0xff] %v8443_v7  ;;  %6370 = vmatpush1.bf16.msra.mxu0 %v7682_v22  ;;  %v7765_v22 = vcombine.high %v3279_v36, %v3287_v16  ;;  %v7764_v7 = vcombine.low %v3279_v36, %v3287_v16  ;;  %v7320_v36 = vcombine.low %v2833_v53, %v2841_v54 }
 0x5b7   :  { %v8447_v34 = vpop.eup %8446  ;;  %6895 = vst [vmem:[#allocation17 + $0x10] sm:$0xff] %v8445_v28  ;;  %6456 = vmatpush1.bf16.msra.mxu1 %v7684_v17  ;;  %6371 = vmatprep.subr.bf16.mxu0 %v7699_v19  ;;  %v3294_v17 = vld [vmem:[#allocation14 + $0xf20] sm:$0xff] }
 0x5b8   :  { %v8449_v39 = vpop.eup %8448  ;;  %6894 = vst [vmem:[#allocation17 + $0x8] sm:$0xff] %v8447_v34  ;;  %6457 = vmatprep.subr.bf16.mxu1 %v7701_v1  ;;  %v3302_v19 = vld [vmem:[#allocation14 + $0xf60] sm:$0xff]  ;;  %v3295_v1 = vld [vmem:[#allocation14 + $0xf28] sm:$0xff] }
 0x5b9   :  { %v8451_v13 = vpop.eup %8450  ;;  %6896 = vst [vmem:[#allocation17 + $0x18] sm:$0xff] %v8449_v39  ;;  %v7779_v26 = vcombine.high %v3294_v17, %v3302_v19  ;;  %v7781_v12 = vcombine.high %v3295_v1, %v3303_v18  ;;  %v3310_v28 = vld [vmem:[#allocation14 + $0xfa0] sm:$0xff]  ;;  %v3311_v34 = vld [vmem:[#allocation14 + $0xfa8] sm:$0xff]  ;;  %v7780_v39 = vcombine.low %v3295_v1, %v3303_v18 }
 0x5ba   :  { %v8453_v27 = vpop.eup %8452  ;;  %6909 = vst [vmem:[#allocation17 + $0x80] sm:$0xff] %v8451_v13  ;;  %6372 = vmatpush1.bf16.msra.mxu0 %v7698_v30  ;;  %v3318_v30 = vld [vmem:[#allocation14 + $0xfe0] sm:$0xff]  ;;  %v2824_v13 = vld [vmem:[#allocation14 + $0x70] sm:$0xff] }
 0x5bb   :  { %v8455_v47 = vpop.eup %8454  ;;  %6911 = vst [vmem:[#allocation17 + $0x90] sm:$0xff] %v8453_v27  ;;  %6458 = vmatpush1.bf16.msra.mxu1 %v7700_v37  ;;  %6373 = vmatprep.subr.bf16.mxu0 %v7715_v38  ;;  %v3319_v37 = vld [vmem:[#allocation14 + $0xfe8] sm:$0xff]  ;;  %v7778_v38 = vcombine.low %v3294_v17, %v3302_v19  ;;  %v7794_v27 = vcombine.low %v3310_v28, %v3318_v30  ;;  %v2873_v17 = vld [vmem:[#allocation14 + $0x1f8] sm:$0xff] }
 0x5bc   :  { %v8457_v51 = vpop.eup %8456  ;;  %6910 = vst [vmem:[#allocation17 + $0x88] sm:$0xff] %v8455_v47  ;;  %6459 = vmatprep.subr.bf16.mxu1 %v7717_v40  ;;  %v7795_v40 = vcombine.high %v3310_v28, %v3318_v30  ;;  %v7797_v41 = vcombine.high %v3311_v34, %v3319_v37  ;;  %v7303_v47 = vcombine.high %v2816_v42, %v2824_v13  ;;  %v2889_v28 = vld [vmem:[#allocation14 + $0x278] sm:$0xff] }
 0x5bd   :  { %6912 = vst [vmem:[#allocation17 + $0x98] sm:$0xff] %v8457_v51  ;;  %v2840_v51 = vld [vmem:[#allocation14 + $0xf0] sm:$0xff] }
 0x5be   :  { %6374 = vmatpush1.bf16.msra.mxu0 %v7714_v45  ;;  %v7796_v45 = vcombine.low %v3311_v34, %v3319_v37 }
 0x5bf   :  { %6460 = vmatpush1.bf16.msra.mxu1 %v7716_v0  ;;  %6375 = vmatprep.subr.bf16.mxu0 %v7731_v49  ;;  %v7305_v0 = vcombine.high %v2817_v62, %v2825_v11  ;;  %v2832_v49 = vld [vmem:[#allocation14 + $0xb0] sm:$0xff] }
 0x5c0   :  { %6461 = vmatprep.subr.bf16.mxu1 %v7733_v52  ;;  %v7302_v52 = vcombine.low %v2816_v42, %v2824_v13  ;;  %v7319_v57 = vcombine.high %v2832_v49, %v2840_v51  ;;  %v7318_v35 = vcombine.low %v2832_v49, %v2840_v51 }
 0x5c2   :  { %6376 = vmatpush1.bf16.msra.mxu0 %v7730_v58  ;;  %v2848_v58 = vld [vmem:[#allocation14 + $0x130] sm:$0xff] }
 0x5c3   :  { %6462 = vmatpush1.bf16.msra.mxu1 %v7732_v59  ;;  %6377 = vmatprep.subr.bf16.mxu0 %v7747_v2  ;;  %v2856_v59 = vld [vmem:[#allocation14 + $0x170] sm:$0xff]  ;;  %v7321_v2 = vcombine.high %v2833_v53, %v2841_v54 }
 0x5c4   :  { %6463 = vmatprep.subr.bf16.mxu1 %v7749_v32  ;;  %v2849_v32 = vld [vmem:[#allocation14 + $0x138] sm:$0xff]  ;;  %v7335_v16 = vcombine.high %v2848_v58, %v2856_v59  ;;  %v7334_v19 = vcombine.low %v2848_v58, %v2856_v59  ;;  %v2928_v54 = vld [vmem:[#allocation14 + $0x3b0] sm:$0xff] }
 0x5c5   :  { %v7336_v1 = vcombine.low %v2849_v32, %v2857_v33  ;;  %v2937_v58 = vld [vmem:[#allocation14 + $0x3f8] sm:$0xff] }
 0x5c6   :  { %6378 = vmatpush1.bf16.msra.mxu0 %v7746_v60  ;;  %v7337_v60 = vcombine.high %v2849_v32, %v2857_v33 }
 0x5c7   :  { %6464 = vmatpush1.bf16.msra.mxu1 %v7748_v61  ;;  %6379 = vmatprep.subr.bf16.mxu0 %v7763_v9  ;;  %v2864_v61 = vld [vmem:[#allocation14 + $0x1b0] sm:$0xff] }
 0x5c8   :  { %6465 = vmatprep.subr.bf16.mxu1 %v7765_v22  ;;  %v2872_v9 = vld [vmem:[#allocation14 + $0x1f0] sm:$0xff]  ;;  %v2865_v22 = vld [vmem:[#allocation14 + $0x1b8] sm:$0xff] }
 0x5c9   :  { %v7351_v18 = vcombine.high %v2864_v61, %v2872_v9  ;;  %v7352_v30 = vcombine.low %v2865_v22, %v2873_v17 }
 0x5ca   :  { %6380 = vmatpush1.bf16.msra.mxu0 %v7762_v21  ;;  %v7353_v21 = vcombine.high %v2865_v22, %v2873_v17 }
 0x5cb   :  { %6466 = vmatpush1.bf16.msra.mxu1 %v7764_v7  ;;  %6381 = vmatprep.subr.bf16.mxu0 %v7779_v26  ;;  %v2880_v7 = vld [vmem:[#allocation14 + $0x230] sm:$0xff] }
 0x5cc   :  { %6467 = vmatprep.subr.bf16.mxu1 %v7781_v12  ;;  %v2888_v26 = vld [vmem:[#allocation14 + $0x270] sm:$0xff]  ;;  %v2881_v12 = vld [vmem:[#allocation14 + $0x238] sm:$0xff] }
 0x5cd   :  { %v7367_v34 = vcombine.high %v2880_v7, %v2888_v26  ;;  %v7369_v37 = vcombine.high %v2881_v12, %v2889_v28  ;;  %v7366_v42 = vcombine.low %v2880_v7, %v2888_v26  ;;  %v7368_v13 = vcombine.low %v2881_v12, %v2889_v28 }
 0x5ce   :  { %6382 = vmatpush1.bf16.msra.mxu0 %v7778_v38  ;;  %v2896_v38 = vld [vmem:[#allocation14 + $0x2b0] sm:$0xff] }
 0x5cf   :  { %6468 = vmatpush1.bf16.msra.mxu1 %v7780_v39  ;;  %6383 = vmatprep.subr.bf16.mxu0 %v7795_v40  ;;  %v2904_v39 = vld [vmem:[#allocation14 + $0x2f0] sm:$0xff]  ;;  %v2897_v40 = vld [vmem:[#allocation14 + $0x2b8] sm:$0xff] }
 0x5d0   :  { %6469 = vmatprep.subr.bf16.mxu1 %v7797_v41  ;;  %v2905_v41 = vld [vmem:[#allocation14 + $0x2f8] sm:$0xff]  ;;  %v7383_v62 = vcombine.high %v2896_v38, %v2904_v39  ;;  %v7382_v49 = vcombine.low %v2896_v38, %v2904_v39 }
 0x5d1   :  { %v7385_v11 = vcombine.high %v2897_v40, %v2905_v41  ;;  %v7384_v51 = vcombine.low %v2897_v40, %v2905_v41 }
 0x5d2   :  { %6384 = vmatpush1.bf16.msra.mxu0 %v7794_v27  ;;  %v2912_v27 = vld [vmem:[#allocation14 + $0x330] sm:$0xff] }
 0x5d3   :  { %6470 = vmatpush1.bf16.msra.mxu1 %v7796_v45  ;;  %6482 = vmatprep.subr.bf16.mxu0 %v7303_v47  ;;  %v2920_v45 = vld [vmem:[#allocation14 + $0x370] sm:$0xff]  ;;  %v2913_v47 = vld [vmem:[#allocation14 + $0x338] sm:$0xff] }
 0x5d4   :  { %6568 = vmatprep.subr.bf16.mxu1 %v7305_v0  ;;  %v2921_v0 = vld [vmem:[#allocation14 + $0x378] sm:$0xff]  ;;  %v7398_v59 = vcombine.low %v2912_v27, %v2920_v45 }
 0x5d5   :  { %6386 = vmatmul.mubr.bf16.vlgmr.msra.gmra.mrb[16].mxu0 %v9147_v4  ;;  %v7401_v53 = vcombine.high %v2913_v47, %v2921_v0 }
 0x5d6   :  { %6472 = vmatmul.mubr.bf16.vlgmr.msra.gmra.mrb[16].mxu1 %v9147_v4  ;;  %6483 = vmatpush1.bf16.msra.mxu0 %v7302_v52  ;;  %v7399_v52 = vcombine.high %v2912_v27, %v2920_v45 }
 0x5d7   :  { %6514 = vmatprep.mubr.bf16.mxu0 %v9149_v20  ;;  %6569 = vmatpush1.bf16.msra.mxu1 %v7304_v56  ;;  %v2936_v56 = vld [vmem:[#allocation14 + $0x3f0] sm:$0xff] }
 0x5d8   :  { %6600 = vmatprep.mubr.bf16.mxu1 %v9149_v20  ;;  %6484 = vmatprep.subr.bf16.mxu0 %v7319_v57  ;;  %v7350_v20 = vcombine.low %v2864_v61, %v2872_v9  ;;  %v2929_v57 = vld [vmem:[#allocation14 + $0x3b8] sm:$0xff]  ;;  %v7415_v32 = vcombine.high %v2928_v54, %v2936_v56  ;;  %v7414_v61 = vcombine.low %v2928_v54, %v2936_v56 }
 0x5d9   :  { %6570 = vmatprep.subr.bf16.mxu1 %v7321_v2  ;;  %v7400_v2 = vcombine.low %v2913_v47, %v2921_v0  ;;  %v7417_v33 = vcombine.high %v2929_v57, %v2937_v58  ;;  %v7416_v9 = vcombine.low %v2929_v57, %v2937_v58 }
 0x5da   :  { %6485 = vmatpush1.bf16.msra.mxu0 %v7318_v35  ;;  %v2944_v35 = vld [vmem:[#allocation14 + $0x430] sm:$0xff] }
 0x5db   :  { %6571 = vmatpush1.bf16.msra.mxu1 %v7320_v36  ;;  %6486 = vmatprep.subr.bf16.mxu0 %v7335_v16  ;;  %v2952_v36 = vld [vmem:[#allocation14 + $0x470] sm:$0xff]  ;;  %v2945_v16 = vld [vmem:[#allocation14 + $0x438] sm:$0xff] }
 0x5dc   :  { %6572 = vmatprep.subr.bf16.mxu1 %v7337_v60  ;;  %v2953_v60 = vld [vmem:[#allocation14 + $0x478] sm:$0xff]  ;;  %v7431_v22 = vcombine.high %v2944_v35, %v2952_v36  ;;  %v7430_v7 = vcombine.low %v2944_v35, %v2952_v36 }
 0x5dd   :  { %v7433_v17 = vcombine.high %v2945_v16, %v2953_v60  ;;  %v7432_v26 = vcombine.low %v2945_v16, %v2953_v60 }
 0x5de   :  { %6487 = vmatpush1.bf16.msra.mxu0 %v7334_v19  ;;  %v2960_v19 = vld [vmem:[#allocation14 + $0x4b0] sm:$0xff] }
 0x5df   :  { %6573 = vmatpush1.bf16.msra.mxu1 %v7336_v1  ;;  %6488 = vmatprep.subr.bf16.mxu0 %v7351_v18  ;;  %v2968_v1 = vld [vmem:[#allocation14 + $0x4f0] sm:$0xff]  ;;  %v2961_v18 = vld [vmem:[#allocation14 + $0x4b8] sm:$0xff] }
 0x5e0   :  { %6574 = vmatprep.subr.bf16.mxu1 %v7353_v21  ;;  %v2969_v21 = vld [vmem:[#allocation14 + $0x4f8] sm:$0xff]  ;;  %v7447_v12 = vcombine.high %v2960_v19, %v2968_v1  ;;  %v7446_v38 = vcombine.low %v2960_v19, %v2968_v1 }
 0x5e1   :  { %v7449_v28 = vcombine.high %v2961_v18, %v2969_v21  ;;  %v7448_v39 = vcombine.low %v2961_v18, %v2969_v21 }
 0x5e2   :  { %6489 = vmatpush1.bf16.msra.mxu0 %v7350_v20  ;;  %v2976_v20 = vld [vmem:[#allocation14 + $0x530] sm:$0xff] }
 0x5e3   :  { %6575 = vmatpush1.bf16.msra.mxu1 %v7352_v30  ;;  %6490 = vmatprep.subr.bf16.mxu0 %v7367_v34  ;;  %v2984_v30 = vld [vmem:[#allocation14 + $0x570] sm:$0xff]  ;;  %v2977_v34 = vld [vmem:[#allocation14 + $0x538] sm:$0xff] }
 0x5e4   :  { %6576 = vmatprep.subr.bf16.mxu1 %v7369_v37  ;;  %v2985_v37 = vld [vmem:[#allocation14 + $0x578] sm:$0xff]  ;;  %v7463_v40 = vcombine.high %v2976_v20, %v2984_v30  ;;  %v7462_v27 = vcombine.low %v2976_v20, %v2984_v30 }
 0x5e5   :  { %v7465_v41 = vcombine.high %v2977_v34, %v2985_v37  ;;  %v7464_v45 = vcombine.low %v2977_v34, %v2985_v37 }
 0x5e6   :  { %6491 = vmatpush1.bf16.msra.mxu0 %v7366_v42  ;;  %v2992_v42 = vld [vmem:[#allocation14 + $0x5b0] sm:$0xff] }
 0x5e7   :  { %6577 = vmatpush1.bf16.msra.mxu1 %v7368_v13  ;;  %6492 = vmatprep.subr.bf16.mxu0 %v7383_v62  ;;  %v3000_v13 = vld [vmem:[#allocation14 + $0x5f0] sm:$0xff]  ;;  %v2993_v62 = vld [vmem:[#allocation14 + $0x5b8] sm:$0xff] }
 0x5e8   :  { %6578 = vmatprep.subr.bf16.mxu1 %v7385_v11  ;;  %v3001_v11 = vld [vmem:[#allocation14 + $0x5f8] sm:$0xff]  ;;  %v7479_v47 = vcombine.high %v2992_v42, %v3000_v13  ;;  %v7478_v54 = vcombine.low %v2992_v42, %v3000_v13 }
 0x5e9   :  { %v7481_v0 = vcombine.high %v2993_v62, %v3001_v11  ;;  %v7480_v56 = vcombine.low %v2993_v62, %v3001_v11 }
 0x5ea   :  { %6493 = vmatpush1.bf16.msra.mxu0 %v7382_v49  ;;  %v3008_v49 = vld [vmem:[#allocation14 + $0x630] sm:$0xff] }
 0x5eb   :  { %6579 = vmatpush1.bf16.msra.mxu1 %v7384_v51  ;;  %6494 = vmatprep.subr.bf16.mxu0 %v7399_v52  ;;  %v3016_v51 = vld [vmem:[#allocation14 + $0x670] sm:$0xff]  ;;  %v3009_v52 = vld [vmem:[#allocation14 + $0x638] sm:$0xff] }
 0x5ec   :  { %6580 = vmatprep.subr.bf16.mxu1 %v7401_v53  ;;  %v3017_v53 = vld [vmem:[#allocation14 + $0x678] sm:$0xff]  ;;  %v7495_v57 = vcombine.high %v3008_v49, %v3016_v51  ;;  %v7494_v35 = vcombine.low %v3008_v49, %v3016_v51 }
 0x5ed   :  { %v7497_v58 = vcombine.high %v3009_v52, %v3017_v53  ;;  %v7496_v36 = vcombine.low %v3009_v52, %v3017_v53  ;;  %v3097_v49 = vld [vmem:[#allocation14 + $0x8f8] sm:$0xff]  ;;  %v3104_v53 = vld [vmem:[#allocation14 + $0x930] sm:$0xff] }
 0x5ee   :  { %6495 = vmatpush1.bf16.msra.mxu0 %v7398_v59  ;;  %v3024_v59 = vld [vmem:[#allocation14 + $0x6b0] sm:$0xff] }
 0x5ef   :  { %6581 = vmatpush1.bf16.msra.mxu1 %v7400_v2  ;;  %6496 = vmatprep.subr.bf16.mxu0 %v7415_v32  ;;  %v3032_v2 = vld [vmem:[#allocation14 + $0x6f0] sm:$0xff]  ;;  %v3025_v32 = vld [vmem:[#allocation14 + $0x6b8] sm:$0xff] }
 0x5f0   :  { %6582 = vmatprep.subr.bf16.mxu1 %v7417_v33  ;;  %v3033_v33 = vld [vmem:[#allocation14 + $0x6f8] sm:$0xff]  ;;  %v7511_v16 = vcombine.high %v3024_v59, %v3032_v2  ;;  %v7510_v19 = vcombine.low %v3024_v59, %v3032_v2 }
 0x5f1   :  { %v7513_v60 = vcombine.high %v3025_v32, %v3033_v33  ;;  %v7512_v1 = vcombine.low %v3025_v32, %v3033_v33 }
 0x5f2   :  { %6497 = vmatpush1.bf16.msra.mxu0 %v7414_v61  ;;  %v3040_v61 = vld [vmem:[#allocation14 + $0x730] sm:$0xff] }
 0x5f3   :  { %6583 = vmatpush1.bf16.msra.mxu1 %v7416_v9  ;;  %6498 = vmatprep.subr.bf16.mxu0 %v7431_v22  ;;  %v3048_v9 = vld [vmem:[#allocation14 + $0x770] sm:$0xff]  ;;  %v3041_v22 = vld [vmem:[#allocation14 + $0x738] sm:$0xff] }
 0x5f4   :  { %6584 = vmatprep.subr.bf16.mxu1 %v7433_v17  ;;  %v3049_v17 = vld [vmem:[#allocation14 + $0x778] sm:$0xff]  ;;  %v7527_v18 = vcombine.high %v3040_v61, %v3048_v9  ;;  %v7526_v20 = vcombine.low %v3040_v61, %v3048_v9 }
 0x5f5   :  { %v7529_v21 = vcombine.high %v3041_v22, %v3049_v17  ;;  %v7528_v30 = vcombine.low %v3041_v22, %v3049_v17  ;;  %v3136_v17 = vld [vmem:[#allocation14 + $0xa30] sm:$0xff] }
 0x5f6   :  { %6499 = vmatpush1.bf16.msra.mxu0 %v7430_v7  ;;  %v3056_v7 = vld [vmem:[#allocation14 + $0x7b0] sm:$0xff] }
 0x5f7   :  { %6585 = vmatpush1.bf16.msra.mxu1 %v7432_v26  ;;  %6500 = vmatprep.subr.bf16.mxu0 %v7447_v12  ;;  %v3064_v26 = vld [vmem:[#allocation14 + $0x7f0] sm:$0xff]  ;;  %v3057_v12 = vld [vmem:[#allocation14 + $0x7b8] sm:$0xff] }
 0x5f8   :  { %6586 = vmatprep.subr.bf16.mxu1 %v7449_v28  ;;  %v3065_v28 = vld [vmem:[#allocation14 + $0x7f8] sm:$0xff]  ;;  %v7543_v34 = vcombine.high %v3056_v7, %v3064_v26  ;;  %v7542_v42 = vcombine.low %v3056_v7, %v3064_v26 }
 0x5f9   :  { %v7545_v37 = vcombine.high %v3057_v12, %v3065_v28  ;;  %v7544_v13 = vcombine.low %v3057_v12, %v3065_v28  ;;  %v3152_v12 = vld [vmem:[#allocation14 + $0xab0] sm:$0xff] }
 0x5fa   :  { %6501 = vmatpush1.bf16.msra.mxu0 %v7446_v38  ;;  %v3072_v38 = vld [vmem:[#allocation14 + $0x830] sm:$0xff] }
 0x5fb   :  { %6587 = vmatpush1.bf16.msra.mxu1 %v7448_v39  ;;  %6502 = vmatprep.subr.bf16.mxu0 %v7463_v40  ;;  %v3080_v39 = vld [vmem:[#allocation14 + $0x870] sm:$0xff]  ;;  %v3073_v40 = vld [vmem:[#allocation14 + $0x838] sm:$0xff] }
 0x5fc   :  { %6588 = vmatprep.subr.bf16.mxu1 %v7465_v41  ;;  %v3081_v41 = vld [vmem:[#allocation14 + $0x878] sm:$0xff]  ;;  %v7559_v62 = vcombine.high %v3072_v38, %v3080_v39  ;;  %v3160_v28 = vld [vmem:[#allocation14 + $0xaf0] sm:$0xff] }
 0x5fd   :  { %v7561_v11 = vcombine.high %v3073_v40, %v3081_v41  ;;  %v7560_v51 = vcombine.low %v3073_v40, %v3081_v41  ;;  %v7639_v40 = vcombine.high %v3152_v12, %v3160_v28 }
 0x5fe   :  { %6503 = vmatpush1.bf16.msra.mxu0 %v7462_v27  ;;  %v3088_v27 = vld [vmem:[#allocation14 + $0x8b0] sm:$0xff] }
 0x5ff   :  { %6589 = vmatpush1.bf16.msra.mxu1 %v7464_v45  ;;  %6504 = vmatprep.subr.bf16.mxu0 %v7479_v47  ;;  %v3096_v45 = vld [vmem:[#allocation14 + $0x8f0] sm:$0xff]  ;;  %v7558_v47 = vcombine.low %v3072_v38, %v3080_v39  ;;  %v3356_v39 = vsub.s32 7, %v9061_v8 }
 0x600   :  { %6590 = vmatprep.subr.bf16.mxu1 %v7481_v0  ;;  %v3089_v0 = vld [vmem:[#allocation14 + $0x8b8] sm:$0xff]  ;;  %v7575_v52 = vcombine.high %v3088_v27, %v3096_v45  ;;  %v7574_v59 = vcombine.low %v3088_v27, %v3096_v45 }
 0x601   :  { %v7576_v2 = vcombine.low %v3089_v0, %v3097_v49  ;;  %v3177_v27 = vld [vmem:[#allocation14 + $0xb78] sm:$0xff] }
 0x602   :  { %6505 = vmatpush1.bf16.msra.mxu0 %v7478_v54  ;;  %v3112_v54 = vld [vmem:[#allocation14 + $0x970] sm:$0xff] }
 0x603   :  { %6591 = vmatpush1.bf16.msra.mxu1 %v7480_v56  ;;  %6506 = vmatprep.subr.bf16.mxu0 %v7495_v57  ;;  %v7577_v56 = vcombine.high %v3089_v0, %v3097_v49  ;;  %v3105_v57 = vld [vmem:[#allocation14 + $0x938] sm:$0xff]  ;;  %v7591_v32 = vcombine.high %v3104_v53, %v3112_v54  ;;  %v7590_v61 = vcombine.low %v3104_v53, %v3112_v54 }
 0x604   :  { %6592 = vmatprep.subr.bf16.mxu1 %v7497_v58  ;;  %v3113_v58 = vld [vmem:[#allocation14 + $0x978] sm:$0xff]  ;;  %v7638_v0 = vcombine.low %v3152_v12, %v3160_v28  ;;  %v3357_v49 = vrot.slane %v9181_v14, %v3356_v39 }
 0x605   :  { %v7593_v33 = vcombine.high %v3105_v57, %v3113_v58  ;;  %v3201_v12 = vld [vmem:[#allocation14 + $0xc38] sm:$0xff] }
 0x606   :  { %6507 = vmatpush1.bf16.msra.mxu0 %v7494_v35  ;;  %v3120_v35 = vld [vmem:[#allocation14 + $0x9b0] sm:$0xff]  ;;  %v3209_v28 = vld [vmem:[#allocation14 + $0xc78] sm:$0xff] }
 0x607   :  { %6593 = vmatpush1.bf16.msra.mxu1 %v7496_v36  ;;  %6508 = vmatprep.subr.bf16.mxu0 %v7511_v16  ;;  %v3128_v36 = vld [vmem:[#allocation14 + $0x9f0] sm:$0xff]  ;;  %v3121_v16 = vld [vmem:[#allocation14 + $0x9b8] sm:$0xff] }
 0x608   :  { %6594 = vmatprep.subr.bf16.mxu1 %v7513_v60  ;;  %v3129_v60 = vld [vmem:[#allocation14 + $0x9f8] sm:$0xff]  ;;  %v7607_v9 = vcombine.high %v3120_v35, %v3128_v36 }
 0x609   :  { %v7609_v22 = vcombine.high %v3121_v16, %v3129_v60 }
 0x60a   :  { %6509 = vmatpush1.bf16.msra.mxu0 %v7510_v19  ;;  %v3144_v19 = vld [vmem:[#allocation14 + $0xa70] sm:$0xff] }
 0x60b   :  { %6595 = vmatpush1.bf16.msra.mxu1 %v7512_v1  ;;  %6510 = vmatprep.subr.bf16.mxu0 %v7527_v18  ;;  %v3137_v1 = vld [vmem:[#allocation14 + $0xa38] sm:$0xff]  ;;  %v7623_v7 = vcombine.high %v3136_v17, %v3144_v19 }
 0x60c   :  { %6596 = vmatprep.subr.bf16.mxu1 %v7529_v21  ;;  %v3145_v18 = vld [vmem:[#allocation14 + $0xa78] sm:$0xff]  ;;  %v7608_v21 = vcombine.low %v3121_v16, %v3129_v60 }
 0x60d   :  { %v7625_v26 = vcombine.high %v3137_v1, %v3145_v18  ;;  %v7624_v38 = vcombine.low %v3137_v1, %v3145_v18 }
 0x60e   :  { %6511 = vmatpush1.bf16.msra.mxu0 %v7526_v20  ;;  %v3153_v20 = vld [vmem:[#allocation14 + $0xab8] sm:$0xff] }
 0x60f   :  { %6597 = vmatpush1.bf16.msra.mxu1 %v7528_v30  ;;  %6512 = vmatprep.subr.bf16.mxu0 %v7543_v34  ;;  %v3161_v30 = vld [vmem:[#allocation14 + $0xaf8] sm:$0xff]  ;;  %v7622_v34 = vcombine.low %v3136_v17, %v3144_v19 }
 0x610   :  { %6598 = vmatprep.subr.bf16.mxu1 %v7545_v37  ;;  %v3352_v37 = vsub.s32 6, %v9061_v8  ;;  %v7641_v41 = vcombine.high %v3153_v20, %v3161_v30 }
 0x612   :  { %6513 = vmatpush1.bf16.msra.mxu0 %v7542_v42  ;;  %v3168_v42 = vld [vmem:[#allocation14 + $0xb30] sm:$0xff]  ;;  %v3353_v45 = vrot.slane %v9181_v14, %v3352_v37 }
 0x613   :  { %6599 = vmatpush1.bf16.msra.mxu1 %v7544_v13  ;;  %6525 = vmatprep.subr.bf16.mxu0 %v7559_v62  ;;  %v3176_v13 = vld [vmem:[#allocation14 + $0xb70] sm:$0xff]  ;;  %v3345_v62 = vrot.slane %v9181_v14, %v9079_v10 }
 0x614   :  { %6611 = vmatprep.subr.bf16.mxu1 %v7561_v11  ;;  %v3169_v11 = vld [vmem:[#allocation14 + $0xb38] sm:$0xff]  ;;  %v7654_v60 = vcombine.low %v3168_v42, %v3176_v13 }
 0x615   :  { %6515 = vmatmul.mubr.bf16.vlgmr.msra.gmra.mrb[20].mxu0 %v9145_v44  ;;  %v7657_v54 = vcombine.high %v3169_v11, %v3177_v27 }
 0x616   :  { %6601 = vmatmul.mubr.bf16.vlgmr.msra.gmra.mrb[20].mxu1 %v9145_v44  ;;  %6526 = vmatpush1.bf16.msra.mxu0 %v7558_v47  ;;  %v7592_v44 = vcombine.low %v3105_v57, %v3113_v58  ;;  %v3349_v47 = vrot.slane %v9181_v14, %v9076_v25  ;;  %v3192_v57 = vld [vmem:[#allocation14 + $0xbf0] sm:$0xff] }
 0x617   :  { %6557 = vmatprep.mubr.bf16.mxu0 %v9151_v48  ;;  %6612 = vmatpush1.bf16.msra.mxu1 %v7560_v51  ;;  %v7640_v51 = vcombine.low %v3153_v20, %v3161_v30 }
 0x618   :  { %6643 = vmatprep.mubr.bf16.mxu1 %v9151_v48  ;;  %6527 = vmatprep.subr.bf16.mxu0 %v7575_v52  ;;  %v7606_v48 = vcombine.low %v3120_v35, %v3128_v36  ;;  %v7655_v52 = vcombine.high %v3168_v42, %v3176_v13  ;;  %v3224_v42 = vld [vmem:[#allocation14 + $0xcf0] sm:$0xff]  ;;  %v3217_v13 = vld [vmem:[#allocation14 + $0xcb8] sm:$0xff] }
 0x619   :  { %6613 = vmatprep.subr.bf16.mxu1 %v7577_v56  ;;  %v3184_v56 = vld [vmem:[#allocation14 + $0xbb0] sm:$0xff] }
 0x61a   :  { %6528 = vmatpush1.bf16.msra.mxu0 %v7574_v59  ;;  %v7671_v19 = vcombine.high %v3184_v56, %v3192_v57  ;;  %v7670_v30 = vcombine.low %v3184_v56, %v3192_v57 }
 0x61b   :  { %6614 = vmatpush1.bf16.msra.mxu1 %v7576_v2  ;;  %6529 = vmatprep.subr.bf16.mxu0 %v7591_v32  ;;  %v3185_v32 = vld [vmem:[#allocation14 + $0xbb8] sm:$0xff] }
 0x61c   :  { %6615 = vmatprep.subr.bf16.mxu1 %v7593_v33  ;;  %v3193_v33 = vld [vmem:[#allocation14 + $0xbf8] sm:$0xff] }
 0x61e   :  { %6530 = vmatpush1.bf16.msra.mxu0 %v7590_v61  ;;  %v7656_v61 = vcombine.low %v3169_v11, %v3177_v27  ;;  %v7688_v27 = vcombine.low %v3201_v12, %v3209_v28 }
 0x61f   :  { %6616 = vmatpush1.bf16.msra.mxu1 %v7592_v44  ;;  %6531 = vmatprep.subr.bf16.mxu0 %v7607_v9 }
 0x620   :  { %6617 = vmatprep.subr.bf16.mxu1 %v7609_v22 }
 0x622   :  { %6532 = vmatpush1.bf16.msra.mxu0 %v7606_v48  ;;  %v7673_v48 = vcombine.high %v3185_v32, %v3193_v33 }
 0x623   :  { %6618 = vmatpush1.bf16.msra.mxu1 %v7608_v21  ;;  %6533 = vmatprep.subr.bf16.mxu0 %v7623_v7  ;;  %v3200_v21 = vld [vmem:[#allocation14 + $0xc30] sm:$0xff] }
 0x624   :  { %6619 = vmatprep.subr.bf16.mxu1 %v7625_v26  ;;  %v3208_v7 = vld [vmem:[#allocation14 + $0xc70] sm:$0xff] }
 0x625   :  { %v7686_v11 = vcombine.low %v3200_v21, %v3208_v7 }
 0x626   :  { %6534 = vmatpush1.bf16.msra.mxu0 %v7622_v34  ;;  %v7672_v34 = vcombine.low %v3185_v32, %v3193_v33 }
 0x627   :  { %6620 = vmatpush1.bf16.msra.mxu1 %v7624_v38  ;;  %6535 = vmatprep.subr.bf16.mxu0 %v7639_v40  ;;  %v7687_v38 = vcombine.high %v3200_v21, %v3208_v7  ;;  %v7689_v40 = vcombine.high %v3201_v12, %v3209_v28  ;;  %v3264_v28 = vld [vmem:[#allocation14 + $0xe30] sm:$0xff] }
 0x628   :  { %v6215_v53 = vpop.f32.mrb[12].mxu0  ;;  %6621 = vmatprep.subr.bf16.mxu1 %v7641_v41  ;;  %v3216_v41 = vld [vmem:[#allocation14 + $0xcb0] sm:$0xff] }
 0x629   :  { %v9235_v58 = vadd.f32 %v6215_v53, %v3345_v62  ;;  %v6301_v59 = vpop.f32.mrb[12].mxu1  ;;  %v6217_v2 = vpop.f32.mrb[13].mxu0  ;;  %v3241_v53 = vld [vmem:[#allocation14 + $0xd78] sm:$0xff]  ;;  %v7702_v56 = vcombine.low %v3216_v41, %v3224_v42 }
 0x62a   :  { %v9237_v35 = vadd.f32 %v6301_v59, %v3353_v45  ;;  %v9239_v36 = vadd.f32 %v6217_v2, %v3349_v47  ;;  %v6303_v16 = vpop.f32.mrb[13].mxu1  ;;  %v6219_v14 = vpop.f32.mrb[14].mxu0  ;;  %6536 = vmatpush1.bf16.msra.mxu0 %v7638_v0  ;;  %v3232_v0 = vld [vmem:[#allocation14 + $0xd30] sm:$0xff] }
 0x62b   :  { %8458 = vtanh.f32 %v9235_v58  ;;  %v9242_v44 = vadd.f32 %v6303_v16, %v3357_v49  ;;  %v9244_v9 = vadd.f32 %v6219_v14, %v3345_v62  ;;  %v6305_v22 = vpop.f32.mrb[14].mxu1  ;;  %6622 = vmatpush1.bf16.msra.mxu1 %v7640_v51  ;;  %v6221_v17 = vpop.f32.mrb[15].mxu0  ;;  %6537 = vmatprep.subr.bf16.mxu0 %v7655_v52  ;;  %v3225_v62 = vld [vmem:[#allocation14 + $0xcf8] sm:$0xff]  ;;  %v3248_v16 = vld [vmem:[#allocation14 + $0xdb0] sm:$0xff] }
 0x62c   :  { %8460 = vtanh.f32 %v9237_v35  ;;  %v9247_v1 = vadd.f32 %v6305_v22, %v3353_v45  ;;  %v6307_v18 = vpop.f32.mrb[15].mxu1  ;;  %6623 = vmatprep.subr.bf16.mxu1 %v7657_v54  ;;  %v9250_v26 = vadd.f32 %v6221_v17, %v3349_v47  ;;  %v7703_v45 = vcombine.high %v3216_v41, %v3224_v42  ;;  %v3233_v52 = vld [vmem:[#allocation14 + $0xd38] sm:$0xff]  ;;  %v3256_v14 = vld [vmem:[#allocation14 + $0xdf0] sm:$0xff] }
 0x62d   :  { %8462 = vtanh.f32 %v9239_v36  ;;  %v9253_v20 = vadd.f32 %v6307_v18, %v3357_v49  ;;  %v7705_v47 = vcombine.high %v3217_v13, %v3225_v62  ;;  %v3240_v49 = vld [vmem:[#allocation14 + $0xd70] sm:$0xff]  ;;  %v7704_v59 = vcombine.low %v3217_v13, %v3225_v62  ;;  %v3257_v22 = vld [vmem:[#allocation14 + $0xdf8] sm:$0xff] }
 0x62e   :  { %8464 = vtanh.f32 %v9242_v44  ;;  %6538 = vmatpush1.bf16.msra.mxu0 %v7654_v60  ;;  %v7719_v2 = vcombine.high %v3232_v0, %v3240_v49  ;;  %v7721_v33 = vcombine.high %v3233_v52, %v3241_v53  ;;  %v7735_v21 = vcombine.high %v3248_v16, %v3256_v14  ;;  %v3280_v62 = vld [vmem:[#allocation14 + $0xeb0] sm:$0xff] }
 0x62f   :  { %8466 = vtanh.f32 %v9244_v9  ;;  %6624 = vmatpush1.bf16.msra.mxu1 %v7656_v61  ;;  %6539 = vmatprep.subr.bf16.mxu0 %v7671_v19  ;;  %v3249_v61 = vld [vmem:[#allocation14 + $0xdb8] sm:$0xff]  ;;  %v7718_v19 = vcombine.low %v3232_v0, %v3240_v49 }
 0x630   :  { %8468 = vtanh.f32 %v9247_v1  ;;  %6625 = vmatprep.subr.bf16.mxu1 %v7673_v48  ;;  %v7720_v48 = vcombine.low %v3233_v52, %v3241_v53  ;;  %v7737_v12 = vcombine.high %v3249_v61, %v3257_v22  ;;  %v7736_v41 = vcombine.low %v3249_v61, %v3257_v22  ;;  %v3296_v52 = vld [vmem:[#allocation14 + $0xf30] sm:$0xff] }
 0x631   :  { %8470 = vtanh.f32 %v9250_v26  ;;  %v3304_v53 = vld [vmem:[#allocation14 + $0xf70] sm:$0xff] }
 0x632   :  { %8472 = vtanh.f32 %v9253_v20  ;;  %6540 = vmatpush1.bf16.msra.mxu0 %v7670_v30  ;;  %v3272_v30 = vld [vmem:[#allocation14 + $0xe70] sm:$0xff]  ;;  %v7782_v61 = vcombine.low %v3296_v52, %v3304_v53 }
 0x633   :  { %6626 = vmatpush1.bf16.msra.mxu1 %v7672_v34  ;;  %6541 = vmatprep.subr.bf16.mxu0 %v7687_v38  ;;  %v3265_v34 = vld [vmem:[#allocation14 + $0xe38] sm:$0xff]  ;;  %v7751_v42 = vcombine.high %v3264_v28, %v3272_v30 }
 0x634   :  { %6627 = vmatprep.subr.bf16.mxu1 %v7689_v40  ;;  %v3273_v38 = vld [vmem:[#allocation14 + $0xe78] sm:$0xff]  ;;  %v7734_v40 = vcombine.low %v3248_v16, %v3256_v14  ;;  %v3320_v16 = vld [vmem:[#allocation14 + $0xff0] sm:$0xff] }
 0x635   :  { %v8459_v51 = vpop.eup %8458  ;;  %v7753_v13 = vcombine.high %v3265_v34, %v3273_v38  ;;  %v7752_v0 = vcombine.low %v3265_v34, %v3273_v38  ;;  %v3313_v14 = vld [vmem:[#allocation14 + $0xfb8] sm:$0xff] }
 0x636   :  { %v8461_v54 = vpop.eup %8460  ;;  %6897 = vst [vmem:[#allocation17 + $0x20] sm:$0xff] %v8459_v51  ;;  %6542 = vmatpush1.bf16.msra.mxu0 %v7686_v11  ;;  %v3288_v11 = vld [vmem:[#allocation14 + $0xef0] sm:$0xff] }
 0x637   :  { %v8463_v57 = vpop.eup %8462  ;;  %6899 = vst [vmem:[#allocation17 + $0x30] sm:$0xff] %v8461_v54  ;;  %6628 = vmatpush1.bf16.msra.mxu1 %v7688_v27  ;;  %6543 = vmatprep.subr.bf16.mxu0 %v7703_v45  ;;  %v3281_v27 = vld [vmem:[#allocation14 + $0xeb8] sm:$0xff]  ;;  %v7767_v49 = vcombine.high %v3280_v62, %v3288_v11 }
 0x638   :  { %v8465_v32 = vpop.eup %8464  ;;  %6898 = vst [vmem:[#allocation17 + $0x28] sm:$0xff] %v8463_v57  ;;  %6629 = vmatprep.subr.bf16.mxu1 %v7705_v47  ;;  %v3289_v45 = vld [vmem:[#allocation14 + $0xef8] sm:$0xff]  ;;  %v7750_v47 = vcombine.low %v3264_v28, %v3272_v30  ;;  %v7766_v57 = vcombine.low %v3280_v62, %v3288_v11 }
 0x639   :  { %v8467_v60 = vpop.eup %8466  ;;  %6900 = vst [vmem:[#allocation17 + $0x38] sm:$0xff] %v8465_v32  ;;  %v7769_v51 = vcombine.high %v3281_v27, %v3289_v45  ;;  %v3297_v54 = vld [vmem:[#allocation14 + $0xf38] sm:$0xff] }
 0x63a   :  { %v8469_v17 = vpop.eup %8468  ;;  %6913 = vst [vmem:[#allocation17 + $0xa0] sm:$0xff] %v8467_v60  ;;  %6544 = vmatpush1.bf16.msra.mxu0 %v7702_v56  ;;  %v3305_v56 = vld [vmem:[#allocation14 + $0xf78] sm:$0xff] }
 0x63b   :  { %v8471_v18 = vpop.eup %8470  ;;  %6915 = vst [vmem:[#allocation17 + $0xb0] sm:$0xff] %v8469_v17  ;;  %6630 = vmatpush1.bf16.msra.mxu1 %v7704_v59  ;;  %6545 = vmatprep.subr.bf16.mxu0 %v7719_v2  ;;  %v7768_v59 = vcombine.low %v3281_v27, %v3289_v45  ;;  %v7783_v2 = vcombine.high %v3296_v52, %v3304_v53  ;;  %v3321_v60 = vld [vmem:[#allocation14 + $0xff8] sm:$0xff] }
 0x63c   :  { %v8473_v7 = vpop.eup %8472  ;;  %6914 = vst [vmem:[#allocation17 + $0xa8] sm:$0xff] %v8471_v18  ;;  %6631 = vmatprep.subr.bf16.mxu1 %v7721_v33  ;;  %v7785_v32 = vcombine.high %v3297_v54, %v3305_v56  ;;  %v3312_v33 = vld [vmem:[#allocation14 + $0xfb0] sm:$0xff]  ;;  %v7784_v22 = vcombine.low %v3297_v54, %v3305_v56 }
 0x63d   :  { %6916 = vst [vmem:[#allocation17 + $0xb8] sm:$0xff] %v8473_v7  ;;  %v7799_v17 = vcombine.high %v3312_v33, %v3320_v16  ;;  %v7798_v18 = vcombine.low %v3312_v33, %v3320_v16  ;;  %v6672_v33 = vmax.f32 %v9206_v3, %v9209_v31 }
 0x63e   :  { %6546 = vmatpush1.bf16.msra.mxu0 %v7718_v19  ;;  %v7801_v19 = vcombine.high %v3313_v14, %v3321_v60 }
 0x63f   :  { %6632 = vmatpush1.bf16.msra.mxu1 %v7720_v48  ;;  %6547 = vmatprep.subr.bf16.mxu0 %v7735_v21  ;;  %v7800_v48 = vcombine.low %v3313_v14, %v3321_v60  ;;  %v9261_v21 = vld [vmem:[#allocation16 + $0x8] sm:$0xff] }
 0x640   :  { %6633 = vmatprep.subr.bf16.mxu1 %v7737_v12  ;;  %v3361_v7 = vrot.slane %v9261_v21, %v9070_v23  ;;  %v3369_v12 = vrot.slane %v9261_v21, %v9067_v6  ;;  %v3365_v28 = vrot.slane %v9261_v21, %v9064_v5  ;;  %v3373_v30 = vrot.slane %v9261_v21, %v9073_v24 }
 0x642   :  { %6548 = vmatpush1.bf16.msra.mxu0 %v7734_v40 }
 0x643   :  { %6634 = vmatpush1.bf16.msra.mxu1 %v7736_v41  ;;  %6549 = vmatprep.subr.bf16.mxu0 %v7751_v42 }
 0x644   :  { %6635 = vmatprep.subr.bf16.mxu1 %v7753_v13 }
 0x646   :  { %6550 = vmatpush1.bf16.msra.mxu0 %v7750_v47 }
 0x647   :  { %6636 = vmatpush1.bf16.msra.mxu1 %v7752_v0  ;;  %6551 = vmatprep.subr.bf16.mxu0 %v7767_v49 }
 0x648   :  { %6637 = vmatprep.subr.bf16.mxu1 %v7769_v51 }
 0x64a   :  { %6552 = vmatpush1.bf16.msra.mxu0 %v7766_v57 }
 0x64b   :  { %6638 = vmatpush1.bf16.msra.mxu1 %v7768_v59  ;;  %6553 = vmatprep.subr.bf16.mxu0 %v7783_v2  ;;  %v6654_v59 = vmax.f32 %v9191_v43, %v9193_v63  ;;  %v6655_v2 = vmax.f32 %v9195_v46, %v9197_v29 }
 0x64c   :  { %6639 = vmatprep.subr.bf16.mxu1 %v7785_v32  ;;  %v6671_v32 = vmax.f32 %v9200_v50, %v9203_v55 }
 0x64d   :  { %v6656_v16 = vmax.f32 %v6654_v59, %v9235_v58  ;;  %v6657_v14 = vmax.f32 %v6655_v2, %v9239_v36 }
 0x64e   :  { %6554 = vmatpush1.bf16.msra.mxu0 %v7782_v61  ;;  %v6673_v60 = vmax.f32 %v6671_v32, %v9244_v9  ;;  %v6674_v61 = vmax.f32 %v6672_v33, %v9250_v26 }
 0x64f   :  { %6640 = vmatpush1.bf16.msra.mxu1 %v7784_v22  ;;  %6555 = vmatprep.subr.bf16.mxu0 %v7799_v17  ;;  %v6658_v22 = vmax.f32 %v6656_v16, %v9237_v35  ;;  %v6659_v17 = vmax.f32 %v6657_v14, %v9242_v44 }
 0x650   :  { %6641 = vmatprep.subr.bf16.mxu1 %v7801_v19  ;;  %v6675_v19 = vmax.f32 %v6673_v60, %v9247_v1 }
 0x652   :  { %6556 = vmatpush1.bf16.msra.mxu0 %v7798_v18  ;;  %v6676_v18 = vmax.f32 %v6674_v61, %v9253_v20 }
 0x653   :  { %6642 = vmatpush1.bf16.msra.mxu1 %v7800_v48 }
 0x655   :  { %6558 = vmatmul.mubr.bf16.vlgmr.msra.gmra.mrb[20].mxu0 %v9147_v4 }
 0x656   :  { %6644 = vmatmul.mubr.bf16.vlgmr.msra.gmra.mrb[20].mxu1 %v9147_v4 }
 0x6a8   :  { %v6387_v34 = vpop.f32.mrb[16].mxu0 }
 0x6a9   :  { %v9271_v38 = vadd.f32 %v6387_v34, %v3361_v7  ;;  %v6473_v40 = vpop.f32.mrb[16].mxu1  ;;  %v6389_v41 = vpop.f32.mrb[17].mxu0  ;;  %v3385_v34 = vrot.slane %v9261_v21, %v3352_v37 }
 0x6aa   :  { %v9273_v4 = vadd.f32 %v6473_v40, %v3369_v12  ;;  %v9275_v42 = vadd.f32 %v6389_v41, %v3365_v28  ;;  %v6475_v13 = vpop.f32.mrb[17].mxu1  ;;  %v6391_v23 = vpop.f32.mrb[18].mxu0  ;;  %v3381_v40 = vrot.slane %v9261_v21, %v9076_v25  ;;  %v3389_v41 = vrot.slane %v9261_v21, %v3356_v39 }
 0x6ab   :  { %8474 = vtanh.f32 %v9271_v38  ;;  %v9278_v6 = vadd.f32 %v6475_v13, %v3373_v30  ;;  %v9280_v62 = vadd.f32 %v6391_v23, %v3361_v7  ;;  %v6477_v5 = vpop.f32.mrb[18].mxu1  ;;  %v6393_v11 = vpop.f32.mrb[19].mxu0  ;;  %v6660_v48 = vmax.f32 %v6658_v22, %v9271_v38 }
 0x6ac   :  { %8476 = vtanh.f32 %v9273_v4  ;;  %v9283_v24 = vadd.f32 %v6477_v5, %v3369_v12  ;;  %v6479_v27 = vpop.f32.mrb[19].mxu1  ;;  %v9286_v45 = vadd.f32 %v6393_v11, %v3365_v28  ;;  %v6661_v7 = vmax.f32 %v6659_v17, %v9275_v42 }
 0x6ad   :  { %8478 = vtanh.f32 %v9275_v42  ;;  %v9289_v47 = vadd.f32 %v6479_v27, %v3373_v30  ;;  %v3377_v12 = vrot.slane %v9261_v21, %v9079_v10  ;;  %v6677_v28 = vmax.f32 %v6675_v19, %v9280_v62 }
 0x6ae   :  { %8480 = vtanh.f32 %v9278_v6  ;;  %v6678_v30 = vmax.f32 %v6676_v18, %v9286_v45  ;;  %v6662_v23 = vmax.f32 %v6660_v48, %v9273_v4  ;;  %v6663_v10 = vmax.f32 %v6661_v7, %v9278_v6 }
 0x6af   :  { %8482 = vtanh.f32 %v9280_v62 }
 0x6b0   :  { %8484 = vtanh.f32 %v9283_v24  ;;  %v6680_v37 = vmax.f32 %v6678_v30, %v9289_v47 }
 0x6b1   :  { %8486 = vtanh.f32 %v9286_v45 }
 0x6b2   :  { %8488 = vtanh.f32 %v9289_v47 }
 0x6b5   :  { %v8475_v0 = vpop.eup %8474 }
 0x6b6   :  { %v8477_v49 = vpop.eup %8476  ;;  %6901 = vst [vmem:[#allocation17 + $0x40] sm:$0xff] %v8475_v0  ;;  %v6679_v0 = vmax.f32 %v6677_v28, %v9283_v24 }
 0x6b7   :  { %v8479_v51 = vpop.eup %8478  ;;  %6903 = vst [vmem:[#allocation17 + $0x50] sm:$0xff] %v8477_v49 }
 0x6b8   :  { %v8481_v52 = vpop.eup %8480  ;;  %6902 = vst [vmem:[#allocation17 + $0x48] sm:$0xff] %v8479_v51 }
 0x6b9   :  { %v8483_v53 = vpop.eup %8482  ;;  %6904 = vst [vmem:[#allocation17 + $0x58] sm:$0xff] %v8481_v52 }
 0x6ba   :  { %v8485_v54 = vpop.eup %8484  ;;  %6917 = vst [vmem:[#allocation17 + $0xc0] sm:$0xff] %v8483_v53 }
 0x6bb   :  { %v8487_v56 = vpop.eup %8486  ;;  %6919 = vst [vmem:[#allocation17 + $0xd0] sm:$0xff] %v8485_v54 }
 0x6bc   :  { %v8489_v57 = vpop.eup %8488  ;;  %6918 = vst [vmem:[#allocation17 + $0xc8] sm:$0xff] %v8487_v56 }
 0x6bd   :  { %6920 = vst [vmem:[#allocation17 + $0xd8] sm:$0xff] %v8489_v57 }
 0x728   :  { %v6559_v13 = vpop.f32.mrb[20].mxu0 }
 0x729   :  { %v9327_v5 = vadd.f32 %v6559_v13, %v3377_v12  ;;  %v6645_v11 = vpop.f32.mrb[20].mxu1  ;;  %v6561_v27 = vpop.f32.mrb[21].mxu0 }
 0x72a   :  { %v9331_v49 = vadd.f32 %v6645_v11, %v3385_v34  ;;  %v9333_v25 = vadd.f32 %v6561_v27, %v3381_v40  ;;  %v6647_v8 = vpop.f32.mrb[21].mxu1  ;;  %v6563_v51 = vpop.f32.mrb[22].mxu0 }
 0x72b   :  { %v6664_v39 = vmax.f32 %v6662_v23, %v9327_v5  ;;  %8490 = vtanh.f32 %v9327_v5  ;;  %v9337_v21 = vadd.f32 %v6647_v8, %v3389_v41  ;;  %v9339_v52 = vadd.f32 %v6563_v51, %v3377_v12  ;;  %v6649_v53 = vpop.f32.mrb[22].mxu1  ;;  %v6565_v54 = vpop.f32.mrb[23].mxu0 }
 0x72c   :  { %8492 = vtanh.f32 %v9331_v49  ;;  %v6665_v56 = vmax.f32 %v6663_v10, %v9333_v25  ;;  %v9343_v57 = vadd.f32 %v6649_v53, %v3385_v34  ;;  %v9345_v59 = vadd.f32 %v6565_v54, %v3381_v40  ;;  %v6651_v2 = vpop.f32.mrb[23].mxu1 }
 0x72d   :  { %8494 = vtanh.f32 %v9333_v25  ;;  %v6681_v32 = vmax.f32 %v6679_v0, %v9339_v52  ;;  %v6666_v33 = vmax.f32 %v6664_v39, %v9331_v49  ;;  %v9352_v14 = vadd.f32 %v6651_v2, %v3389_v41 }
 0x72e   :  { %8496 = vtanh.f32 %v9337_v21  ;;  %v6682_v16 = vmax.f32 %v6680_v37, %v9345_v59  ;;  %v6667_v60 = vmax.f32 %v6665_v56, %v9337_v21  ;;  %v9362_v41 = vand.u32 127, %v236_v15 }
 0x72f   :  { %8498 = vtanh.f32 %v9339_v52  ;;  %v6683_v61 = vmax.f32 %v6681_v32, %v9343_v57 }
 0x730   :  { %8500 = vtanh.f32 %v9343_v57  ;;  %v6668_v22 = vmax.f32 %v6666_v33, %v6667_v60  ;;  %v6684_v17 = vmax.f32 %v6682_v16, %v9352_v14  ;;  %v9368_v23 = vadd.s32 128, %v9362_v41 }
 0x731   :  { %8502 = vtanh.f32 %v9345_v59  ;;  %v9371_v10 = vadd.s32 256, %v9362_v41  ;;  %v9376_v27 = vadd.s32 384, %v9362_v41  ;;  %v9379_v0 = vadd.s32 512, %v9362_v41 }
 0x732   :  { %8504 = vtanh.f32 %v9352_v14  ;;  %6669 = vmax.xlane.f32.xlu0 %v6668_v22  ;;  %v6685_v19 = vmax.f32 %v6683_v61, %v6684_v17  ;;  %v9382_v15 = vadd.s32 640, %v9362_v41  ;;  %v9385_v37 = vadd.s32 768, %v9362_v41 }
 0x733   :  { %v9397_v8 = vadd.s32 896, %v9362_v41  ;;  %v9400_v51 = vadd.s32 1024, %v9362_v41  ;;  %v9403_v39 = vadd.s32 1152, %v9362_v41  ;;  %v9418_v53 = vadd.s32 1792, %v9362_v41 }
 0x734   :  { %6686 = vmax.xlane.f32.xlu1 %v6685_v19  ;;  %v9425_v33 = vadd.s32 1920, %v9362_v41 }
 0x735   :  { %v8491_v18 = vpop.eup %8490 }
 0x736   :  { %v8493_v48 = vpop.eup %8492  ;;  %6905 = vst [vmem:[#allocation17 + $0x60] sm:$0xff] %v8491_v18 }
 0x737   :  { %v8495_v7 = vpop.eup %8494  ;;  %6907 = vst [vmem:[#allocation17 + $0x70] sm:$0xff] %v8493_v48 }
 0x738   :  { %v8497_v12 = vpop.eup %8496  ;;  %6906 = vst [vmem:[#allocation17 + $0x68] sm:$0xff] %v8495_v7 }
 0x739   :  { %v8499_v28 = vpop.eup %8498  ;;  %6908 = vst [vmem:[#allocation17 + $0x78] sm:$0xff] %v8497_v12 }
 0x73a   :  { %v8501_v30 = vpop.eup %8500  ;;  %6921 = vst [vmem:[#allocation17 + $0xe0] sm:$0xff] %v8499_v28 }
 0x73b   :  { %v8503_v34 = vpop.eup %8502  ;;  %6923 = vst [vmem:[#allocation17 + $0xf0] sm:$0xff] %v8501_v30 }
 0x73c   :  { %v8505_v40 = vpop.eup %8504  ;;  %6922 = vst [vmem:[#allocation17 + $0xe8] sm:$0xff] %v8503_v34 }
 0x73d   :  { %6924 = vst [vmem:[#allocation17 + $0xf8] sm:$0xff] %v8505_v40 }
 0x7bf   :  { %v9364_v13 = vpop.xlane.xlu0 %6669 }
 0x7c0   :  { %6925 = vst [vmem:[#allocation18] sm:$0xff] %v9364_v13  ;;  %vm6705_vm0 = vcmp.eq.f32.partialorder %v9191_v43, %v9364_v13  ;;  %vm6706_vm1 = vcmp.eq.f32.partialorder %v9195_v46, %v9364_v13  ;;  %vm6707_vm2 = vcmp.eq.f32.partialorder %v9193_v63, %v9364_v13  ;;  %vm6708_vm3 = vcmp.eq.f32.partialorder %v9197_v29, %v9364_v13 }
 0x7c1   :  { %v9373_v11 = vpop.xlane.xlu1 %6686  ;;  %v9406_v43 = vadd.s32 1280, %v9362_v41  ;;  %v9409_v46 = vadd.s32 1408, %v9362_v41  ;;  %v9412_v63 = vadd.s32 1536, %v9362_v41  ;;  %v9415_v29 = vadd.s32 1664, %v9362_v41 }
 0x7c2   :  { %6926 = vst [vmem:[#allocation18 + $0x8] sm:$0xff] %v9373_v11  ;;  %v6737_v54 = vsel %vm6705_vm0, %v9362_v41, 2048  ;;  %v6738_v56 = vsel %vm6706_vm1, %v9368_v23, 2048  ;;  %v6739_v2 = vsel %vm6707_vm2, %v9371_v10, 2048  ;;  %v6740_v32 = vsel %vm6708_vm3, %v9376_v27, 2048 }
 0x7c3   :  { %vm6709_vm4 = vcmp.eq.f32.partialorder %v9235_v58, %v9364_v13  ;;  %vm6710_vm5 = vcmp.eq.f32.partialorder %v9239_v36, %v9364_v13  ;;  %vm6711_vm6 = vcmp.eq.f32.partialorder %v9237_v35, %v9364_v13  ;;  %vm6712_vm7 = vcmp.eq.f32.partialorder %v9242_v44, %v9364_v13 }
 0x7c4   :  { %vm6713_vm8 = vcmp.eq.f32.partialorder %v9271_v38, %v9364_v13  ;;  %vm6714_vm9 = vcmp.eq.f32.partialorder %v9275_v42, %v9364_v13  ;;  %vm6715_vm10 = vcmp.eq.f32.partialorder %v9273_v4, %v9364_v13  ;;  %vm6716_vm11 = vcmp.eq.f32.partialorder %v9278_v6, %v9364_v13 }
 0x7c5   :  { %vm6717_vm12 = vcmp.eq.f32.partialorder %v9327_v5, %v9364_v13  ;;  %vm6769_vm13 = vcmp.lt.s32.totalorder %v6737_v54, %v6739_v2  ;;  %vm6771_vm14 = vcmp.lt.s32.totalorder %v6738_v56, %v6740_v32  ;;  %v6741_v58 = vsel %vm6709_vm4, %v9379_v0, 2048 }
 0x7c6   :  { %v6742_v36 = vsel %vm6710_vm5, %v9382_v15, 2048  ;;  %v6770_v16 = vsel %vm6769_vm13, %v6737_v54, %v6739_v2  ;;  %v6772_v60 = vsel %vm6771_vm14, %v6738_v56, %v6740_v32  ;;  %vm6718_vm15 = vcmp.eq.f32.partialorder %v9333_v25, %v9364_v13 }
 0x7c7   :  { %vm6719_vm0 = vcmp.eq.f32.partialorder %v9331_v49, %v9364_v13  ;;  %vm6773_vm1 = vcmp.lt.s32.totalorder %v6770_v16, %v6741_v58  ;;  %vm6775_vm2 = vcmp.lt.s32.totalorder %v6772_v60, %v6742_v36  ;;  %v6743_v61 = vsel %vm6711_vm6, %v9385_v37, 2048 }
 0x7c8   :  { %v6744_v22 = vsel %vm6712_vm7, %v9397_v8, 2048  ;;  %v6774_v17 = vsel %vm6773_vm1, %v6770_v16, %v6741_v58  ;;  %v6776_v19 = vsel %vm6775_vm2, %v6772_v60, %v6742_v36  ;;  %vm6720_vm3 = vcmp.eq.f32.partialorder %v9337_v21, %v9364_v13 }
 0x7c9   :  { %v6745_v18 = vsel %vm6713_vm8, %v9400_v51, 2048  ;;  %vm6777_vm4 = vcmp.lt.s32.totalorder %v6774_v17, %v6743_v61  ;;  %vm6779_vm5 = vcmp.lt.s32.totalorder %v6776_v19, %v6744_v22  ;;  %v6746_v35 = vsel %vm6714_vm9, %v9403_v39, 2048 }
 0x7ca   :  { %v6747_v44 = vsel %vm6715_vm10, %v9406_v43, 2048  ;;  %v6778_v48 = vsel %vm6777_vm4, %v6774_v17, %v6743_v61  ;;  %v6780_v7 = vsel %vm6779_vm5, %v6776_v19, %v6744_v22  ;;  %v6748_v38 = vsel %vm6716_vm11, %v9409_v46, 2048 }
 0x7cb   :  { %v6749_v12 = vsel %vm6717_vm12, %v9412_v63, 2048  ;;  %vm6781_vm6 = vcmp.lt.s32.totalorder %v6778_v48, %v6745_v18  ;;  %vm6783_vm7 = vcmp.lt.s32.totalorder %v6780_v7, %v6746_v35  ;;  %v6750_v4 = vsel %vm6718_vm15, %v9415_v29, 2048 }
 0x7cc   :  { %v6751_v42 = vsel %vm6719_vm0, %v9418_v53, 2048  ;;  %v6782_v28 = vsel %vm6781_vm6, %v6778_v48, %v6745_v18  ;;  %v6784_v6 = vsel %vm6783_vm7, %v6780_v7, %v6746_v35  ;;  %vm6721_vm10 = vcmp.eq.f32.partialorder %v9200_v50, %v9373_v11 }
 0x7cd   :  { %vm6785_vm8 = vcmp.lt.s32.totalorder %v6782_v28, %v6747_v44  ;;  %vm6787_vm9 = vcmp.lt.s32.totalorder %v6784_v6, %v6748_v38  ;;  %vm6722_vm11 = vcmp.eq.f32.partialorder %v9206_v3, %v9373_v11  ;;  %vm6723_vm12 = vcmp.eq.f32.partialorder %v9203_v55, %v9373_v11 }
 0x7ce   :  { %v6786_v5 = vsel %vm6785_vm8, %v6782_v28, %v6747_v44  ;;  %v6788_v30 = vsel %vm6787_vm9, %v6784_v6, %v6748_v38  ;;  %vm6724_vm13 = vcmp.eq.f32.partialorder %v9209_v31, %v9373_v11  ;;  %v6752_v49 = vsel %vm6720_vm3, %v9425_v33, 2048 }
 0x7cf   :  { %vm6789_vm14 = vcmp.lt.s32.totalorder %v6786_v5, %v6749_v12  ;;  %vm6791_vm15 = vcmp.lt.s32.totalorder %v6788_v30, %v6750_v4  ;;  %vm6725_vm0 = vcmp.eq.f32.partialorder %v9244_v9, %v9373_v11  ;;  %v6753_v25 = vsel %vm6721_vm10, %v9362_v41, 2048 }
 0x7d0   :  { %v6790_v50 = vsel %vm6789_vm14, %v6786_v5, %v6749_v12  ;;  %v6792_v3 = vsel %vm6791_vm15, %v6788_v30, %v6750_v4  ;;  %v6754_v34 = vsel %vm6722_vm11, %v9368_v23, 2048  ;;  %v6755_v55 = vsel %vm6723_vm12, %v9371_v10, 2048 }
 0x7d1   :  { %vm6793_vm1 = vcmp.lt.s32.totalorder %v6790_v50, %v6751_v42  ;;  %vm6795_vm2 = vcmp.lt.s32.totalorder %v6792_v3, %v6752_v49  ;;  %v6756_v31 = vsel %vm6724_vm13, %v9376_v27, 2048  ;;  %vm6726_vm3 = vcmp.eq.f32.partialorder %v9250_v26, %v9373_v11 }
 0x7d2   :  { %v6794_v40 = vsel %vm6793_vm1, %v6790_v50, %v6751_v42  ;;  %v6796_v21 = vsel %vm6795_vm2, %v6792_v3, %v6752_v49  ;;  %vm6727_vm5 = vcmp.eq.f32.partialorder %v9247_v1, %v9373_v11  ;;  %vm6728_vm6 = vcmp.eq.f32.partialorder %v9253_v20, %v9373_v11 }
 0x7d3   :  { %vm6797_vm4 = vcmp.lt.s32.totalorder %v6794_v40, %v6796_v21  ;;  %vm6729_vm7 = vcmp.eq.f32.partialorder %v9280_v62, %v9373_v11  ;;  %v6757_v13 = vsel %vm6725_vm0, %v9379_v0, 2048  ;;  %vm6813_vm8 = vcmp.lt.s32.totalorder %v6753_v25, %v6755_v55 }
 0x7d4   :  { %v6798_v41 = vsel %vm6797_vm4, %v6794_v40, %v6796_v21  ;;  %vm6815_vm9 = vcmp.lt.s32.totalorder %v6754_v34, %v6756_v31  ;;  %v6758_v26 = vsel %vm6726_vm3, %v9382_v15, 2048  ;;  %v6814_v10 = vsel %vm6813_vm8, %v6753_v25, %v6755_v55 }
 0x7d5   :  { %v6800_v23 = vshra.s32 %v6798_v41, 16  ;;  %v6816_v27 = vsel %vm6815_vm9, %v6754_v34, %v6756_v31  ;;  %vm6730_vm10 = vcmp.eq.f32.partialorder %v9286_v45, %v9373_v11  ;;  %v6759_v1 = vsel %vm6727_vm5, %v9385_v37, 2048 }
 0x7d6   :  { %vm6817_vm11 = vcmp.lt.s32.totalorder %v6814_v10, %v6757_v13  ;;  %vm6819_vm12 = vcmp.lt.s32.totalorder %v6816_v27, %v6758_v26  ;;  %v6760_v54 = vsel %vm6728_vm6, %v9397_v8, 2048  ;;  %vm6731_vm13 = vcmp.eq.f32.partialorder %v9283_v24, %v9373_v11 }
 0x7d7   :  { %v6802_v20 = vcvt.s32.f32 %v6800_v23  ;;  %v6818_v56 = vsel %vm6817_vm11, %v6814_v10, %v6757_v13  ;;  %v6820_v9 = vsel %vm6819_vm12, %v6816_v27, %v6758_v26  ;;  %vm6732_vm14 = vcmp.eq.f32.partialorder %v9289_v47, %v9373_v11 }
 0x7d8   :  { %vm6821_vm15 = vcmp.lt.s32.totalorder %v6818_v56, %v6759_v1  ;;  %vm6823_vm0 = vcmp.lt.s32.totalorder %v6820_v9, %v6760_v54  ;;  %v6761_v45 = vsel %vm6729_vm7, %v9400_v51, 2048  ;;  %v6762_v0 = vsel %vm6730_vm10, %v9403_v39, 2048 }
 0x7d9   :  { %6803 = vmin.xlane.f32.xlu0 %v6802_v20  ;;  %v6822_v15 = vsel %vm6821_vm15, %v6818_v56, %v6759_v1  ;;  %v6824_v37 = vsel %vm6823_vm0, %v6820_v9, %v6760_v54  ;;  %vm6733_vm1 = vcmp.eq.f32.partialorder %v9339_v52, %v9373_v11  ;;  %vm6734_vm2 = vcmp.eq.f32.partialorder %v9345_v59, %v9373_v11 }
 0x7da   :  { %vm6825_vm3 = vcmp.lt.s32.totalorder %v6822_v15, %v6761_v45  ;;  %vm6827_vm4 = vcmp.lt.s32.totalorder %v6824_v37, %v6762_v0  ;;  %v6763_v24 = vsel %vm6731_vm13, %v9406_v43, 2048  ;;  %v6764_v47 = vsel %vm6732_vm14, %v9409_v46, 2048 }
 0x7db   :  { %v6826_v8 = vsel %vm6825_vm3, %v6822_v15, %v6761_v45  ;;  %v6828_v2 = vsel %vm6827_vm4, %v6824_v37, %v6762_v0  ;;  %vm6735_vm5 = vcmp.eq.f32.partialorder %v9343_v57, %v9373_v11  ;;  %vm6736_vm6 = vcmp.eq.f32.partialorder %v9352_v14, %v9373_v11 }
 0x7dc   :  { %vm6829_vm7 = vcmp.lt.s32.totalorder %v6826_v8, %v6763_v24  ;;  %vm6831_vm8 = vcmp.lt.s32.totalorder %v6828_v2, %v6764_v47  ;;  %v6765_v62 = vsel %vm6733_vm1, %v9412_v63, 2048  ;;  %v6766_v52 = vsel %vm6734_vm2, %v9415_v29, 2048 }
 0x7dd   :  { %v6830_v59 = vsel %vm6829_vm7, %v6826_v8, %v6763_v24  ;;  %v6832_v51 = vsel %vm6831_vm8, %v6828_v2, %v6764_v47  ;;  %v6767_v39 = vsel %vm6735_vm5, %v9418_v53, 2048  ;;  %v6768_v43 = vsel %vm6736_vm6, %v9425_v33, 2048 }
 0x7de   :  { %vm6833_vm9 = vcmp.lt.s32.totalorder %v6830_v59, %v6765_v62  ;;  %vm6835_vm10 = vcmp.lt.s32.totalorder %v6832_v51, %v6766_v52  ;;  %v6799_v29 = vand.u32 65535, %v6798_v41 }
 0x7df   :  { %v6834_v46 = vsel %vm6833_vm9, %v6830_v59, %v6765_v62  ;;  %v6836_v32 = vsel %vm6835_vm10, %v6832_v51, %v6766_v52 }
 0x7e0   :  { %vm6837_vm11 = vcmp.lt.s32.totalorder %v6834_v46, %v6767_v39  ;;  %vm6839_vm12 = vcmp.lt.s32.totalorder %v6836_v32, %v6768_v43  ;;  %v6801_v16 = vcvt.s32.f32 %v6799_v29 }
 0x7e1   :  { %v6838_v57 = vsel %vm6837_vm11, %v6834_v46, %v6767_v39  ;;  %v6840_v14 = vsel %vm6839_vm12, %v6836_v32, %v6768_v43 }
 0x7e2   :  { %vm6841_vm13 = vcmp.lt.s32.totalorder %v6838_v57, %v6840_v14 }
 0x7e3   :  { %v6842_v11 = vsel %vm6841_vm13, %v6838_v57, %v6840_v14 }
 0x7e4   :  { %v6844_v58 = vshra.s32 %v6842_v11, 16  ;;  %v6843_v53 = vand.u32 65535, %v6842_v11 }
 0x7e6   :  { %v6846_v63 = vcvt.s32.f32 %v6844_v58  ;;  %v6845_v33 = vcvt.s32.f32 %v6843_v53 }
 0x7e8   :  { %6847 = vmin.xlane.f32.xlu1 %v6846_v63 }
 0x866   :  { %v6804_v36 = vpop.xlane.xlu0 %6803 }
 0x867   :  { %vm6805_vm14 = vcmp.eq.f32.partialorder %v6802_v20, %v6804_v36 }
 0x868   :  { %v6806_v60 = vsel %vm6805_vm14, %v6801_v16, inf }
 0x869   :  { %6807 = vmin.xlane.f32.xlu0 %v6806_v60 }
 0x875   :  { %v6848_v61 = vpop.xlane.xlu1 %6847 }
 0x876   :  { %vm6849_vm15 = vcmp.eq.f32.partialorder %v6846_v63, %v6848_v61 }
 0x877   :  { %v6850_v22 = vsel %vm6849_vm15, %v6845_v33, inf }
 0x878   :  { %6851 = vmin.xlane.f32.xlu1 %v6850_v22 }
 0x879   :  { %8715 = shalt.err (!%p8712_p6)
}
 0x87a   :  { %s8716_s24 = scalar_lea.hbm %s9593_s9, 4096 }
 0x87b   :  { %p8717_p7 = scmp.ne.s32.totalorder %s9593_s9, %s8716_s24  ;;  %p8720_p8 = scmp.lt.u32.totalorder %s8716_s24, %s9593_s9 }
 0x87d   :  { %p8722_p9 = pnand %p8720_p8, %p8717_p7 }
 0x87f   :  { %8725 = shalt.err (!%p8722_p9)
}
 0x880   :  { %s8779_s25 = smov 2048   ;;  %s8780_s29 = smov 128  }
 0x881   :  { %6940 = dma.vmem_to_hbm [thread:$0]  %s6935_s27, 4096, %s9593_s9, [#allocation4], %s8779_s25, %s8779_s25, %s8780_s29  }
 0x882   :  { %s8726_s26 = scalar_lea.vmem %s9547_s19, 256  ;;  %p8731_p11 = scmp.lt.s32.totalorder %s9547_s19, %s9547_s19 }
 0x883   :  { %p8727_p10 = scmp.ne.s32.totalorder %s9547_s19, %s8726_s26  ;;  %p8732_p12 = scmp.lt.s32.totalorder %s8726_s26, %s8726_s26 }
 0x885   :  { %p8733_p13 = por %p8732_p12, %p8731_p11 }
 0x887   :  { %p8734_p0 = pnand %p8733_p13, %p8727_p10 }
 0x889   :  { %8737 = shalt.err (!%p8734_p0)
}
 0x88a   :  { %s8738_s13 = scalar_lea.hbm %s9594_s10, 256 }
 0x88b   :  { %p8739_p1 = scmp.ne.s32.totalorder %s9594_s10, %s8738_s13  ;;  %p8742_p2 = scmp.lt.u32.totalorder %s8738_s13, %s9594_s10 }
 0x88d   :  { %p8744_p3 = pnand %p8742_p2, %p8739_p1 }
 0x88f   :  { %8747 = shalt.err (!%p8744_p3)
}
 0x890   :  { %s8781_s9 = smov 8   ;;  %v6810_v17 = vcvt.f32.s32 %v6804_v36  ;;  %v6854_v48 = vcvt.f32.s32 %v6848_v61 }
 0x891   :  { %6952 = dma.vmem_to_hbm [thread:$0]  %s9547_s19, 256, %s9594_s10, [#allocation19], %s8780_s29, %s8780_s29, %s8781_s9  }
 0x892   :  { %v6811_v18 = vshll.u32 %v6810_v17, 16  ;;  %v6855_v38 = vshll.u32 %v6854_v48, 16 }
 0x8f6   :  { %v6808_v19 = vpop.xlane.xlu0 %6807 }
 0x8f7   :  { %v6809_v35 = vcvt.f32.s32 %v6808_v19 }
 0x8f9   :  { %v6812_v44 = vadd.s32 %v6811_v18, %v6809_v35 }
 0x8fb   :  { %6927 = vst [vmem:[%s9595_s11] sm:$0xff] %v6812_v44 }
 0x905   :  { %v6852_v7 = vpop.xlane.xlu1 %6851 }
 0x906   :  { %v6853_v12 = vcvt.f32.s32 %v6852_v7 }
 0x908   :  { %v6856_v4 = vadd.s32 %v6855_v38, %v6853_v12 }
 0x90a   :  { %6928 = vst [vmem:[%s9595_s11 + $0x8] sm:$0xff] %v6856_v4 }
 0x90b   :  { %8758 = dma.done.wait [#allocation4], 4096  }
 0x90c   :  { %8759 = vsyncadd [#allocation4], 4294963200 }
 0x90d   :  { %8760 = dma.done.wait [#allocation19], 256  }
 0x90e   :  { %8761 = vsyncadd [#allocation19], 4294967040 }
 0x90f   :  { %6963 = vsyncpa [#allocation3], 1 }
 0x910   :  { %6964 = vsyncpa [#allocation6], 1 }
 0x911   :  { %6965 = vsyncpa [#allocation9], 1 }
 0x912   :  { %6966 = vsyncpa [#allocation12], 1 }
 0x913   :  { %6967 = vsyncpa [#allocation15], 1 }
 0x914   :  { %6968 = vsyncpa [#allocation4], 1 }
 0x915   :  { %6969 = vsyncpa [#allocation19], 1 }

</bundles_post_ra>
